<compile_context>
chip_gen: v6e
topology: v6e:2x2x1
jax: 0.10.0
libtpu: 0.0.40
codegen_flags: <defaults>
</compile_context>

<pallas_src>
import functools

import jax
import jax.numpy as jnp
from jax.experimental import pallas as pl
from jax.experimental.pallas import tpu as pltpu


def _round_up(x, m):
    return ((x + m - 1) // m) * m


# --------------------------- fused LSTM + FC kernel ---------------------------
def _fused_lstm_fc_kernel(x_ref, wih_ref, whh_ref, b_ref, fcw_ref, fcb_ref,
                          out_ref, seq_sc, gates_sc):
    """All refs fully resident in VMEM (no grid).

    x_ref:    (T, Bp, Hp)     time-major input, zero padded
    wih_ref:  (L, Hp, 4*Hp)   per-layer input->gate weight (one 128-lane tile per gate)
    whh_ref:  (L, Hp, 4*Hp)   per-layer hidden->gate weight
    b_ref:    (L, 1, 4*Hp)    per-layer fused bias (b_ih + b_hh), gate-tile aligned
    fcw_ref:  (Hp, Op)        final Linear weight (padded)
    fcb_ref:  (1, Op)         final Linear bias (padded)
    out_ref:  (Bp, Op)
    seq_sc:   (T, Bp, Hp)     scratch: layer l's output sequence (input of layer l+1)
    gates_sc: (T, Bp, 4*Hp)   scratch: batched input->gate projection of current layer
    """
    T, Bp, Hp = x_ref.shape
    L = wih_ref.shape[0]

    h_last = jnp.zeros((Bp, Hp), jnp.float32)
    for layer in range(L):                              # static unroll over layers
        # ---- non-recurrent part: ONE big matmul over all T timesteps + bias ----
        in_seq = (x_ref if layer == 0 else seq_sc)[...].reshape(T * Bp, Hp)
        gx = jnp.dot(in_seq, wih_ref[layer], preferred_element_type=jnp.float32)
        gates_sc[...] = (gx + b_ref[layer]).reshape(T, Bp, 4 * Hp)

        write_seq = layer < L - 1                       # last layer: only h_{T-1} needed

        # ---- recurrent part: small hidden->gate matmul + elementwise per step ----
        def step(t, carry, layer=layer, write_seq=write_seq):
            h, c = carry
            gates = gates_sc[t] + jnp.dot(
                h, whh_ref[layer], preferred_element_type=jnp.float32)  # (Bp, 4*Hp)
            # PyTorch gate order i, f, g, o — each slice is a full lane-aligned tile
            i = jax.nn.sigmoid(gates[:, 0 * Hp:1 * Hp])
            f = jax.nn.sigmoid(gates[:, 1 * Hp:2 * Hp])
            g = jnp.tanh(gates[:, 2 * Hp:3 * Hp])
            o = jax.nn.sigmoid(gates[:, 3 * Hp:4 * Hp])
            c_new = f * c + i * g
            h_new = o * jnp.tanh(c_new)
            if write_seq:
                seq_sc[t] = h_new
            return h_new, c_new

        h0 = jnp.zeros((Bp, Hp), jnp.float32)           # h0 = c0 = 0 (torch.zeros)
        c0 = jnp.zeros((Bp, Hp), jnp.float32)
        h_last, _ = jax.lax.fori_loop(0, T, step, (h0, c0), unroll=True)

    # final Linear on the last timestep's hidden state (lane-dense store)
    out_ref[...] = (
        jnp.dot(h_last, fcw_ref[...], preferred_element_type=jnp.float32)
        + fcb_ref[...]
    )


# ------------------------------ parameter setup ------------------------------
def init_params(key, input_size, hidden_size, num_layers, output_size):
    """Deterministic init mirroring nn.LSTM / nn.Linear parameter shapes.

    PyTorch stores weight_ih_l{k}: (4H, in), weight_hh_l{k}: (4H, H); we keep them
    pre-transposed and fold b_ih + b_hh into a single (1, 4H) bias.
    """
    k = 1.0 / jnp.sqrt(jnp.float32(hidden_size))
    params = {"lstm": [], "fc_w": None, "fc_b": None}
    keys = jax.random.split(key, num_layers * 4 + 2)
    for layer in range(num_layers):
        in_dim = input_size if layer == 0 else hidden_size
        k0, k1, k2, k3 = keys[layer * 4: layer * 4 + 4]
        w_ih = jax.random.uniform(k0, (in_dim, 4 * hidden_size), jnp.float32, -k, k)
        w_hh = jax.random.uniform(k1, (hidden_size, 4 * hidden_size), jnp.float32, -k, k)
        b_ih = jax.random.uniform(k2, (4 * hidden_size,), jnp.float32, -k, k)
        b_hh = jax.random.uniform(k3, (4 * hidden_size,), jnp.float32, -k, k)
        params["lstm"].append(
            {"w_ih": w_ih, "w_hh": w_hh, "b": (b_ih + b_hh)[None, :]}
        )
    kw, kb = keys[-2], keys[-1]
    params["fc_w"] = jax.random.uniform(kw, (hidden_size, output_size), jnp.float32, -k, k)
    params["fc_b"] = jax.random.uniform(kb, (output_size,), jnp.float32, -k, k)[None, :]
    return params


def pack_params(params):
    """Pad nn.LSTM / nn.Linear params into lane/sublane-aligned kernel operands.

    Layout per layer l:
      wih (Hp, 4*Hp): rows [0:in_dim] valid, cols [g*Hp : g*Hp+H] hold gate g (i,f,g,o)
      whh (Hp, 4*Hp): rows [0:H]      valid, same gate-tile column layout
      b   (1, 4*Hp):  fused b_ih + b_hh, gate-tile aligned
    Each gate occupies its own multiple-of-128-lane tile; all padding is zero so the
    recurrence keeps padded rows/cols exactly zero.
    """
    H = params["lstm"][0]["w_hh"].shape[0]
    D = params["lstm"][0]["w_ih"].shape[0]
    O = params["fc_w"].shape[1]
    Hp = _round_up(max(D, H), 128)
    Op = _round_up(O, 128)

    wih_stack, whh_stack, b_stack = [], [], []
    for layer in params["lstm"]:
        w_ih, w_hh, b = layer["w_ih"], layer["w_hh"], layer["b"]
        in_dim = w_ih.shape[0]
        wih = jnp.zeros((Hp, 4 * Hp), jnp.float32)
        whh = jnp.zeros((Hp, 4 * Hp), jnp.float32)
        bf = jnp.zeros((1, 4 * Hp), jnp.float32)
        for g in range(4):
            wih = wih.at[:in_dim, g * Hp:g * Hp + H].set(w_ih[:, g * H:(g + 1) * H])
            whh = whh.at[:H, g * Hp:g * Hp + H].set(w_hh[:, g * H:(g + 1) * H])
            bf = bf.at[0, g * Hp:g * Hp + H].set(b[0, g * H:(g + 1) * H])
        wih_stack.append(wih)
        whh_stack.append(whh)
        b_stack.append(bf)

    return {
        "wih": jnp.stack(wih_stack),                                     # (L, Hp, 4Hp)
        "whh": jnp.stack(whh_stack),                                     # (L, Hp, 4Hp)
        "b": jnp.stack(b_stack),                                         # (L, 1, 4Hp)
        "fcw": jnp.zeros((Hp, Op), jnp.float32).at[:H, :O].set(params["fc_w"]),
        "fcb": jnp.zeros((1, Op), jnp.float32).at[:, :O].set(params["fc_b"]),
    }


# --------------------------------- forward -----------------------------------
@functools.partial(jax.jit, static_argnames=("output_size",))
def price_prediction_lstm(x, packed, *, output_size):
    """x: (batch, seq, input_size) -> (batch, output_size)."""
    B, T, D = x.shape
    Hp = packed["wih"].shape[1]
    Op = packed["fcw"].shape[1]
    Bp = _round_up(B, 8)

    # single small pad/transpose/cast into the time-major padded slab (fused XLA op)
    x_tm = jnp.zeros((T, Bp, Hp), jnp.float32)
    x_tm = x_tm.at[:, :B, :D].set(jnp.transpose(x, (1, 0, 2)).astype(jnp.float32))

    out_pad = pl.pallas_call(
        _fused_lstm_fc_kernel,
        out_shape=jax.ShapeDtypeStruct((Bp, Op), jnp.float32),
        scratch_shapes=[
            pltpu.VMEM((T, Bp, Hp), jnp.float32),        # inter-layer hidden sequence
            pltpu.VMEM((T, Bp, 4 * Hp), jnp.float32),    # batched input->gate projection
        ],
    )(x_tm, packed["wih"], packed["whh"], packed["b"], packed["fcw"], packed["fcb"])
    return out_pad[:B, :output_size]


# --------------------------- pure-JAX reference check -------------------------
def _reference(x, params):
    def cell(carry, x_t, w_ih, w_hh, b, H):
        h, c = carry
        gates = x_t @ w_ih + h @ w_hh + b
        i = jax.nn.sigmoid(gates[:, 0 * H:1 * H])
        f = jax.nn.sigmoid(gates[:, 1 * H:2 * H])
        g = jnp.tanh(gates[:, 2 * H:3 * H])
        o = jax.nn.sigmoid(gates[:, 3 * H:4 * H])
        c = f * c + i * g
        h = o * jnp.tanh(c)
        return (h, c), h

    seq = jnp.transpose(x, (1, 0, 2)).astype(jnp.float32)
    B = x.shape[0]
    for layer in params["lstm"]:
        H = layer["w_hh"].shape[0]
        carry = (jnp.zeros((B, H), jnp.float32), jnp.zeros((B, H), jnp.float32))
        _, seq = jax.lax.scan(
            lambda c, xt: cell(c, xt, layer["w_ih"], layer["w_hh"], layer["b"], H),
            carry, seq)
    return seq[-1] @ params["fc_w"] + params["fc_b"]


if __name__ == "__main__":
    batch, seq, input_size = 2, 8, 4
    hidden_size, num_layers, output_size = 32, 2, 1

    key = jax.random.PRNGKey(0)
    kx, kp = jax.random.split(key)
    x = jax.random.normal(kx, (batch, seq, input_size), jnp.float32)
    params = init_params(kp, input_size, hidden_size, num_layers, output_size)
    packed = pack_params(params)

    out = price_prediction_lstm(x, packed, output_size=output_size)
    out = jax.block_until_ready(out)

    ref = _reference(x, params)
    assert out.shape == (batch, output_size), out.shape
    assert jnp.allclose(out, ref, atol=1e-5, rtol=1e-5), (out, ref)

    print("KERNEL_OK")
</pallas_src>

<mosaic_0001>
module attributes {stable_mosaic.version = 11 : i64} {
  func.func @_fused_lstm_fc_kernel(%arg0: memref<8x8x128xf32, #tpu.memory_space<vmem>>, %arg1: memref<2x128x512xf32, #tpu.memory_space<vmem>>, %arg2: memref<2x128x512xf32, #tpu.memory_space<vmem>>, %arg3: memref<2x1x512xf32, #tpu.memory_space<vmem>>, %arg4: memref<128x128xf32, #tpu.memory_space<vmem>>, %arg5: memref<1x128xf32, #tpu.memory_space<vmem>>, %arg6: memref<8x128xf32, #tpu.memory_space<vmem>>, %arg7: memref<8x8x128xf32, #tpu.memory_space<vmem>>, %arg8: memref<8x8x512xf32, #tpu.memory_space<vmem>>) attributes {dimension_semantics = [], scalar_prefetch = 0 : i64, scratch_operands = 2 : i64, tpu.core_type = #tpu.core_type<tc>} {
    %c0 = arith.constant 0 : index
    %c0_0 = arith.constant 0 : index
    %c0_1 = arith.constant 0 : index
    %0 = vector.load %arg0[%c0, %c0_0, %c0_1] : memref<8x8x128xf32, #tpu.memory_space<vmem>>, vector<8x8x128xf32>
    %1 = vector.shape_cast %0 : vector<8x8x128xf32> to vector<64x128xf32>
    %c0_2 = arith.constant 0 : index
    %c0_3 = arith.constant 0 : index
    %c0_4 = arith.constant 0 : index
    %2 = vector.load %arg1[%c0_2, %c0_3, %c0_4] : memref<2x128x512xf32, #tpu.memory_space<vmem>>, vector<1x128x512xf32>
    %3 = vector.shape_cast %2 : vector<1x128x512xf32> to vector<128x512xf32>
    %cst = arith.constant dense<0.000000e+00> : vector<64x512xf32>
    %4 = tpu.matmul %1, %3, %cst {dimension_numbers = #tpu.dot_dimension_numbers<[1], [0], [0], [1], [0, 0, 1, 1], [], []>} : vector<64x128xf32>, vector<128x512xf32>, vector<64x512xf32> -> vector<64x512xf32>
    %c0_5 = arith.constant 0 : index
    %c0_6 = arith.constant 0 : index
    %c0_7 = arith.constant 0 : index
    %5 = vector.load %arg3[%c0_5, %c0_6, %c0_7] : memref<2x1x512xf32, #tpu.memory_space<vmem>>, vector<1x1x512xf32>
    %6 = vector.shape_cast %5 : vector<1x1x512xf32> to vector<1x512xf32>
    %7 = vector.broadcast %6 : vector<1x512xf32> to vector<64x512xf32>
    %8 = arith.addf %4, %7 : vector<64x512xf32>
    %9 = vector.shape_cast %8 : vector<64x512xf32> to vector<8x8x512xf32>
    %c0_8 = arith.constant 0 : index
    %c0_9 = arith.constant 0 : index
    %c0_10 = arith.constant 0 : index
    %10 = vector.load %arg8[%c0_8, %c0_9, %c0_10] : memref<8x8x512xf32, #tpu.memory_space<vmem>>, vector<8x8x512xf32>
    tpu.vector_store %arg8[%c0_8, %c0_9, %c0_10], %9 {strides = array<i32>} : memref<8x8x512xf32, #tpu.memory_space<vmem>>, vector<8x8x512xf32>,
    %cst_11 = arith.constant 0.000000e+00 : f32
    %11 = vector.broadcast %cst_11 : f32 to vector<8x128xf32>
    %cst_12 = arith.constant 0.000000e+00 : f32
    %12 = vector.broadcast %cst_12 : f32 to vector<8x128xf32>
    %c0_i32 = arith.constant 0 : i32
    %13 = arith.index_cast %c0_i32 : i32 to index
    %c0_13 = arith.constant 0 : index
    %c0_14 = arith.constant 0 : index
    %14 = vector.load %arg8[%13, %c0_13, %c0_14] : memref<8x8x512xf32, #tpu.memory_space<vmem>>, vector<1x8x512xf32>
    %15 = vector.shape_cast %14 : vector<1x8x512xf32> to vector<8x512xf32>
    %c0_15 = arith.constant 0 : index
    %c0_16 = arith.constant 0 : index
    %c0_17 = arith.constant 0 : index
    %16 = vector.load %arg2[%c0_15, %c0_16, %c0_17] : memref<2x128x512xf32, #tpu.memory_space<vmem>>, vector<1x128x512xf32>
    %17 = vector.shape_cast %16 : vector<1x128x512xf32> to vector<128x512xf32>
    %cst_18 = arith.constant dense<0.000000e+00> : vector<8x512xf32>
    %18 = tpu.matmul %11, %17, %cst_18 {dimension_numbers = #tpu.dot_dimension_numbers<[1], [0], [0], [1], [0, 0, 1, 1], [], []>} : vector<8x128xf32>, vector<128x512xf32>, vector<8x512xf32> -> vector<8x512xf32>
    %19 = arith.addf %15, %18 : vector<8x512xf32>
    %20 = vector.extract_strided_slice %19 {offsets = [0, 0], sizes = [8, 128], strides = [1, 1]} : vector<8x512xf32> to vector<8x128xf32>
    %21 = arith.negf %20 : vector<8x128xf32>
    %22 = math.exp %21 : vector<8x128xf32>
    %cst_19 = arith.constant 1.000000e+00 : f32
    %23 = vector.broadcast %cst_19 : f32 to vector<8x128xf32>
    %24 = arith.addf %23, %22 : vector<8x128xf32>
    %25 = arith.divf %23, %24 : vector<8x128xf32>
    %26 = vector.extract_strided_slice %19 {offsets = [0, 128], sizes = [8, 128], strides = [1, 1]} : vector<8x512xf32> to vector<8x128xf32>
    %27 = arith.negf %26 : vector<8x128xf32>
    %28 = math.exp %27 : vector<8x128xf32>
    %cst_20 = arith.constant 1.000000e+00 : f32
    %29 = vector.broadcast %cst_20 : f32 to vector<8x128xf32>
    %30 = arith.addf %29, %28 : vector<8x128xf32>
    %31 = arith.divf %29, %30 : vector<8x128xf32>
    %32 = vector.extract_strided_slice %19 {offsets = [0, 256], sizes = [8, 128], strides = [1, 1]} : vector<8x512xf32> to vector<8x128xf32>
    %33 = math.tanh %32 : vector<8x128xf32>
    %34 = vector.extract_strided_slice %19 {offsets = [0, 384], sizes = [8, 128], strides = [1, 1]} : vector<8x512xf32> to vector<8x128xf32>
    %35 = arith.negf %34 : vector<8x128xf32>
    %36 = math.exp %35 : vector<8x128xf32>
    %cst_21 = arith.constant 1.000000e+00 : f32
    %37 = vector.broadcast %cst_21 : f32 to vector<8x128xf32>
    %38 = arith.addf %37, %36 : vector<8x128xf32>
    %39 = arith.divf %37, %38 : vector<8x128xf32>
    %40 = arith.mulf %31, %12 : vector<8x128xf32>
    %41 = arith.mulf %25, %33 : vector<8x128xf32>
    %42 = arith.addf %40, %41 : vector<8x128xf32>
    %43 = math.tanh %42 : vector<8x128xf32>
    %44 = arith.mulf %39, %43 : vector<8x128xf32>
    %45 = arith.index_cast %c0_i32 : i32 to index
    %c0_22 = arith.constant 0 : index
    %c0_23 = arith.constant 0 : index
    %46 = vector.load %arg7[%45, %c0_22, %c0_23] : memref<8x8x128xf32, #tpu.memory_space<vmem>>, vector<1x8x128xf32>
    %47 = vector.shape_cast %46 : vector<1x8x128xf32> to vector<8x128xf32>
    %48 = vector.shape_cast %44 : vector<8x128xf32> to vector<1x8x128xf32>
    tpu.vector_store %arg7[%45, %c0_22, %c0_23], %48 {strides = array<i32>} : memref<8x8x128xf32, #tpu.memory_space<vmem>>, vector<1x8x128xf32>,
    %c1_i32 = arith.constant 1 : i32
    %49 = arith.index_cast %c1_i32 : i32 to index
    %c0_24 = arith.constant 0 : index
    %c0_25 = arith.constant 0 : index
    %50 = vector.load %arg8[%49, %c0_24, %c0_25] : memref<8x8x512xf32, #tpu.memory_space<vmem>>, vector<1x8x512xf32>
    %51 = vector.shape_cast %50 : vector<1x8x512xf32> to vector<8x512xf32>
    %c0_26 = arith.constant 0 : index
    %c0_27 = arith.constant 0 : index
    %c0_28 = arith.constant 0 : index
    %52 = vector.load %arg2[%c0_26, %c0_27, %c0_28] : memref<2x128x512xf32, #tpu.memory_space<vmem>>, vector<1x128x512xf32>
    %53 = vector.shape_cast %52 : vector<1x128x512xf32> to vector<128x512xf32>
    %cst_29 = arith.constant dense<0.000000e+00> : vector<8x512xf32>
    %54 = tpu.matmul %44, %53, %cst_29 {dimension_numbers = #tpu.dot_dimension_numbers<[1], [0], [0], [1], [0, 0, 1, 1], [], []>} : vector<8x128xf32>, vector<128x512xf32>, vector<8x512xf32> -> vector<8x512xf32>
    %55 = arith.addf %51, %54 : vector<8x512xf32>
    %56 = vector.extract_strided_slice %55 {offsets = [0, 0], sizes = [8, 128], strides = [1, 1]} : vector<8x512xf32> to vector<8x128xf32>
    %57 = arith.negf %56 : vector<8x128xf32>
    %58 = math.exp %57 : vector<8x128xf32>
    %cst_30 = arith.constant 1.000000e+00 : f32
    %59 = vector.broadcast %cst_30 : f32 to vector<8x128xf32>
    %60 = arith.addf %59, %58 : vector<8x128xf32>
    %61 = arith.divf %59, %60 : vector<8x128xf32>
    %62 = vector.extract_strided_slice %55 {offsets = [0, 128], sizes = [8, 128], strides = [1, 1]} : vector<8x512xf32> to vector<8x128xf32>
    %63 = arith.negf %62 : vector<8x128xf32>
    %64 = math.exp %63 : vector<8x128xf32>
    %cst_31 = arith.constant 1.000000e+00 : f32
    %65 = vector.broadcast %cst_31 : f32 to vector<8x128xf32>
    %66 = arith.addf %65, %64 : vector<8x128xf32>
    %67 = arith.divf %65, %66 : vector<8x128xf32>
    %68 = vector.extract_strided_slice %55 {offsets = [0, 256], sizes = [8, 128], strides = [1, 1]} : vector<8x512xf32> to vector<8x128xf32>
    %69 = math.tanh %68 : vector<8x128xf32>
    %70 = vector.extract_strided_slice %55 {offsets = [0, 384], sizes = [8, 128], strides = [1, 1]} : vector<8x512xf32> to vector<8x128xf32>
    %71 = arith.negf %70 : vector<8x128xf32>
    %72 = math.exp %71 : vector<8x128xf32>
    %cst_32 = arith.constant 1.000000e+00 : f32
    %73 = vector.broadcast %cst_32 : f32 to vector<8x128xf32>
    %74 = arith.addf %73, %72 : vector<8x128xf32>
    %75 = arith.divf %73, %74 : vector<8x128xf32>
    %76 = arith.mulf %67, %42 : vector<8x128xf32>
    %77 = arith.mulf %61, %69 : vector<8x128xf32>
    %78 = arith.addf %76, %77 : vector<8x128xf32>
    %79 = math.tanh %78 : vector<8x128xf32>
    %80 = arith.mulf %75, %79 : vector<8x128xf32>
    %81 = arith.index_cast %c1_i32 : i32 to index
    %c0_33 = arith.constant 0 : index
    %c0_34 = arith.constant 0 : index
    %82 = vector.load %arg7[%81, %c0_33, %c0_34] : memref<8x8x128xf32, #tpu.memory_space<vmem>>, vector<1x8x128xf32>
    %83 = vector.shape_cast %82 : vector<1x8x128xf32> to vector<8x128xf32>
    %84 = vector.shape_cast %80 : vector<8x128xf32> to vector<1x8x128xf32>
    tpu.vector_store %arg7[%81, %c0_33, %c0_34], %84 {strides = array<i32>} : memref<8x8x128xf32, #tpu.memory_space<vmem>>, vector<1x8x128xf32>,
    %c2_i32 = arith.constant 2 : i32
    %85 = arith.index_cast %c2_i32 : i32 to index
    %c0_35 = arith.constant 0 : index
    %c0_36 = arith.constant 0 : index
    %86 = vector.load %arg8[%85, %c0_35, %c0_36] : memref<8x8x512xf32, #tpu.memory_space<vmem>>, vector<1x8x512xf32>
    %87 = vector.shape_cast %86 : vector<1x8x512xf32> to vector<8x512xf32>
    %c0_37 = arith.constant 0 : index
    %c0_38 = arith.constant 0 : index
    %c0_39 = arith.constant 0 : index
    %88 = vector.load %arg2[%c0_37, %c0_38, %c0_39] : memref<2x128x512xf32, #tpu.memory_space<vmem>>, vector<1x128x512xf32>
    %89 = vector.shape_cast %88 : vector<1x128x512xf32> to vector<128x512xf32>
    %cst_40 = arith.constant dense<0.000000e+00> : vector<8x512xf32>
    %90 = tpu.matmul %80, %89, %cst_40 {dimension_numbers = #tpu.dot_dimension_numbers<[1], [0], [0], [1], [0, 0, 1, 1], [], []>} : vector<8x128xf32>, vector<128x512xf32>, vector<8x512xf32> -> vector<8x512xf32>
    %91 = arith.addf %87, %90 : vector<8x512xf32>
    %92 = vector.extract_strided_slice %91 {offsets = [0, 0], sizes = [8, 128], strides = [1, 1]} : vector<8x512xf32> to vector<8x128xf32>
    %93 = arith.negf %92 : vector<8x128xf32>
    %94 = math.exp %93 : vector<8x128xf32>
    %cst_41 = arith.constant 1.000000e+00 : f32
    %95 = vector.broadcast %cst_41 : f32 to vector<8x128xf32>
    %96 = arith.addf %95, %94 : vector<8x128xf32>
    %97 = arith.divf %95, %96 : vector<8x128xf32>
    %98 = vector.extract_strided_slice %91 {offsets = [0, 128], sizes = [8, 128], strides = [1, 1]} : vector<8x512xf32> to vector<8x128xf32>
    %99 = arith.negf %98 : vector<8x128xf32>
    %100 = math.exp %99 : vector<8x128xf32>
    %cst_42 = arith.constant 1.000000e+00 : f32
    %101 = vector.broadcast %cst_42 : f32 to vector<8x128xf32>
    %102 = arith.addf %101, %100 : vector<8x128xf32>
    %103 = arith.divf %101, %102 : vector<8x128xf32>
    %104 = vector.extract_strided_slice %91 {offsets = [0, 256], sizes = [8, 128], strides = [1, 1]} : vector<8x512xf32> to vector<8x128xf32>
    %105 = math.tanh %104 : vector<8x128xf32>
    %106 = vector.extract_strided_slice %91 {offsets = [0, 384], sizes = [8, 128], strides = [1, 1]} : vector<8x512xf32> to vector<8x128xf32>
    %107 = arith.negf %106 : vector<8x128xf32>
    %108 = math.exp %107 : vector<8x128xf32>
    %cst_43 = arith.constant 1.000000e+00 : f32
    %109 = vector.broadcast %cst_43 : f32 to vector<8x128xf32>
    %110 = arith.addf %109, %108 : vector<8x128xf32>
    %111 = arith.divf %109, %110 : vector<8x128xf32>
    %112 = arith.mulf %103, %78 : vector<8x128xf32>
    %113 = arith.mulf %97, %105 : vector<8x128xf32>
    %114 = arith.addf %112, %113 : vector<8x128xf32>
    %115 = math.tanh %114 : vector<8x128xf32>
    %116 = arith.mulf %111, %115 : vector<8x128xf32>
    %117 = arith.index_cast %c2_i32 : i32 to index
    %c0_44 = arith.constant 0 : index
    %c0_45 = arith.constant 0 : index
    %118 = vector.load %arg7[%117, %c0_44, %c0_45] : memref<8x8x128xf32, #tpu.memory_space<vmem>>, vector<1x8x128xf32>
    %119 = vector.shape_cast %118 : vector<1x8x128xf32> to vector<8x128xf32>
    %120 = vector.shape_cast %116 : vector<8x128xf32> to vector<1x8x128xf32>
    tpu.vector_store %arg7[%117, %c0_44, %c0_45], %120 {strides = array<i32>} : memref<8x8x128xf32, #tpu.memory_space<vmem>>, vector<1x8x128xf32>,
    %c3_i32 = arith.constant 3 : i32
    %121 = arith.index_cast %c3_i32 : i32 to index
    %c0_46 = arith.constant 0 : index
    %c0_47 = arith.constant 0 : index
    %122 = vector.load %arg8[%121, %c0_46, %c0_47] : memref<8x8x512xf32, #tpu.memory_space<vmem>>, vector<1x8x512xf32>
    %123 = vector.shape_cast %122 : vector<1x8x512xf32> to vector<8x512xf32>
    %c0_48 = arith.constant 0 : index
    %c0_49 = arith.constant 0 : index
    %c0_50 = arith.constant 0 : index
    %124 = vector.load %arg2[%c0_48, %c0_49, %c0_50] : memref<2x128x512xf32, #tpu.memory_space<vmem>>, vector<1x128x512xf32>
    %125 = vector.shape_cast %124 : vector<1x128x512xf32> to vector<128x512xf32>
    %cst_51 = arith.constant dense<0.000000e+00> : vector<8x512xf32>
    %126 = tpu.matmul %116, %125, %cst_51 {dimension_numbers = #tpu.dot_dimension_numbers<[1], [0], [0], [1], [0, 0, 1, 1], [], []>} : vector<8x128xf32>, vector<128x512xf32>, vector<8x512xf32> -> vector<8x512xf32>
    %127 = arith.addf %123, %126 : vector<8x512xf32>
    %128 = vector.extract_strided_slice %127 {offsets = [0, 0], sizes = [8, 128], strides = [1, 1]} : vector<8x512xf32> to vector<8x128xf32>
    %129 = arith.negf %128 : vector<8x128xf32>
    %130 = math.exp %129 : vector<8x128xf32>
    %cst_52 = arith.constant 1.000000e+00 : f32
    %131 = vector.broadcast %cst_52 : f32 to vector<8x128xf32>
    %132 = arith.addf %131, %130 : vector<8x128xf32>
    %133 = arith.divf %131, %132 : vector<8x128xf32>
    %134 = vector.extract_strided_slice %127 {offsets = [0, 128], sizes = [8, 128], strides = [1, 1]} : vector<8x512xf32> to vector<8x128xf32>
    %135 = arith.negf %134 : vector<8x128xf32>
    %136 = math.exp %135 : vector<8x128xf32>
    %cst_53 = arith.constant 1.000000e+00 : f32
    %137 = vector.broadcast %cst_53 : f32 to vector<8x128xf32>
    %138 = arith.addf %137, %136 : vector<8x128xf32>
    %139 = arith.divf %137, %138 : vector<8x128xf32>
    %140 = vector.extract_strided_slice %127 {offsets = [0, 256], sizes = [8, 128], strides = [1, 1]} : vector<8x512xf32> to vector<8x128xf32>
    %141 = math.tanh %140 : vector<8x128xf32>
    %142 = vector.extract_strided_slice %127 {offsets = [0, 384], sizes = [8, 128], strides = [1, 1]} : vector<8x512xf32> to vector<8x128xf32>
    %143 = arith.negf %142 : vector<8x128xf32>
    %144 = math.exp %143 : vector<8x128xf32>
    %cst_54 = arith.constant 1.000000e+00 : f32
    %145 = vector.broadcast %cst_54 : f32 to vector<8x128xf32>
    %146 = arith.addf %145, %144 : vector<8x128xf32>
    %147 = arith.divf %145, %146 : vector<8x128xf32>
    %148 = arith.mulf %139, %114 : vector<8x128xf32>
    %149 = arith.mulf %133, %141 : vector<8x128xf32>
    %150 = arith.addf %148, %149 : vector<8x128xf32>
    %151 = math.tanh %150 : vector<8x128xf32>
    %152 = arith.mulf %147, %151 : vector<8x128xf32>
    %153 = arith.index_cast %c3_i32 : i32 to index
    %c0_55 = arith.constant 0 : index
    %c0_56 = arith.constant 0 : index
    %154 = vector.load %arg7[%153, %c0_55, %c0_56] : memref<8x8x128xf32, #tpu.memory_space<vmem>>, vector<1x8x128xf32>
    %155 = vector.shape_cast %154 : vector<1x8x128xf32> to vector<8x128xf32>
    %156 = vector.shape_cast %152 : vector<8x128xf32> to vector<1x8x128xf32>
    tpu.vector_store %arg7[%153, %c0_55, %c0_56], %156 {strides = array<i32>} : memref<8x8x128xf32, #tpu.memory_space<vmem>>, vector<1x8x128xf32>,
    %c4_i32 = arith.constant 4 : i32
    %157 = arith.index_cast %c4_i32 : i32 to index
    %c0_57 = arith.constant 0 : index
    %c0_58 = arith.constant 0 : index
    %158 = vector.load %arg8[%157, %c0_57, %c0_58] : memref<8x8x512xf32, #tpu.memory_space<vmem>>, vector<1x8x512xf32>
    %159 = vector.shape_cast %158 : vector<1x8x512xf32> to vector<8x512xf32>
    %c0_59 = arith.constant 0 : index
    %c0_60 = arith.constant 0 : index
    %c0_61 = arith.constant 0 : index
    %160 = vector.load %arg2[%c0_59, %c0_60, %c0_61] : memref<2x128x512xf32, #tpu.memory_space<vmem>>, vector<1x128x512xf32>
    %161 = vector.shape_cast %160 : vector<1x128x512xf32> to vector<128x512xf32>
    %cst_62 = arith.constant dense<0.000000e+00> : vector<8x512xf32>
    %162 = tpu.matmul %152, %161, %cst_62 {dimension_numbers = #tpu.dot_dimension_numbers<[1], [0], [0], [1], [0, 0, 1, 1], [], []>} : vector<8x128xf32>, vector<128x512xf32>, vector<8x512xf32> -> vector<8x512xf32>
    %163 = arith.addf %159, %162 : vector<8x512xf32>
    %164 = vector.extract_strided_slice %163 {offsets = [0, 0], sizes = [8, 128], strides = [1, 1]} : vector<8x512xf32> to vector<8x128xf32>
    %165 = arith.negf %164 : vector<8x128xf32>
    %166 = math.exp %165 : vector<8x128xf32>
    %cst_63 = arith.constant 1.000000e+00 : f32
    %167 = vector.broadcast %cst_63 : f32 to vector<8x128xf32>
    %168 = arith.addf %167, %166 : vector<8x128xf32>
    %169 = arith.divf %167, %168 : vector<8x128xf32>
    %170 = vector.extract_strided_slice %163 {offsets = [0, 128], sizes = [8, 128], strides = [1, 1]} : vector<8x512xf32> to vector<8x128xf32>
    %171 = arith.negf %170 : vector<8x128xf32>
    %172 = math.exp %171 : vector<8x128xf32>
    %cst_64 = arith.constant 1.000000e+00 : f32
    %173 = vector.broadcast %cst_64 : f32 to vector<8x128xf32>
    %174 = arith.addf %173, %172 : vector<8x128xf32>
    %175 = arith.divf %173, %174 : vector<8x128xf32>
    %176 = vector.extract_strided_slice %163 {offsets = [0, 256], sizes = [8, 128], strides = [1, 1]} : vector<8x512xf32> to vector<8x128xf32>
    %177 = math.tanh %176 : vector<8x128xf32>
    %178 = vector.extract_strided_slice %163 {offsets = [0, 384], sizes = [8, 128], strides = [1, 1]} : vector<8x512xf32> to vector<8x128xf32>
    %179 = arith.negf %178 : vector<8x128xf32>
    %180 = math.exp %179 : vector<8x128xf32>
    %cst_65 = arith.constant 1.000000e+00 : f32
    %181 = vector.broadcast %cst_65 : f32 to vector<8x128xf32>
    %182 = arith.addf %181, %180 : vector<8x128xf32>
    %183 = arith.divf %181, %182 : vector<8x128xf32>
    %184 = arith.mulf %175, %150 : vector<8x128xf32>
    %185 = arith.mulf %169, %177 : vector<8x128xf32>
    %186 = arith.addf %184, %185 : vector<8x128xf32>
    %187 = math.tanh %186 : vector<8x128xf32>
    %188 = arith.mulf %183, %187 : vector<8x128xf32>
    %189 = arith.index_cast %c4_i32 : i32 to index
    %c0_66 = arith.constant 0 : index
    %c0_67 = arith.constant 0 : index
    %190 = vector.load %arg7[%189, %c0_66, %c0_67] : memref<8x8x128xf32, #tpu.memory_space<vmem>>, vector<1x8x128xf32>
    %191 = vector.shape_cast %190 : vector<1x8x128xf32> to vector<8x128xf32>
    %192 = vector.shape_cast %188 : vector<8x128xf32> to vector<1x8x128xf32>
    tpu.vector_store %arg7[%189, %c0_66, %c0_67], %192 {strides = array<i32>} : memref<8x8x128xf32, #tpu.memory_space<vmem>>, vector<1x8x128xf32>,
    %c5_i32 = arith.constant 5 : i32
    %193 = arith.index_cast %c5_i32 : i32 to index
    %c0_68 = arith.constant 0 : index
    %c0_69 = arith.constant 0 : index
    %194 = vector.load %arg8[%193, %c0_68, %c0_69] : memref<8x8x512xf32, #tpu.memory_space<vmem>>, vector<1x8x512xf32>
    %195 = vector.shape_cast %194 : vector<1x8x512xf32> to vector<8x512xf32>
    %c0_70 = arith.constant 0 : index
    %c0_71 = arith.constant 0 : index
    %c0_72 = arith.constant 0 : index
    %196 = vector.load %arg2[%c0_70, %c0_71, %c0_72] : memref<2x128x512xf32, #tpu.memory_space<vmem>>, vector<1x128x512xf32>
    %197 = vector.shape_cast %196 : vector<1x128x512xf32> to vector<128x512xf32>
    %cst_73 = arith.constant dense<0.000000e+00> : vector<8x512xf32>
    %198 = tpu.matmul %188, %197, %cst_73 {dimension_numbers = #tpu.dot_dimension_numbers<[1], [0], [0], [1], [0, 0, 1, 1], [], []>} : vector<8x128xf32>, vector<128x512xf32>, vector<8x512xf32> -> vector<8x512xf32>
    %199 = arith.addf %195, %198 : vector<8x512xf32>
    %200 = vector.extract_strided_slice %199 {offsets = [0, 0], sizes = [8, 128], strides = [1, 1]} : vector<8x512xf32> to vector<8x128xf32>
    %201 = arith.negf %200 : vector<8x128xf32>
    %202 = math.exp %201 : vector<8x128xf32>
    %cst_74 = arith.constant 1.000000e+00 : f32
    %203 = vector.broadcast %cst_74 : f32 to vector<8x128xf32>
    %204 = arith.addf %203, %202 : vector<8x128xf32>
    %205 = arith.divf %203, %204 : vector<8x128xf32>
    %206 = vector.extract_strided_slice %199 {offsets = [0, 128], sizes = [8, 128], strides = [1, 1]} : vector<8x512xf32> to vector<8x128xf32>
    %207 = arith.negf %206 : vector<8x128xf32>
    %208 = math.exp %207 : vector<8x128xf32>
    %cst_75 = arith.constant 1.000000e+00 : f32
    %209 = vector.broadcast %cst_75 : f32 to vector<8x128xf32>
    %210 = arith.addf %209, %208 : vector<8x128xf32>
    %211 = arith.divf %209, %210 : vector<8x128xf32>
    %212 = vector.extract_strided_slice %199 {offsets = [0, 256], sizes = [8, 128], strides = [1, 1]} : vector<8x512xf32> to vector<8x128xf32>
    %213 = math.tanh %212 : vector<8x128xf32>
    %214 = vector.extract_strided_slice %199 {offsets = [0, 384], sizes = [8, 128], strides = [1, 1]} : vector<8x512xf32> to vector<8x128xf32>
    %215 = arith.negf %214 : vector<8x128xf32>
    %216 = math.exp %215 : vector<8x128xf32>
    %cst_76 = arith.constant 1.000000e+00 : f32
    %217 = vector.broadcast %cst_76 : f32 to vector<8x128xf32>
    %218 = arith.addf %217, %216 : vector<8x128xf32>
    %219 = arith.divf %217, %218 : vector<8x128xf32>
    %220 = arith.mulf %211, %186 : vector<8x128xf32>
    %221 = arith.mulf %205, %213 : vector<8x128xf32>
    %222 = arith.addf %220, %221 : vector<8x128xf32>
    %223 = math.tanh %222 : vector<8x128xf32>
    %224 = arith.mulf %219, %223 : vector<8x128xf32>
    %225 = arith.index_cast %c5_i32 : i32 to index
    %c0_77 = arith.constant 0 : index
    %c0_78 = arith.constant 0 : index
    %226 = vector.load %arg7[%225, %c0_77, %c0_78] : memref<8x8x128xf32, #tpu.memory_space<vmem>>, vector<1x8x128xf32>
    %227 = vector.shape_cast %226 : vector<1x8x128xf32> to vector<8x128xf32>
    %228 = vector.shape_cast %224 : vector<8x128xf32> to vector<1x8x128xf32>
    tpu.vector_store %arg7[%225, %c0_77, %c0_78], %228 {strides = array<i32>} : memref<8x8x128xf32, #tpu.memory_space<vmem>>, vector<1x8x128xf32>,
    %c6_i32 = arith.constant 6 : i32
    %229 = arith.index_cast %c6_i32 : i32 to index
    %c0_79 = arith.constant 0 : index
    %c0_80 = arith.constant 0 : index
    %230 = vector.load %arg8[%229, %c0_79, %c0_80] : memref<8x8x512xf32, #tpu.memory_space<vmem>>, vector<1x8x512xf32>
    %231 = vector.shape_cast %230 : vector<1x8x512xf32> to vector<8x512xf32>
    %c0_81 = arith.constant 0 : index
    %c0_82 = arith.constant 0 : index
    %c0_83 = arith.constant 0 : index
    %232 = vector.load %arg2[%c0_81, %c0_82, %c0_83] : memref<2x128x512xf32, #tpu.memory_space<vmem>>, vector<1x128x512xf32>
    %233 = vector.shape_cast %232 : vector<1x128x512xf32> to vector<128x512xf32>
    %cst_84 = arith.constant dense<0.000000e+00> : vector<8x512xf32>
    %234 = tpu.matmul %224, %233, %cst_84 {dimension_numbers = #tpu.dot_dimension_numbers<[1], [0], [0], [1], [0, 0, 1, 1], [], []>} : vector<8x128xf32>, vector<128x512xf32>, vector<8x512xf32> -> vector<8x512xf32>
    %235 = arith.addf %231, %234 : vector<8x512xf32>
    %236 = vector.extract_strided_slice %235 {offsets = [0, 0], sizes = [8, 128], strides = [1, 1]} : vector<8x512xf32> to vector<8x128xf32>
    %237 = arith.negf %236 : vector<8x128xf32>
    %238 = math.exp %237 : vector<8x128xf32>
    %cst_85 = arith.constant 1.000000e+00 : f32
    %239 = vector.broadcast %cst_85 : f32 to vector<8x128xf32>
    %240 = arith.addf %239, %238 : vector<8x128xf32>
    %241 = arith.divf %239, %240 : vector<8x128xf32>
    %242 = vector.extract_strided_slice %235 {offsets = [0, 128], sizes = [8, 128], strides = [1, 1]} : vector<8x512xf32> to vector<8x128xf32>
    %243 = arith.negf %242 : vector<8x128xf32>
    %244 = math.exp %243 : vector<8x128xf32>
    %cst_86 = arith.constant 1.000000e+00 : f32
    %245 = vector.broadcast %cst_86 : f32 to vector<8x128xf32>
    %246 = arith.addf %245, %244 : vector<8x128xf32>
    %247 = arith.divf %245, %246 : vector<8x128xf32>
    %248 = vector.extract_strided_slice %235 {offsets = [0, 256], sizes = [8, 128], strides = [1, 1]} : vector<8x512xf32> to vector<8x128xf32>
    %249 = math.tanh %248 : vector<8x128xf32>
    %250 = vector.extract_strided_slice %235 {offsets = [0, 384], sizes = [8, 128], strides = [1, 1]} : vector<8x512xf32> to vector<8x128xf32>
    %251 = arith.negf %250 : vector<8x128xf32>
    %252 = math.exp %251 : vector<8x128xf32>
    %cst_87 = arith.constant 1.000000e+00 : f32
    %253 = vector.broadcast %cst_87 : f32 to vector<8x128xf32>
    %254 = arith.addf %253, %252 : vector<8x128xf32>
    %255 = arith.divf %253, %254 : vector<8x128xf32>
    %256 = arith.mulf %247, %222 : vector<8x128xf32>
    %257 = arith.mulf %241, %249 : vector<8x128xf32>
    %258 = arith.addf %256, %257 : vector<8x128xf32>
    %259 = math.tanh %258 : vector<8x128xf32>
    %260 = arith.mulf %255, %259 : vector<8x128xf32>
    %261 = arith.index_cast %c6_i32 : i32 to index
    %c0_88 = arith.constant 0 : index
    %c0_89 = arith.constant 0 : index
    %262 = vector.load %arg7[%261, %c0_88, %c0_89] : memref<8x8x128xf32, #tpu.memory_space<vmem>>, vector<1x8x128xf32>
    %263 = vector.shape_cast %262 : vector<1x8x128xf32> to vector<8x128xf32>
    %264 = vector.shape_cast %260 : vector<8x128xf32> to vector<1x8x128xf32>
    tpu.vector_store %arg7[%261, %c0_88, %c0_89], %264 {strides = array<i32>} : memref<8x8x128xf32, #tpu.memory_space<vmem>>, vector<1x8x128xf32>,
    %c7_i32 = arith.constant 7 : i32
    %265 = arith.index_cast %c7_i32 : i32 to index
    %c0_90 = arith.constant 0 : index
    %c0_91 = arith.constant 0 : index
    %266 = vector.load %arg8[%265, %c0_90, %c0_91] : memref<8x8x512xf32, #tpu.memory_space<vmem>>, vector<1x8x512xf32>
    %267 = vector.shape_cast %266 : vector<1x8x512xf32> to vector<8x512xf32>
    %c0_92 = arith.constant 0 : index
    %c0_93 = arith.constant 0 : index
    %c0_94 = arith.constant 0 : index
    %268 = vector.load %arg2[%c0_92, %c0_93, %c0_94] : memref<2x128x512xf32, #tpu.memory_space<vmem>>, vector<1x128x512xf32>
    %269 = vector.shape_cast %268 : vector<1x128x512xf32> to vector<128x512xf32>
    %cst_95 = arith.constant dense<0.000000e+00> : vector<8x512xf32>
    %270 = tpu.matmul %260, %269, %cst_95 {dimension_numbers = #tpu.dot_dimension_numbers<[1], [0], [0], [1], [0, 0, 1, 1], [], []>} : vector<8x128xf32>, vector<128x512xf32>, vector<8x512xf32> -> vector<8x512xf32>
    %271 = arith.addf %267, %270 : vector<8x512xf32>
    %272 = vector.extract_strided_slice %271 {offsets = [0, 0], sizes = [8, 128], strides = [1, 1]} : vector<8x512xf32> to vector<8x128xf32>
    %273 = arith.negf %272 : vector<8x128xf32>
    %274 = math.exp %273 : vector<8x128xf32>
    %cst_96 = arith.constant 1.000000e+00 : f32
    %275 = vector.broadcast %cst_96 : f32 to vector<8x128xf32>
    %276 = arith.addf %275, %274 : vector<8x128xf32>
    %277 = arith.divf %275, %276 : vector<8x128xf32>
    %278 = vector.extract_strided_slice %271 {offsets = [0, 128], sizes = [8, 128], strides = [1, 1]} : vector<8x512xf32> to vector<8x128xf32>
    %279 = arith.negf %278 : vector<8x128xf32>
    %280 = math.exp %279 : vector<8x128xf32>
    %cst_97 = arith.constant 1.000000e+00 : f32
    %281 = vector.broadcast %cst_97 : f32 to vector<8x128xf32>
    %282 = arith.addf %281, %280 : vector<8x128xf32>
    %283 = arith.divf %281, %282 : vector<8x128xf32>
    %284 = vector.extract_strided_slice %271 {offsets = [0, 256], sizes = [8, 128], strides = [1, 1]} : vector<8x512xf32> to vector<8x128xf32>
    %285 = math.tanh %284 : vector<8x128xf32>
    %286 = vector.extract_strided_slice %271 {offsets = [0, 384], sizes = [8, 128], strides = [1, 1]} : vector<8x512xf32> to vector<8x128xf32>
    %287 = arith.negf %286 : vector<8x128xf32>
    %288 = math.exp %287 : vector<8x128xf32>
    %cst_98 = arith.constant 1.000000e+00 : f32
    %289 = vector.broadcast %cst_98 : f32 to vector<8x128xf32>
    %290 = arith.addf %289, %288 : vector<8x128xf32>
    %291 = arith.divf %289, %290 : vector<8x128xf32>
    %292 = arith.mulf %283, %258 : vector<8x128xf32>
    %293 = arith.mulf %277, %285 : vector<8x128xf32>
    %294 = arith.addf %292, %293 : vector<8x128xf32>
    %295 = math.tanh %294 : vector<8x128xf32>
    %296 = arith.mulf %291, %295 : vector<8x128xf32>
    %297 = arith.index_cast %c7_i32 : i32 to index
    %c0_99 = arith.constant 0 : index
    %c0_100 = arith.constant 0 : index
    %298 = vector.load %arg7[%297, %c0_99, %c0_100] : memref<8x8x128xf32, #tpu.memory_space<vmem>>, vector<1x8x128xf32>
    %299 = vector.shape_cast %298 : vector<1x8x128xf32> to vector<8x128xf32>
    %300 = vector.shape_cast %296 : vector<8x128xf32> to vector<1x8x128xf32>
    tpu.vector_store %arg7[%297, %c0_99, %c0_100], %300 {strides = array<i32>} : memref<8x8x128xf32, #tpu.memory_space<vmem>>, vector<1x8x128xf32>,
    %c8_i32 = arith.constant 8 : i32
    %c0_101 = arith.constant 0 : index
    %c0_102 = arith.constant 0 : index
    %c0_103 = arith.constant 0 : index
    %301 = vector.load %arg7[%c0_101, %c0_102, %c0_103] : memref<8x8x128xf32, #tpu.memory_space<vmem>>, vector<8x8x128xf32>
    %302 = vector.shape_cast %301 : vector<8x8x128xf32> to vector<64x128xf32>
    %c1 = arith.constant 1 : index
    %c0_104 = arith.constant 0 : index
    %c0_105 = arith.constant 0 : index
    %303 = vector.load %arg1[%c1, %c0_104, %c0_105] : memref<2x128x512xf32, #tpu.memory_space<vmem>>, vector<1x128x512xf32>
    %304 = vector.shape_cast %303 : vector<1x128x512xf32> to vector<128x512xf32>
    %cst_106 = arith.constant dense<0.000000e+00> : vector<64x512xf32>
    %305 = tpu.matmul %302, %304, %cst_106 {dimension_numbers = #tpu.dot_dimension_numbers<[1], [0], [0], [1], [0, 0, 1, 1], [], []>} : vector<64x128xf32>, vector<128x512xf32>, vector<64x512xf32> -> vector<64x512xf32>
    %c1_107 = arith.constant 1 : index
    %c0_108 = arith.constant 0 : index
    %c0_109 = arith.constant 0 : index
    %306 = vector.load %arg3[%c1_107, %c0_108, %c0_109] : memref<2x1x512xf32, #tpu.memory_space<vmem>>, vector<1x1x512xf32>
    %307 = vector.shape_cast %306 : vector<1x1x512xf32> to vector<1x512xf32>
    %308 = vector.broadcast %307 : vector<1x512xf32> to vector<64x512xf32>
    %309 = arith.addf %305, %308 : vector<64x512xf32>
    %310 = vector.shape_cast %309 : vector<64x512xf32> to vector<8x8x512xf32>
    %c0_110 = arith.constant 0 : index
    %c0_111 = arith.constant 0 : index
    %c0_112 = arith.constant 0 : index
    %311 = vector.load %arg8[%c0_110, %c0_111, %c0_112] : memref<8x8x512xf32, #tpu.memory_space<vmem>>, vector<8x8x512xf32>
    tpu.vector_store %arg8[%c0_110, %c0_111, %c0_112], %310 {strides = array<i32>} : memref<8x8x512xf32, #tpu.memory_space<vmem>>, vector<8x8x512xf32>,
    %cst_113 = arith.constant 0.000000e+00 : f32
    %312 = vector.broadcast %cst_113 : f32 to vector<8x128xf32>
    %cst_114 = arith.constant 0.000000e+00 : f32
    %313 = vector.broadcast %cst_114 : f32 to vector<8x128xf32>
    %c0_i32_115 = arith.constant 0 : i32
    %314 = arith.index_cast %c0_i32_115 : i32 to index
    %c0_116 = arith.constant 0 : index
    %c0_117 = arith.constant 0 : index
    %315 = vector.load %arg8[%314, %c0_116, %c0_117] : memref<8x8x512xf32, #tpu.memory_space<vmem>>, vector<1x8x512xf32>
    %316 = vector.shape_cast %315 : vector<1x8x512xf32> to vector<8x512xf32>
    %c1_118 = arith.constant 1 : index
    %c0_119 = arith.constant 0 : index
    %c0_120 = arith.constant 0 : index
    %317 = vector.load %arg2[%c1_118, %c0_119, %c0_120] : memref<2x128x512xf32, #tpu.memory_space<vmem>>, vector<1x128x512xf32>
    %318 = vector.shape_cast %317 : vector<1x128x512xf32> to vector<128x512xf32>
    %cst_121 = arith.constant dense<0.000000e+00> : vector<8x512xf32>
    %319 = tpu.matmul %312, %318, %cst_121 {dimension_numbers = #tpu.dot_dimension_numbers<[1], [0], [0], [1], [0, 0, 1, 1], [], []>} : vector<8x128xf32>, vector<128x512xf32>, vector<8x512xf32> -> vector<8x512xf32>
    %320 = arith.addf %316, %319 : vector<8x512xf32>
    %321 = vector.extract_strided_slice %320 {offsets = [0, 0], sizes = [8, 128], strides = [1, 1]} : vector<8x512xf32> to vector<8x128xf32>
    %322 = arith.negf %321 : vector<8x128xf32>
    %323 = math.exp %322 : vector<8x128xf32>
    %cst_122 = arith.constant 1.000000e+00 : f32
    %324 = vector.broadcast %cst_122 : f32 to vector<8x128xf32>
    %325 = arith.addf %324, %323 : vector<8x128xf32>
    %326 = arith.divf %324, %325 : vector<8x128xf32>
    %327 = vector.extract_strided_slice %320 {offsets = [0, 128], sizes = [8, 128], strides = [1, 1]} : vector<8x512xf32> to vector<8x128xf32>
    %328 = arith.negf %327 : vector<8x128xf32>
    %329 = math.exp %328 : vector<8x128xf32>
    %cst_123 = arith.constant 1.000000e+00 : f32
    %330 = vector.broadcast %cst_123 : f32 to vector<8x128xf32>
    %331 = arith.addf %330, %329 : vector<8x128xf32>
    %332 = arith.divf %330, %331 : vector<8x128xf32>
    %333 = vector.extract_strided_slice %320 {offsets = [0, 256], sizes = [8, 128], strides = [1, 1]} : vector<8x512xf32> to vector<8x128xf32>
    %334 = math.tanh %333 : vector<8x128xf32>
    %335 = vector.extract_strided_slice %320 {offsets = [0, 384], sizes = [8, 128], strides = [1, 1]} : vector<8x512xf32> to vector<8x128xf32>
    %336 = arith.negf %335 : vector<8x128xf32>
    %337 = math.exp %336 : vector<8x128xf32>
    %cst_124 = arith.constant 1.000000e+00 : f32
    %338 = vector.broadcast %cst_124 : f32 to vector<8x128xf32>
    %339 = arith.addf %338, %337 : vector<8x128xf32>
    %340 = arith.divf %338, %339 : vector<8x128xf32>
    %341 = arith.mulf %332, %313 : vector<8x128xf32>
    %342 = arith.mulf %326, %334 : vector<8x128xf32>
    %343 = arith.addf %341, %342 : vector<8x128xf32>
    %344 = math.tanh %343 : vector<8x128xf32>
    %345 = arith.mulf %340, %344 : vector<8x128xf32>
    %c1_i32_125 = arith.constant 1 : i32
    %346 = arith.index_cast %c1_i32_125 : i32 to index
    %c0_126 = arith.constant 0 : index
    %c0_127 = arith.constant 0 : index
    %347 = vector.load %arg8[%346, %c0_126, %c0_127] : memref<8x8x512xf32, #tpu.memory_space<vmem>>, vector<1x8x512xf32>
    %348 = vector.shape_cast %347 : vector<1x8x512xf32> to vector<8x512xf32>
    %c1_128 = arith.constant 1 : index
    %c0_129 = arith.constant 0 : index
    %c0_130 = arith.constant 0 : index
    %349 = vector.load %arg2[%c1_128, %c0_129, %c0_130] : memref<2x128x512xf32, #tpu.memory_space<vmem>>, vector<1x128x512xf32>
    %350 = vector.shape_cast %349 : vector<1x128x512xf32> to vector<128x512xf32>
    %cst_131 = arith.constant dense<0.000000e+00> : vector<8x512xf32>
    %351 = tpu.matmul %345, %350, %cst_131 {dimension_numbers = #tpu.dot_dimension_numbers<[1], [0], [0], [1], [0, 0, 1, 1], [], []>} : vector<8x128xf32>, vector<128x512xf32>, vector<8x512xf32> -> vector<8x512xf32>
    %352 = arith.addf %348, %351 : vector<8x512xf32>
    %353 = vector.extract_strided_slice %352 {offsets = [0, 0], sizes = [8, 128], strides = [1, 1]} : vector<8x512xf32> to vector<8x128xf32>
    %354 = arith.negf %353 : vector<8x128xf32>
    %355 = math.exp %354 : vector<8x128xf32>
    %cst_132 = arith.constant 1.000000e+00 : f32
    %356 = vector.broadcast %cst_132 : f32 to vector<8x128xf32>
    %357 = arith.addf %356, %355 : vector<8x128xf32>
    %358 = arith.divf %356, %357 : vector<8x128xf32>
    %359 = vector.extract_strided_slice %352 {offsets = [0, 128], sizes = [8, 128], strides = [1, 1]} : vector<8x512xf32> to vector<8x128xf32>
    %360 = arith.negf %359 : vector<8x128xf32>
    %361 = math.exp %360 : vector<8x128xf32>
    %cst_133 = arith.constant 1.000000e+00 : f32
    %362 = vector.broadcast %cst_133 : f32 to vector<8x128xf32>
    %363 = arith.addf %362, %361 : vector<8x128xf32>
    %364 = arith.divf %362, %363 : vector<8x128xf32>
    %365 = vector.extract_strided_slice %352 {offsets = [0, 256], sizes = [8, 128], strides = [1, 1]} : vector<8x512xf32> to vector<8x128xf32>
    %366 = math.tanh %365 : vector<8x128xf32>
    %367 = vector.extract_strided_slice %352 {offsets = [0, 384], sizes = [8, 128], strides = [1, 1]} : vector<8x512xf32> to vector<8x128xf32>
    %368 = arith.negf %367 : vector<8x128xf32>
    %369 = math.exp %368 : vector<8x128xf32>
    %cst_134 = arith.constant 1.000000e+00 : f32
    %370 = vector.broadcast %cst_134 : f32 to vector<8x128xf32>
    %371 = arith.addf %370, %369 : vector<8x128xf32>
    %372 = arith.divf %370, %371 : vector<8x128xf32>
    %373 = arith.mulf %364, %343 : vector<8x128xf32>
    %374 = arith.mulf %358, %366 : vector<8x128xf32>
    %375 = arith.addf %373, %374 : vector<8x128xf32>
    %376 = math.tanh %375 : vector<8x128xf32>
    %377 = arith.mulf %372, %376 : vector<8x128xf32>
    %c2_i32_135 = arith.constant 2 : i32
    %378 = arith.index_cast %c2_i32_135 : i32 to index
    %c0_136 = arith.constant 0 : index
    %c0_137 = arith.constant 0 : index
    %379 = vector.load %arg8[%378, %c0_136, %c0_137] : memref<8x8x512xf32, #tpu.memory_space<vmem>>, vector<1x8x512xf32>
    %380 = vector.shape_cast %379 : vector<1x8x512xf32> to vector<8x512xf32>
    %c1_138 = arith.constant 1 : index
    %c0_139 = arith.constant 0 : index
    %c0_140 = arith.constant 0 : index
    %381 = vector.load %arg2[%c1_138, %c0_139, %c0_140] : memref<2x128x512xf32, #tpu.memory_space<vmem>>, vector<1x128x512xf32>
    %382 = vector.shape_cast %381 : vector<1x128x512xf32> to vector<128x512xf32>
    %cst_141 = arith.constant dense<0.000000e+00> : vector<8x512xf32>
    %383 = tpu.matmul %377, %382, %cst_141 {dimension_numbers = #tpu.dot_dimension_numbers<[1], [0], [0], [1], [0, 0, 1, 1], [], []>} : vector<8x128xf32>, vector<128x512xf32>, vector<8x512xf32> -> vector<8x512xf32>
    %384 = arith.addf %380, %383 : vector<8x512xf32>
    %385 = vector.extract_strided_slice %384 {offsets = [0, 0], sizes = [8, 128], strides = [1, 1]} : vector<8x512xf32> to vector<8x128xf32>
    %386 = arith.negf %385 : vector<8x128xf32>
    %387 = math.exp %386 : vector<8x128xf32>
    %cst_142 = arith.constant 1.000000e+00 : f32
    %388 = vector.broadcast %cst_142 : f32 to vector<8x128xf32>
    %389 = arith.addf %388, %387 : vector<8x128xf32>
    %390 = arith.divf %388, %389 : vector<8x128xf32>
    %391 = vector.extract_strided_slice %384 {offsets = [0, 128], sizes = [8, 128], strides = [1, 1]} : vector<8x512xf32> to vector<8x128xf32>
    %392 = arith.negf %391 : vector<8x128xf32>
    %393 = math.exp %392 : vector<8x128xf32>
    %cst_143 = arith.constant 1.000000e+00 : f32
    %394 = vector.broadcast %cst_143 : f32 to vector<8x128xf32>
    %395 = arith.addf %394, %393 : vector<8x128xf32>
    %396 = arith.divf %394, %395 : vector<8x128xf32>
    %397 = vector.extract_strided_slice %384 {offsets = [0, 256], sizes = [8, 128], strides = [1, 1]} : vector<8x512xf32> to vector<8x128xf32>
    %398 = math.tanh %397 : vector<8x128xf32>
    %399 = vector.extract_strided_slice %384 {offsets = [0, 384], sizes = [8, 128], strides = [1, 1]} : vector<8x512xf32> to vector<8x128xf32>
    %400 = arith.negf %399 : vector<8x128xf32>
    %401 = math.exp %400 : vector<8x128xf32>
    %cst_144 = arith.constant 1.000000e+00 : f32
    %402 = vector.broadcast %cst_144 : f32 to vector<8x128xf32>
    %403 = arith.addf %402, %401 : vector<8x128xf32>
    %404 = arith.divf %402, %403 : vector<8x128xf32>
    %405 = arith.mulf %396, %375 : vector<8x128xf32>
    %406 = arith.mulf %390, %398 : vector<8x128xf32>
    %407 = arith.addf %405, %406 : vector<8x128xf32>
    %408 = math.tanh %407 : vector<8x128xf32>
    %409 = arith.mulf %404, %408 : vector<8x128xf32>
    %c3_i32_145 = arith.constant 3 : i32
    %410 = arith.index_cast %c3_i32_145 : i32 to index
    %c0_146 = arith.constant 0 : index
    %c0_147 = arith.constant 0 : index
    %411 = vector.load %arg8[%410, %c0_146, %c0_147] : memref<8x8x512xf32, #tpu.memory_space<vmem>>, vector<1x8x512xf32>
    %412 = vector.shape_cast %411 : vector<1x8x512xf32> to vector<8x512xf32>
    %c1_148 = arith.constant 1 : index
    %c0_149 = arith.constant 0 : index
    %c0_150 = arith.constant 0 : index
    %413 = vector.load %arg2[%c1_148, %c0_149, %c0_150] : memref<2x128x512xf32, #tpu.memory_space<vmem>>, vector<1x128x512xf32>
    %414 = vector.shape_cast %413 : vector<1x128x512xf32> to vector<128x512xf32>
    %cst_151 = arith.constant dense<0.000000e+00> : vector<8x512xf32>
    %415 = tpu.matmul %409, %414, %cst_151 {dimension_numbers = #tpu.dot_dimension_numbers<[1], [0], [0], [1], [0, 0, 1, 1], [], []>} : vector<8x128xf32>, vector<128x512xf32>, vector<8x512xf32> -> vector<8x512xf32>
    %416 = arith.addf %412, %415 : vector<8x512xf32>
    %417 = vector.extract_strided_slice %416 {offsets = [0, 0], sizes = [8, 128], strides = [1, 1]} : vector<8x512xf32> to vector<8x128xf32>
    %418 = arith.negf %417 : vector<8x128xf32>
    %419 = math.exp %418 : vector<8x128xf32>
    %cst_152 = arith.constant 1.000000e+00 : f32
    %420 = vector.broadcast %cst_152 : f32 to vector<8x128xf32>
    %421 = arith.addf %420, %419 : vector<8x128xf32>
    %422 = arith.divf %420, %421 : vector<8x128xf32>
    %423 = vector.extract_strided_slice %416 {offsets = [0, 128], sizes = [8, 128], strides = [1, 1]} : vector<8x512xf32> to vector<8x128xf32>
    %424 = arith.negf %423 : vector<8x128xf32>
    %425 = math.exp %424 : vector<8x128xf32>
    %cst_153 = arith.constant 1.000000e+00 : f32
    %426 = vector.broadcast %cst_153 : f32 to vector<8x128xf32>
    %427 = arith.addf %426, %425 : vector<8x128xf32>
    %428 = arith.divf %426, %427 : vector<8x128xf32>
    %429 = vector.extract_strided_slice %416 {offsets = [0, 256], sizes = [8, 128], strides = [1, 1]} : vector<8x512xf32> to vector<8x128xf32>
    %430 = math.tanh %429 : vector<8x128xf32>
    %431 = vector.extract_strided_slice %416 {offsets = [0, 384], sizes = [8, 128], strides = [1, 1]} : vector<8x512xf32> to vector<8x128xf32>
    %432 = arith.negf %431 : vector<8x128xf32>
    %433 = math.exp %432 : vector<8x128xf32>
    %cst_154 = arith.constant 1.000000e+00 : f32
    %434 = vector.broadcast %cst_154 : f32 to vector<8x128xf32>
    %435 = arith.addf %434, %433 : vector<8x128xf32>
    %436 = arith.divf %434, %435 : vector<8x128xf32>
    %437 = arith.mulf %428, %407 : vector<8x128xf32>
    %438 = arith.mulf %422, %430 : vector<8x128xf32>
    %439 = arith.addf %437, %438 : vector<8x128xf32>
    %440 = math.tanh %439 : vector<8x128xf32>
    %441 = arith.mulf %436, %440 : vector<8x128xf32>
    %c4_i32_155 = arith.constant 4 : i32
    %442 = arith.index_cast %c4_i32_155 : i32 to index
    %c0_156 = arith.constant 0 : index
    %c0_157 = arith.constant 0 : index
    %443 = vector.load %arg8[%442, %c0_156, %c0_157] : memref<8x8x512xf32, #tpu.memory_space<vmem>>, vector<1x8x512xf32>
    %444 = vector.shape_cast %443 : vector<1x8x512xf32> to vector<8x512xf32>
    %c1_158 = arith.constant 1 : index
    %c0_159 = arith.constant 0 : index
    %c0_160 = arith.constant 0 : index
    %445 = vector.load %arg2[%c1_158, %c0_159, %c0_160] : memref<2x128x512xf32, #tpu.memory_space<vmem>>, vector<1x128x512xf32>
    %446 = vector.shape_cast %445 : vector<1x128x512xf32> to vector<128x512xf32>
    %cst_161 = arith.constant dense<0.000000e+00> : vector<8x512xf32>
    %447 = tpu.matmul %441, %446, %cst_161 {dimension_numbers = #tpu.dot_dimension_numbers<[1], [0], [0], [1], [0, 0, 1, 1], [], []>} : vector<8x128xf32>, vector<128x512xf32>, vector<8x512xf32> -> vector<8x512xf32>
    %448 = arith.addf %444, %447 : vector<8x512xf32>
    %449 = vector.extract_strided_slice %448 {offsets = [0, 0], sizes = [8, 128], strides = [1, 1]} : vector<8x512xf32> to vector<8x128xf32>
    %450 = arith.negf %449 : vector<8x128xf32>
    %451 = math.exp %450 : vector<8x128xf32>
    %cst_162 = arith.constant 1.000000e+00 : f32
    %452 = vector.broadcast %cst_162 : f32 to vector<8x128xf32>
    %453 = arith.addf %452, %451 : vector<8x128xf32>
    %454 = arith.divf %452, %453 : vector<8x128xf32>
    %455 = vector.extract_strided_slice %448 {offsets = [0, 128], sizes = [8, 128], strides = [1, 1]} : vector<8x512xf32> to vector<8x128xf32>
    %456 = arith.negf %455 : vector<8x128xf32>
    %457 = math.exp %456 : vector<8x128xf32>
    %cst_163 = arith.constant 1.000000e+00 : f32
    %458 = vector.broadcast %cst_163 : f32 to vector<8x128xf32>
    %459 = arith.addf %458, %457 : vector<8x128xf32>
    %460 = arith.divf %458, %459 : vector<8x128xf32>
    %461 = vector.extract_strided_slice %448 {offsets = [0, 256], sizes = [8, 128], strides = [1, 1]} : vector<8x512xf32> to vector<8x128xf32>
    %462 = math.tanh %461 : vector<8x128xf32>
    %463 = vector.extract_strided_slice %448 {offsets = [0, 384], sizes = [8, 128], strides = [1, 1]} : vector<8x512xf32> to vector<8x128xf32>
    %464 = arith.negf %463 : vector<8x128xf32>
    %465 = math.exp %464 : vector<8x128xf32>
    %cst_164 = arith.constant 1.000000e+00 : f32
    %466 = vector.broadcast %cst_164 : f32 to vector<8x128xf32>
    %467 = arith.addf %466, %465 : vector<8x128xf32>
    %468 = arith.divf %466, %467 : vector<8x128xf32>
    %469 = arith.mulf %460, %439 : vector<8x128xf32>
    %470 = arith.mulf %454, %462 : vector<8x128xf32>
    %471 = arith.addf %469, %470 : vector<8x128xf32>
    %472 = math.tanh %471 : vector<8x128xf32>
    %473 = arith.mulf %468, %472 : vector<8x128xf32>
    %c5_i32_165 = arith.constant 5 : i32
    %474 = arith.index_cast %c5_i32_165 : i32 to index
    %c0_166 = arith.constant 0 : index
    %c0_167 = arith.constant 0 : index
    %475 = vector.load %arg8[%474, %c0_166, %c0_167] : memref<8x8x512xf32, #tpu.memory_space<vmem>>, vector<1x8x512xf32>
    %476 = vector.shape_cast %475 : vector<1x8x512xf32> to vector<8x512xf32>
    %c1_168 = arith.constant 1 : index
    %c0_169 = arith.constant 0 : index
    %c0_170 = arith.constant 0 : index
    %477 = vector.load %arg2[%c1_168, %c0_169, %c0_170] : memref<2x128x512xf32, #tpu.memory_space<vmem>>, vector<1x128x512xf32>
    %478 = vector.shape_cast %477 : vector<1x128x512xf32> to vector<128x512xf32>
    %cst_171 = arith.constant dense<0.000000e+00> : vector<8x512xf32>
    %479 = tpu.matmul %473, %478, %cst_171 {dimension_numbers = #tpu.dot_dimension_numbers<[1], [0], [0], [1], [0, 0, 1, 1], [], []>} : vector<8x128xf32>, vector<128x512xf32>, vector<8x512xf32> -> vector<8x512xf32>
    %480 = arith.addf %476, %479 : vector<8x512xf32>
    %481 = vector.extract_strided_slice %480 {offsets = [0, 0], sizes = [8, 128], strides = [1, 1]} : vector<8x512xf32> to vector<8x128xf32>
    %482 = arith.negf %481 : vector<8x128xf32>
    %483 = math.exp %482 : vector<8x128xf32>
    %cst_172 = arith.constant 1.000000e+00 : f32
    %484 = vector.broadcast %cst_172 : f32 to vector<8x128xf32>
    %485 = arith.addf %484, %483 : vector<8x128xf32>
    %486 = arith.divf %484, %485 : vector<8x128xf32>
    %487 = vector.extract_strided_slice %480 {offsets = [0, 128], sizes = [8, 128], strides = [1, 1]} : vector<8x512xf32> to vector<8x128xf32>
    %488 = arith.negf %487 : vector<8x128xf32>
    %489 = math.exp %488 : vector<8x128xf32>
    %cst_173 = arith.constant 1.000000e+00 : f32
    %490 = vector.broadcast %cst_173 : f32 to vector<8x128xf32>
    %491 = arith.addf %490, %489 : vector<8x128xf32>
    %492 = arith.divf %490, %491 : vector<8x128xf32>
    %493 = vector.extract_strided_slice %480 {offsets = [0, 256], sizes = [8, 128], strides = [1, 1]} : vector<8x512xf32> to vector<8x128xf32>
    %494 = math.tanh %493 : vector<8x128xf32>
    %495 = vector.extract_strided_slice %480 {offsets = [0, 384], sizes = [8, 128], strides = [1, 1]} : vector<8x512xf32> to vector<8x128xf32>
    %496 = arith.negf %495 : vector<8x128xf32>
    %497 = math.exp %496 : vector<8x128xf32>
    %cst_174 = arith.constant 1.000000e+00 : f32
    %498 = vector.broadcast %cst_174 : f32 to vector<8x128xf32>
    %499 = arith.addf %498, %497 : vector<8x128xf32>
    %500 = arith.divf %498, %499 : vector<8x128xf32>
    %501 = arith.mulf %492, %471 : vector<8x128xf32>
    %502 = arith.mulf %486, %494 : vector<8x128xf32>
    %503 = arith.addf %501, %502 : vector<8x128xf32>
    %504 = math.tanh %503 : vector<8x128xf32>
    %505 = arith.mulf %500, %504 : vector<8x128xf32>
    %c6_i32_175 = arith.constant 6 : i32
    %506 = arith.index_cast %c6_i32_175 : i32 to index
    %c0_176 = arith.constant 0 : index
    %c0_177 = arith.constant 0 : index
    %507 = vector.load %arg8[%506, %c0_176, %c0_177] : memref<8x8x512xf32, #tpu.memory_space<vmem>>, vector<1x8x512xf32>
    %508 = vector.shape_cast %507 : vector<1x8x512xf32> to vector<8x512xf32>
    %c1_178 = arith.constant 1 : index
    %c0_179 = arith.constant 0 : index
    %c0_180 = arith.constant 0 : index
    %509 = vector.load %arg2[%c1_178, %c0_179, %c0_180] : memref<2x128x512xf32, #tpu.memory_space<vmem>>, vector<1x128x512xf32>
    %510 = vector.shape_cast %509 : vector<1x128x512xf32> to vector<128x512xf32>
    %cst_181 = arith.constant dense<0.000000e+00> : vector<8x512xf32>
    %511 = tpu.matmul %505, %510, %cst_181 {dimension_numbers = #tpu.dot_dimension_numbers<[1], [0], [0], [1], [0, 0, 1, 1], [], []>} : vector<8x128xf32>, vector<128x512xf32>, vector<8x512xf32> -> vector<8x512xf32>
    %512 = arith.addf %508, %511 : vector<8x512xf32>
    %513 = vector.extract_strided_slice %512 {offsets = [0, 0], sizes = [8, 128], strides = [1, 1]} : vector<8x512xf32> to vector<8x128xf32>
    %514 = arith.negf %513 : vector<8x128xf32>
    %515 = math.exp %514 : vector<8x128xf32>
    %cst_182 = arith.constant 1.000000e+00 : f32
    %516 = vector.broadcast %cst_182 : f32 to vector<8x128xf32>
    %517 = arith.addf %516, %515 : vector<8x128xf32>
    %518 = arith.divf %516, %517 : vector<8x128xf32>
    %519 = vector.extract_strided_slice %512 {offsets = [0, 128], sizes = [8, 128], strides = [1, 1]} : vector<8x512xf32> to vector<8x128xf32>
    %520 = arith.negf %519 : vector<8x128xf32>
    %521 = math.exp %520 : vector<8x128xf32>
    %cst_183 = arith.constant 1.000000e+00 : f32
    %522 = vector.broadcast %cst_183 : f32 to vector<8x128xf32>
    %523 = arith.addf %522, %521 : vector<8x128xf32>
    %524 = arith.divf %522, %523 : vector<8x128xf32>
    %525 = vector.extract_strided_slice %512 {offsets = [0, 256], sizes = [8, 128], strides = [1, 1]} : vector<8x512xf32> to vector<8x128xf32>
    %526 = math.tanh %525 : vector<8x128xf32>
    %527 = vector.extract_strided_slice %512 {offsets = [0, 384], sizes = [8, 128], strides = [1, 1]} : vector<8x512xf32> to vector<8x128xf32>
    %528 = arith.negf %527 : vector<8x128xf32>
    %529 = math.exp %528 : vector<8x128xf32>
    %cst_184 = arith.constant 1.000000e+00 : f32
    %530 = vector.broadcast %cst_184 : f32 to vector<8x128xf32>
    %531 = arith.addf %530, %529 : vector<8x128xf32>
    %532 = arith.divf %530, %531 : vector<8x128xf32>
    %533 = arith.mulf %524, %503 : vector<8x128xf32>
    %534 = arith.mulf %518, %526 : vector<8x128xf32>
    %535 = arith.addf %533, %534 : vector<8x128xf32>
    %536 = math.tanh %535 : vector<8x128xf32>
    %537 = arith.mulf %532, %536 : vector<8x128xf32>
    %c7_i32_185 = arith.constant 7 : i32
    %538 = arith.index_cast %c7_i32_185 : i32 to index
    %c0_186 = arith.constant 0 : index
    %c0_187 = arith.constant 0 : index
    %539 = vector.load %arg8[%538, %c0_186, %c0_187] : memref<8x8x512xf32, #tpu.memory_space<vmem>>, vector<1x8x512xf32>
    %540 = vector.shape_cast %539 : vector<1x8x512xf32> to vector<8x512xf32>
    %c1_188 = arith.constant 1 : index
    %c0_189 = arith.constant 0 : index
    %c0_190 = arith.constant 0 : index
    %541 = vector.load %arg2[%c1_188, %c0_189, %c0_190] : memref<2x128x512xf32, #tpu.memory_space<vmem>>, vector<1x128x512xf32>
    %542 = vector.shape_cast %541 : vector<1x128x512xf32> to vector<128x512xf32>
    %cst_191 = arith.constant dense<0.000000e+00> : vector<8x512xf32>
    %543 = tpu.matmul %537, %542, %cst_191 {dimension_numbers = #tpu.dot_dimension_numbers<[1], [0], [0], [1], [0, 0, 1, 1], [], []>} : vector<8x128xf32>, vector<128x512xf32>, vector<8x512xf32> -> vector<8x512xf32>
    %544 = arith.addf %540, %543 : vector<8x512xf32>
    %545 = vector.extract_strided_slice %544 {offsets = [0, 0], sizes = [8, 128], strides = [1, 1]} : vector<8x512xf32> to vector<8x128xf32>
    %546 = arith.negf %545 : vector<8x128xf32>
    %547 = math.exp %546 : vector<8x128xf32>
    %cst_192 = arith.constant 1.000000e+00 : f32
    %548 = vector.broadcast %cst_192 : f32 to vector<8x128xf32>
    %549 = arith.addf %548, %547 : vector<8x128xf32>
    %550 = arith.divf %548, %549 : vector<8x128xf32>
    %551 = vector.extract_strided_slice %544 {offsets = [0, 128], sizes = [8, 128], strides = [1, 1]} : vector<8x512xf32> to vector<8x128xf32>
    %552 = arith.negf %551 : vector<8x128xf32>
    %553 = math.exp %552 : vector<8x128xf32>
    %cst_193 = arith.constant 1.000000e+00 : f32
    %554 = vector.broadcast %cst_193 : f32 to vector<8x128xf32>
    %555 = arith.addf %554, %553 : vector<8x128xf32>
    %556 = arith.divf %554, %555 : vector<8x128xf32>
    %557 = vector.extract_strided_slice %544 {offsets = [0, 256], sizes = [8, 128], strides = [1, 1]} : vector<8x512xf32> to vector<8x128xf32>
    %558 = math.tanh %557 : vector<8x128xf32>
    %559 = vector.extract_strided_slice %544 {offsets = [0, 384], sizes = [8, 128], strides = [1, 1]} : vector<8x512xf32> to vector<8x128xf32>
    %560 = arith.negf %559 : vector<8x128xf32>
    %561 = math.exp %560 : vector<8x128xf32>
    %cst_194 = arith.constant 1.000000e+00 : f32
    %562 = vector.broadcast %cst_194 : f32 to vector<8x128xf32>
    %563 = arith.addf %562, %561 : vector<8x128xf32>
    %564 = arith.divf %562, %563 : vector<8x128xf32>
    %565 = arith.mulf %556, %535 : vector<8x128xf32>
    %566 = arith.mulf %550, %558 : vector<8x128xf32>
    %567 = arith.addf %565, %566 : vector<8x128xf32>
    %568 = math.tanh %567 : vector<8x128xf32>
    %569 = arith.mulf %564, %568 : vector<8x128xf32>
    %c8_i32_195 = arith.constant 8 : i32
    %c0_196 = arith.constant 0 : index
    %c0_197 = arith.constant 0 : index
    %570 = vector.load %arg4[%c0_196, %c0_197] : memref<128x128xf32, #tpu.memory_space<vmem>>, vector<128x128xf32>
    %cst_198 = arith.constant dense<0.000000e+00> : vector<8x128xf32>
    %571 = tpu.matmul %569, %570, %cst_198 {dimension_numbers = #tpu.dot_dimension_numbers<[1], [0], [0], [1], [0, 0, 1, 1], [], []>} : vector<8x128xf32>, vector<128x128xf32>, vector<8x128xf32> -> vector<8x128xf32>
    %c0_199 = arith.constant 0 : index
    %c0_200 = arith.constant 0 : index
    %572 = vector.load %arg5[%c0_199, %c0_200] : memref<1x128xf32, #tpu.memory_space<vmem>>, vector<1x128xf32>
    %573 = vector.broadcast %572 : vector<1x128xf32> to vector<8x128xf32>
    %574 = arith.addf %571, %573 : vector<8x128xf32>
    %c0_201 = arith.constant 0 : index
    %c0_202 = arith.constant 0 : index
    %575 = vector.load %arg6[%c0_201, %c0_202] : memref<8x128xf32, #tpu.memory_space<vmem>>, vector<8x128xf32>
    tpu.vector_store %arg6[%c0_201, %c0_202], %574 {strides = array<i32>} : memref<8x128xf32, #tpu.memory_space<vmem>>, vector<8x128xf32>,
    return
  }
}

</mosaic_0001>

<bundles_post_ra>
// kernel: price_prediction_lstm.1
= control target key start
LH: loop header
LB: loop body
LE: loop exit
PB: predicated region body
PF: predicated region fallthrough
CT: control target
= control target key end

     0   :  { %11 = vsyncpa [#allocation5], 0  ;;  %s6754_s0 = inlined_call_operand.vmem [shape: f32[8,8,128], index: 0, kind: input, shape index: {}]   ;;  %s6755_s1 = inlined_call_operand.hbm [shape: f32[2,128,512], index: 1, kind: input, shape index: {}]   ;;  %s6756_s2 = inlined_call_operand.hbm [shape: f32[2,128,512], index: 2, kind: input, shape index: {}]   ;;  %s6757_s3 = inlined_call_operand.vmem [shape: f32[2,1,512], index: 3, kind: input, shape index: {}]   ;;  %s6758_s4 = inlined_call_operand.hbm [shape: f32[128,128], index: 4, kind: input, shape index: {}]   ;;  %s6759_s5 = inlined_call_operand.vmem [shape: f32[1,128], index: 5, kind: input, shape index: {}]   ;;  %s6760_s6 = inlined_call_operand.vmem [shape: f32[8,128], index: 6, kind: output, shape index: {}]  }
   0x1   :  { %12 = vsyncpa [#allocation7], 0  ;;  %s4748_s21 = smov [#allocation6]   ;;  %s4749_s23 = smov [#allocation4]  }
   0x2   :  { %s32_s22 = sshll.u32 %s4748_s21, 4  ;;  %s20_s24 = sshll.u32 %s4749_s23, 4  ;;  %s33_s22 = int_to_ptr.vmem [resolvable:$true] %s32_s22  ;;  %s21_s24 = int_to_ptr.vmem [resolvable:$true] %s20_s24 }
   0x3   :  { %s4692_s25 = scalar_lea.vmem %s33_s22, 16384  ;;  %p4697_p1 = scmp.lt.s32.totalorder %s33_s22, %s33_s22 }
   0x4   :  { %p4693_p0 = scmp.ne.s32.totalorder %s33_s22, %s4692_s25  ;;  %p4698_p2 = scmp.lt.s32.totalorder %s4692_s25, %s4692_s25 }
   0x6   :  { %p4699_p3 = por %p4698_p2, %p4697_p1 }
   0x8   :  { %p4700_p4 = pnand %p4699_p3, %p4693_p0 }
   0xa   :  { %4703 = shalt.err (!%p4700_p4)
}
   0xb   :  { %s4750_s26 = smov 512   ;;  %s4751_s27 = smov 32  }
   0xc   :  { %38 = dma.hbm_to_vmem [thread:$0]  %s6756_s2, 16384, %s33_s22, [#allocation7], %s4750_s26, %s4750_s26, %s4751_s27  }
   0xd   :  { %s4712_s30 = scalar_lea.vmem %s21_s24, 16384  ;;  %p4717_p6 = scmp.lt.s32.totalorder %s21_s24, %s21_s24 }
   0xe   :  { %p4713_p5 = scmp.ne.s32.totalorder %s21_s24, %s4712_s30  ;;  %p4718_p7 = scmp.lt.s32.totalorder %s4712_s30, %s4712_s30 }
  0x10   :  { %p4719_p8 = por %p4718_p7, %p4717_p6 }
  0x12   :  { %p4720_p9 = pnand %p4719_p8, %p4713_p5 }
  0x14   :  { %4723 = shalt.err (!%p4720_p9)
}
  0x15   :  { %26 = dma.hbm_to_vmem [thread:$0]  %s6755_s1, 16384, %s21_s24, [#allocation5], %s4750_s26, %s4750_s26, %s4751_s27  }
  0x16   :  { %s4752_s9 = smov [#allocation8]  }
  0x17   :  { %s46_s10 = sshll.u32 %s4752_s9, 4  ;;  %s47_s10 = int_to_ptr.vmem [resolvable:$true] %s46_s10 }
  0x18   :  { %s4732_s11 = scalar_lea.vmem %s47_s10, 2048  ;;  %p4737_p11 = scmp.lt.s32.totalorder %s47_s10, %s47_s10 }
  0x19   :  { %p4733_p10 = scmp.ne.s32.totalorder %s47_s10, %s4732_s11  ;;  %p4738_p12 = scmp.lt.s32.totalorder %s4732_s11, %s4732_s11 }
  0x1b   :  { %p4739_p13 = por %p4738_p12, %p4737_p11 }
  0x1d   :  { %p4740_p0 = pnand %p4739_p13, %p4733_p10 }
  0x1f   :  { %4743 = shalt.err (!%p4740_p0)
}
  0x20   :  { %s4753_s2 = smov 128   ;;  %s4754_s12 = smov 8  }
  0x21   :  { %52 = dma.hbm_to_vmem [thread:$0]  %s6758_s4, 2048, %s47_s10, [#allocation7], %s4753_s2, %s4753_s2, %s4754_s12  }
  0x22   :  { %4744 = dma.done.wait [#allocation5], 16384  }
  0x23   :  { %4745 = vsyncadd [#allocation5], 4294950912 }
  0x24   :  { %4746 = dma.done.wait [#allocation7], 18432  }
  0x25   :  { %4747 = vsyncadd [#allocation7], 4294948864  ;;  %v6761_v0 = vmov 0.0   ;;  %v133_v1 = vld [vmem:[#allocation4 + $0x1e8] sm:$0xff]  ;;  %v135_v2 = vld [vmem:[#allocation4 + $0x1f8] sm:$0xff]  ;;  %vm4756_vm0 = vmmov 0  }
  0x26   :  { %222 = vmatprep.mubr.f32.mxu0 %v6761_v0  ;;  %335 = vmatprep.mubr.f32.mxu1 %v6761_v0  ;;  %v132_v3 = vld [vmem:[#allocation4 + $0x1e0] sm:$0xff]  ;;  %v134_v4 = vld [vmem:[#allocation4 + $0x1f0] sm:$0xff]  ;;  %v129_v5 = vld [vmem:[#allocation4 + $0x1c8] sm:$0xff] }
  0x27   :  { %158 = vmatprep.subr.mxu0 %v133_v1  ;;  %271 = vmatprep.subr.mxu1 %v135_v2  ;;  %v131_v6 = vld [vmem:[#allocation4 + $0x1d8] sm:$0xff]  ;;  %v128_v7 = vld [vmem:[#allocation4 + $0x1c0] sm:$0xff]  ;;  %v130_v8 = vld [vmem:[#allocation4 + $0x1d0] sm:$0xff] }
  0x28   :  { %159 = vmatpush1.msra.mxu0 %v132_v3  ;;  %272 = vmatpush1.msra.mxu1 %v134_v4  ;;  %v125_v9 = vld [vmem:[#allocation4 + $0x1a8] sm:$0xff]  ;;  %v127_v10 = vld [vmem:[#allocation4 + $0x1b8] sm:$0xff]  ;;  %v124_v11 = vld [vmem:[#allocation4 + $0x1a0] sm:$0xff] }
  0x29   :  { %160 = vmatprep.subr.mxu0 %v129_v5  ;;  %273 = vmatprep.subr.mxu1 %v131_v6  ;;  %v126_v12 = vld [vmem:[#allocation4 + $0x1b0] sm:$0xff]  ;;  %v121_v13 = vld [vmem:[#allocation4 + $0x188] sm:$0xff]  ;;  %v123_v14 = vld [vmem:[#allocation4 + $0x198] sm:$0xff] }
  0x2a   :  { %161 = vmatpush1.msra.mxu0 %v128_v7  ;;  %274 = vmatpush1.msra.mxu1 %v130_v8  ;;  %v120_v15 = vld [vmem:[#allocation4 + $0x180] sm:$0xff]  ;;  %v122_v16 = vld [vmem:[#allocation4 + $0x190] sm:$0xff]  ;;  %v117_v17 = vld [vmem:[#allocation4 + $0x168] sm:$0xff] }
  0x2b   :  { %162 = vmatprep.subr.mxu0 %v125_v9  ;;  %275 = vmatprep.subr.mxu1 %v127_v10  ;;  %v119_v18 = vld [vmem:[#allocation4 + $0x178] sm:$0xff]  ;;  %v116_v19 = vld [vmem:[#allocation4 + $0x160] sm:$0xff]  ;;  %v118_v20 = vld [vmem:[#allocation4 + $0x170] sm:$0xff] }
  0x2c   :  { %163 = vmatpush1.msra.mxu0 %v124_v11  ;;  %276 = vmatpush1.msra.mxu1 %v126_v12  ;;  %v113_v21 = vld [vmem:[#allocation4 + $0x148] sm:$0xff]  ;;  %v115_v22 = vld [vmem:[#allocation4 + $0x158] sm:$0xff]  ;;  %v112_v23 = vld [vmem:[#allocation4 + $0x140] sm:$0xff] }
  0x2d   :  { %164 = vmatprep.subr.mxu0 %v121_v13  ;;  %277 = vmatprep.subr.mxu1 %v123_v14  ;;  %v114_v24 = vld [vmem:[#allocation4 + $0x150] sm:$0xff]  ;;  %v109_v25 = vld [vmem:[#allocation4 + $0x128] sm:$0xff]  ;;  %v111_v26 = vld [vmem:[#allocation4 + $0x138] sm:$0xff] }
  0x2e   :  { %165 = vmatpush1.msra.mxu0 %v120_v15  ;;  %278 = vmatpush1.msra.mxu1 %v122_v16  ;;  %v108_v27 = vld [vmem:[#allocation4 + $0x120] sm:$0xff]  ;;  %v110_v28 = vld [vmem:[#allocation4 + $0x130] sm:$0xff]  ;;  %v105_v29 = vld [vmem:[#allocation4 + $0x108] sm:$0xff] }
  0x2f   :  { %166 = vmatprep.subr.mxu0 %v117_v17  ;;  %279 = vmatprep.subr.mxu1 %v119_v18  ;;  %v107_v30 = vld [vmem:[#allocation4 + $0x118] sm:$0xff]  ;;  %v104_v31 = vld [vmem:[#allocation4 + $0x100] sm:$0xff]  ;;  %v106_v32 = vld [vmem:[#allocation4 + $0x110] sm:$0xff] }
  0x30   :  { %167 = vmatpush1.msra.mxu0 %v116_v19  ;;  %280 = vmatpush1.msra.mxu1 %v118_v20  ;;  %v101_v33 = vld [vmem:[#allocation4 + $0xe8] sm:$0xff]  ;;  %v103_v34 = vld [vmem:[#allocation4 + $0xf8] sm:$0xff]  ;;  %v100_v35 = vld [vmem:[#allocation4 + $0xe0] sm:$0xff] }
  0x31   :  { %168 = vmatprep.subr.mxu0 %v113_v21  ;;  %281 = vmatprep.subr.mxu1 %v115_v22  ;;  %v102_v36 = vld [vmem:[#allocation4 + $0xf0] sm:$0xff]  ;;  %v97_v37 = vld [vmem:[#allocation4 + $0xc8] sm:$0xff]  ;;  %v99_v38 = vld [vmem:[#allocation4 + $0xd8] sm:$0xff] }
  0x32   :  { %169 = vmatpush1.msra.mxu0 %v112_v23  ;;  %282 = vmatpush1.msra.mxu1 %v114_v24  ;;  %v96_v39 = vld [vmem:[#allocation4 + $0xc0] sm:$0xff]  ;;  %v98_v40 = vld [vmem:[#allocation4 + $0xd0] sm:$0xff]  ;;  %v93_v41 = vld [vmem:[#allocation4 + $0xa8] sm:$0xff] }
  0x33   :  { %170 = vmatprep.subr.mxu0 %v109_v25  ;;  %283 = vmatprep.subr.mxu1 %v111_v26  ;;  %v95_v42 = vld [vmem:[#allocation4 + $0xb8] sm:$0xff]  ;;  %v92_v43 = vld [vmem:[#allocation4 + $0xa0] sm:$0xff]  ;;  %v94_v44 = vld [vmem:[#allocation4 + $0xb0] sm:$0xff] }
  0x34   :  { %171 = vmatpush1.msra.mxu0 %v108_v27  ;;  %284 = vmatpush1.msra.mxu1 %v110_v28  ;;  %v89_v45 = vld [vmem:[#allocation4 + $0x88] sm:$0xff]  ;;  %v91_v46 = vld [vmem:[#allocation4 + $0x98] sm:$0xff]  ;;  %v88_v47 = vld [vmem:[#allocation4 + $0x80] sm:$0xff] }
  0x35   :  { %172 = vmatprep.subr.mxu0 %v105_v29  ;;  %285 = vmatprep.subr.mxu1 %v107_v30  ;;  %v90_v48 = vld [vmem:[#allocation4 + $0x90] sm:$0xff]  ;;  %v85_v49 = vld [vmem:[#allocation4 + $0x68] sm:$0xff]  ;;  %v87_v50 = vld [vmem:[#allocation4 + $0x78] sm:$0xff] }
  0x36   :  { %173 = vmatpush1.msra.mxu0 %v104_v31  ;;  %286 = vmatpush1.msra.mxu1 %v106_v32  ;;  %v84_v51 = vld [vmem:[#allocation4 + $0x60] sm:$0xff]  ;;  %v86_v52 = vld [vmem:[#allocation4 + $0x70] sm:$0xff]  ;;  %v81_v53 = vld [vmem:[#allocation4 + $0x48] sm:$0xff] }
  0x37   :  { %174 = vmatprep.subr.mxu0 %v101_v33  ;;  %287 = vmatprep.subr.mxu1 %v103_v34  ;;  %v83_v54 = vld [vmem:[#allocation4 + $0x58] sm:$0xff]  ;;  %v80_v55 = vld [vmem:[#allocation4 + $0x40] sm:$0xff]  ;;  %v82_v56 = vld [vmem:[#allocation4 + $0x50] sm:$0xff] }
  0x38   :  { %175 = vmatpush1.msra.mxu0 %v100_v35  ;;  %288 = vmatpush1.msra.mxu1 %v102_v36  ;;  %v77_v57 = vld [vmem:[#allocation4 + $0x28] sm:$0xff]  ;;  %v79_v58 = vld [vmem:[#allocation4 + $0x38] sm:$0xff]  ;;  %v76_v59 = vld [vmem:[#allocation4 + $0x20] sm:$0xff] }
  0x39   :  { %176 = vmatprep.subr.mxu0 %v97_v37  ;;  %289 = vmatprep.subr.mxu1 %v99_v38  ;;  %v78_v60 = vld [vmem:[#allocation4 + $0x30] sm:$0xff]  ;;  %v73_v61 = vld [vmem:[#allocation4 + $0x8] sm:$0xff]  ;;  %v75_v62 = vld [vmem:[#allocation4 + $0x18] sm:$0xff] }
  0x3a   :  { %177 = vmatpush1.msra.mxu0 %v96_v39  ;;  %290 = vmatpush1.msra.mxu1 %v98_v40  ;;  %v72_v63 = vld [vmem:[#allocation4] sm:$0xff]  ;;  %v74_v1 = vld [vmem:[#allocation4 + $0x10] sm:$0xff]  ;;  %v4806_v3 = vld [vmem:[#allocation6 + $0x1e8] sm:$0xff] }
  0x3b   :  { %178 = vmatprep.subr.mxu0 %v93_v41  ;;  %291 = vmatprep.subr.mxu1 %v95_v42  ;;  %v64_v2 = vld [vmem:[%s6754_s0] sm:$0xff]  ;;  %v4808_v4 = vld [vmem:[#allocation6 + $0x1f8] sm:$0xff]  ;;  %v4812_v6 = vld [vmem:[#allocation6 + $0x1f0] sm:$0xff] }
  0x3c   :  { %179 = vmatpush1.msra.mxu0 %v92_v43  ;;  %292 = vmatpush1.msra.mxu1 %v94_v44  ;;  %v4810_v5 = vld [vmem:[#allocation6 + $0x1e0] sm:$0xff]  ;;  %v4814_v7 = vld [vmem:[#allocation6 + $0x1c8] sm:$0xff]  ;;  %v4816_v8 = vld [vmem:[#allocation6 + $0x1d8] sm:$0xff] }
  0x3d   :  { %180 = vmatprep.subr.mxu0 %v89_v45  ;;  %293 = vmatprep.subr.mxu1 %v91_v46  ;;  %v4822_v9 = vld [vmem:[#allocation6 + $0x1c0] sm:$0xff]  ;;  %v4824_v10 = vld [vmem:[#allocation6 + $0x1d0] sm:$0xff]  ;;  %v65_v11 = vld [vmem:[%s6754_s0 + $0x8] sm:$0xff] }
  0x3e   :  { %181 = vmatpush1.msra.mxu0 %v88_v47  ;;  %294 = vmatpush1.msra.mxu1 %v90_v48  ;;  %v4833_v12 = vld [vmem:[#allocation6 + $0x1a8] sm:$0xff]  ;;  %v4835_v13 = vld [vmem:[#allocation6 + $0x1b8] sm:$0xff]  ;;  %v4839_v14 = vld [vmem:[#allocation6 + $0x1a0] sm:$0xff] }
  0x3f   :  { %182 = vmatprep.subr.mxu0 %v85_v49  ;;  %295 = vmatprep.subr.mxu1 %v87_v50  ;;  %v4841_v15 = vld [vmem:[#allocation6 + $0x1b0] sm:$0xff]  ;;  %v4843_v16 = vld [vmem:[#allocation6 + $0x188] sm:$0xff]  ;;  %v4845_v17 = vld [vmem:[#allocation6 + $0x198] sm:$0xff] }
  0x40   :  { %183 = vmatpush1.msra.mxu0 %v84_v51  ;;  %296 = vmatpush1.msra.mxu1 %v86_v52  ;;  %v4851_v18 = vld [vmem:[#allocation6 + $0x180] sm:$0xff]  ;;  %v4853_v19 = vld [vmem:[#allocation6 + $0x190] sm:$0xff]  ;;  %v4862_v21 = vld [vmem:[#allocation6 + $0x168] sm:$0xff] }
  0x41   :  { %184 = vmatprep.subr.mxu0 %v81_v53  ;;  %297 = vmatprep.subr.mxu1 %v83_v54  ;;  %v66_v20 = vld [vmem:[%s6754_s0 + $0x10] sm:$0xff]  ;;  %v4864_v22 = vld [vmem:[#allocation6 + $0x178] sm:$0xff]  ;;  %v4868_v23 = vld [vmem:[#allocation6 + $0x160] sm:$0xff] }
  0x42   :  { %185 = vmatpush1.msra.mxu0 %v80_v55  ;;  %298 = vmatpush1.msra.mxu1 %v82_v56  ;;  %v4870_v24 = vld [vmem:[#allocation6 + $0x170] sm:$0xff]  ;;  %v4872_v25 = vld [vmem:[#allocation6 + $0x148] sm:$0xff]  ;;  %v4874_v26 = vld [vmem:[#allocation6 + $0x158] sm:$0xff] }
  0x43   :  { %186 = vmatprep.subr.mxu0 %v77_v57  ;;  %299 = vmatprep.subr.mxu1 %v79_v58  ;;  %v4880_v27 = vld [vmem:[#allocation6 + $0x140] sm:$0xff]  ;;  %v4882_v28 = vld [vmem:[#allocation6 + $0x150] sm:$0xff]  ;;  %v67_v29 = vld [vmem:[%s6754_s0 + $0x18] sm:$0xff] }
  0x44   :  { %187 = vmatpush1.msra.mxu0 %v76_v59  ;;  %300 = vmatpush1.msra.mxu1 %v78_v60  ;;  %v4891_v30 = vld [vmem:[#allocation6 + $0x128] sm:$0xff]  ;;  %v4893_v31 = vld [vmem:[#allocation6 + $0x138] sm:$0xff]  ;;  %v4897_v32 = vld [vmem:[#allocation6 + $0x120] sm:$0xff] }
  0x45   :  { %188 = vmatprep.subr.mxu0 %v73_v61  ;;  %301 = vmatprep.subr.mxu1 %v75_v62  ;;  %v4899_v33 = vld [vmem:[#allocation6 + $0x130] sm:$0xff]  ;;  %v4901_v34 = vld [vmem:[#allocation6 + $0x108] sm:$0xff]  ;;  %v4903_v35 = vld [vmem:[#allocation6 + $0x118] sm:$0xff] }
  0x46   :  { %189 = vmatpush1.msra.mxu0 %v72_v63  ;;  %302 = vmatpush1.msra.mxu1 %v74_v1  ;;  %v4909_v36 = vld [vmem:[#allocation6 + $0x100] sm:$0xff]  ;;  %v4911_v37 = vld [vmem:[#allocation6 + $0x110] sm:$0xff]  ;;  %v4920_v39 = vld [vmem:[#allocation6 + $0xe8] sm:$0xff] }
  0x47   :  { %223 = vmatmul.mubr.f32.vlgmr.msra.gmra.mxu0 %v64_v2  ;;  %336 = vmatmul.mubr.f32.vlgmr.msra.gmra.mxu1 %v64_v2  ;;  %v68_v38 = vld [vmem:[%s6754_s0 + $0x20] sm:$0xff]  ;;  %v4922_v40 = vld [vmem:[#allocation6 + $0xf8] sm:$0xff]  ;;  %v4928_v42 = vld [vmem:[#allocation6 + $0xf0] sm:$0xff] }
  0x48   :  { %484 = vmatprep.subr.mxu0 %v4806_v3  ;;  %555 = vmatprep.subr.mxu1 %v4808_v4  ;;  %v4926_v41 = vld [vmem:[#allocation6 + $0xe0] sm:$0xff]  ;;  %v4930_v43 = vld [vmem:[#allocation6 + $0xc8] sm:$0xff]  ;;  %v4932_v44 = vld [vmem:[#allocation6 + $0xd8] sm:$0xff] }
  0x49   :  { %485 = vmatpush1.msra.mxu0 %v4810_v5  ;;  %556 = vmatpush1.msra.mxu1 %v4812_v6  ;;  %v4938_v45 = vld [vmem:[#allocation6 + $0xc0] sm:$0xff]  ;;  %v4940_v46 = vld [vmem:[#allocation6 + $0xd0] sm:$0xff]  ;;  %v69_v47 = vld [vmem:[%s6754_s0 + $0x28] sm:$0xff] }
  0x4a   :  { %486 = vmatprep.subr.mxu0 %v4814_v7  ;;  %557 = vmatprep.subr.mxu1 %v4816_v8  ;;  %v4949_v48 = vld [vmem:[#allocation6 + $0xa8] sm:$0xff]  ;;  %v4951_v49 = vld [vmem:[#allocation6 + $0xb8] sm:$0xff]  ;;  %v4955_v50 = vld [vmem:[#allocation6 + $0xa0] sm:$0xff] }
  0x4b   :  { %228 = vmatprep.mubr.f32.mxu0 %v6761_v0  ;;  %341 = vmatprep.mubr.f32.mxu1 %v6761_v0  ;;  %v4957_v51 = vld [vmem:[#allocation6 + $0xb0] sm:$0xff]  ;;  %v4959_v52 = vld [vmem:[#allocation6 + $0x88] sm:$0xff]  ;;  %v4961_v53 = vld [vmem:[#allocation6 + $0x98] sm:$0xff] }
  0x4c   :  { %487 = vmatpush1.msra.mxu0 %v4822_v9  ;;  %558 = vmatpush1.msra.mxu1 %v4824_v10  ;;  %6941 = vst [vmem:[#allocation11_spill] sm:$0xff] %v4957_v51  ;;  %6942 = vst [vmem:[#allocation12_spill] sm:$0xff] %v4959_v52  ;;  %v4967_v54 = vld [vmem:[#allocation6 + $0x80] sm:$0xff]  ;;  %v4969_v55 = vld [vmem:[#allocation6 + $0x90] sm:$0xff] }
  0x4d   :  { %229 = vmatmul.mubr.f32.gmra.mxu0 %v65_v11  ;;  %342 = vmatmul.mubr.f32.gmra.mxu1 %v65_v11  ;;  %6943 = vst [vmem:[#allocation13_spill] sm:$0xff] %v4961_v53  ;;  %6944 = vst [vmem:[#allocation14_spill] sm:$0xff] %v4967_v54  ;;  %v70_v56 = vld [vmem:[%s6754_s0 + $0x30] sm:$0xff]  ;;  %v4978_v57 = vld [vmem:[#allocation6 + $0x68] sm:$0xff] }
  0x4e   :  { %488 = vmatprep.subr.mxu0 %v4833_v12  ;;  %559 = vmatprep.subr.mxu1 %v4835_v13  ;;  %6945 = vst [vmem:[#allocation15_spill] sm:$0xff] %v4969_v55  ;;  %6946 = vst [vmem:[#allocation16_spill] sm:$0xff] %v4978_v57  ;;  %v4980_v58 = vld [vmem:[#allocation6 + $0x78] sm:$0xff]  ;;  %v4984_v59 = vld [vmem:[#allocation6 + $0x60] sm:$0xff] }
  0x4f   :  { %489 = vmatpush1.msra.mxu0 %v4839_v14  ;;  %560 = vmatpush1.msra.mxu1 %v4841_v15  ;;  %6947 = vst [vmem:[#allocation17_spill] sm:$0xff] %v4980_v58  ;;  %6948 = vst [vmem:[#allocation18_spill] sm:$0xff] %v4984_v59  ;;  %v4986_v60 = vld [vmem:[#allocation6 + $0x70] sm:$0xff]  ;;  %v4988_v61 = vld [vmem:[#allocation6 + $0x48] sm:$0xff] }
  0x50   :  { %490 = vmatprep.subr.mxu0 %v4843_v16  ;;  %561 = vmatprep.subr.mxu1 %v4845_v17  ;;  %6949 = vst [vmem:[#allocation19_spill] sm:$0xff] %v4986_v60  ;;  %6950 = vst [vmem:[#allocation20_spill] sm:$0xff] %v4988_v61  ;;  %v4990_v62 = vld [vmem:[#allocation6 + $0x58] sm:$0xff]  ;;  %v4996_v63 = vld [vmem:[#allocation6 + $0x40] sm:$0xff] }
  0x51   :  { %234 = vmatprep.mubr.f32.mxu0 %v6761_v0  ;;  %347 = vmatprep.mubr.f32.mxu1 %v6761_v0  ;;  %6951 = vst [vmem:[#allocation21_spill] sm:$0xff] %v4990_v62  ;;  %6952 = vst [vmem:[#allocation22_spill] sm:$0xff] %v4996_v63  ;;  %v4998_v1 = vld [vmem:[#allocation6 + $0x50] sm:$0xff]  ;;  %v71_v2 = vld [vmem:[%s6754_s0 + $0x38] sm:$0xff] }
  0x52   :  { %491 = vmatpush1.msra.mxu0 %v4851_v18  ;;  %562 = vmatpush1.msra.mxu1 %v4853_v19  ;;  %6953 = vst [vmem:[#allocation23_spill] sm:$0xff] %v4998_v1  ;;  %v5007_v11 = vld [vmem:[#allocation6 + $0x28] sm:$0xff] }
  0x53   :  { %235 = vmatmul.mubr.f32.gmra.mxu0 %v66_v20  ;;  %348 = vmatmul.mubr.f32.gmra.mxu1 %v66_v20  ;;  %6954 = vst [vmem:[#allocation24_spill] sm:$0xff] %v5007_v11  ;;  %v5009_v20 = vld [vmem:[#allocation6 + $0x38] sm:$0xff] }
  0x54   :  { %492 = vmatprep.subr.mxu0 %v4862_v21  ;;  %563 = vmatprep.subr.mxu1 %v4864_v22  ;;  %6955 = vst [vmem:[#allocation25_spill] sm:$0xff] %v5009_v20 }
  0x55   :  { %493 = vmatpush1.msra.mxu0 %v4868_v23  ;;  %564 = vmatpush1.msra.mxu1 %v4870_v24 }
  0x56   :  { %494 = vmatprep.subr.mxu0 %v4872_v25  ;;  %565 = vmatprep.subr.mxu1 %v4874_v26 }
  0x57   :  { %240 = vmatprep.mubr.f32.mxu0 %v6761_v0  ;;  %353 = vmatprep.mubr.f32.mxu1 %v6761_v0 }
  0x58   :  { %495 = vmatpush1.msra.mxu0 %v4880_v27  ;;  %566 = vmatpush1.msra.mxu1 %v4882_v28 }
  0x59   :  { %241 = vmatmul.mubr.f32.gmra.mxu0 %v67_v29  ;;  %354 = vmatmul.mubr.f32.gmra.mxu1 %v67_v29  ;;  %v5013_v29 = vld [vmem:[#allocation6 + $0x20] sm:$0xff] }
  0x5a   :  { %496 = vmatprep.subr.mxu0 %v4891_v30  ;;  %567 = vmatprep.subr.mxu1 %v4893_v31  ;;  %6956 = vst [vmem:[#allocation26_spill] sm:$0xff] %v5013_v29 }
  0x5b   :  { %497 = vmatpush1.msra.mxu0 %v4897_v32  ;;  %568 = vmatpush1.msra.mxu1 %v4899_v33 }
  0x5c   :  { %498 = vmatprep.subr.mxu0 %v4901_v34  ;;  %569 = vmatprep.subr.mxu1 %v4903_v35 }
  0x5d   :  { %246 = vmatprep.mubr.f32.mxu0 %v6761_v0  ;;  %359 = vmatprep.mubr.f32.mxu1 %v6761_v0 }
  0x5e   :  { %499 = vmatpush1.msra.mxu0 %v4909_v36  ;;  %570 = vmatpush1.msra.mxu1 %v4911_v37 }
  0x5f   :  { %247 = vmatmul.mubr.f32.gmra.mxu0 %v68_v38  ;;  %360 = vmatmul.mubr.f32.gmra.mxu1 %v68_v38  ;;  %v5015_v38 = vld [vmem:[#allocation6 + $0x30] sm:$0xff] }
  0x60   :  { %500 = vmatprep.subr.mxu0 %v4920_v39  ;;  %571 = vmatprep.subr.mxu1 %v4922_v40  ;;  %6957 = vst [vmem:[#allocation27_spill] sm:$0xff] %v5015_v38 }
  0x61   :  { %501 = vmatpush1.msra.mxu0 %v4926_v41  ;;  %572 = vmatpush1.msra.mxu1 %v4928_v42 }
  0x62   :  { %502 = vmatprep.subr.mxu0 %v4930_v43  ;;  %573 = vmatprep.subr.mxu1 %v4932_v44 }
  0x63   :  { %252 = vmatprep.mubr.f32.mxu0 %v6761_v0  ;;  %365 = vmatprep.mubr.f32.mxu1 %v6761_v0 }
  0x64   :  { %503 = vmatpush1.msra.mxu0 %v4938_v45  ;;  %574 = vmatpush1.msra.mxu1 %v4940_v46 }
  0x65   :  { %253 = vmatmul.mubr.f32.gmra.mxu0 %v69_v47  ;;  %366 = vmatmul.mubr.f32.gmra.mxu1 %v69_v47  ;;  %v5017_v47 = vld [vmem:[#allocation6 + $0x8] sm:$0xff] }
  0x66   :  { %504 = vmatprep.subr.mxu0 %v4949_v48  ;;  %575 = vmatprep.subr.mxu1 %v4951_v49  ;;  %6958 = vst [vmem:[#allocation28_spill] sm:$0xff] %v5017_v47 }
  0x67   :  { %505 = vmatpush1.msra.mxu0 %v4955_v50  ;;  %576 = vmatpush1.msra.mxu1 %v4957_v51 }
  0x68   :  { %506 = vmatprep.subr.mxu0 %v4959_v52  ;;  %577 = vmatprep.subr.mxu1 %v4961_v53 }
  0x69   :  { %258 = vmatprep.mubr.f32.mxu0 %v6761_v0  ;;  %371 = vmatprep.mubr.f32.mxu1 %v6761_v0 }
  0x6a   :  { %507 = vmatpush1.msra.mxu0 %v4967_v54  ;;  %578 = vmatpush1.msra.mxu1 %v4969_v55 }
  0x6b   :  { %259 = vmatmul.mubr.f32.gmra.mxu0 %v70_v56  ;;  %372 = vmatmul.mubr.f32.gmra.mxu1 %v70_v56  ;;  %v5019_v56 = vld [vmem:[#allocation6 + $0x18] sm:$0xff] }
  0x6c   :  { %508 = vmatprep.subr.mxu0 %v4978_v57  ;;  %579 = vmatprep.subr.mxu1 %v4980_v58  ;;  %6959 = vst [vmem:[#allocation29_spill] sm:$0xff] %v5019_v56 }
  0x6d   :  { %509 = vmatpush1.msra.mxu0 %v4984_v59  ;;  %580 = vmatpush1.msra.mxu1 %v4986_v60 }
  0x6e   :  { %510 = vmatprep.subr.mxu0 %v4988_v61  ;;  %581 = vmatprep.subr.mxu1 %v4990_v62 }
  0x6f   :  { %264 = vmatprep.mubr.f32.mxu0 %v6761_v0  ;;  %377 = vmatprep.mubr.f32.mxu1 %v6761_v0  ;;  %v5023_v0 = vld [vmem:[#allocation6] sm:$0xff] }
  0x70   :  { %511 = vmatpush1.msra.mxu0 %v4996_v63  ;;  %582 = vmatpush1.msra.mxu1 %v4998_v1  ;;  %6960 = vst [vmem:[#allocation30_spill] sm:$0xff] %v5023_v0  ;;  %v5027_v1 = vld [vmem:[#allocation6 + $0x10] sm:$0xff] }
  0x71   :  { %265 = vmatmul.mubr.f32.gmra.mxu0 %v71_v2  ;;  %378 = vmatmul.mubr.f32.gmra.mxu1 %v71_v2  ;;  %6961 = vst [vmem:[#allocation31_spill] sm:$0xff] %v5027_v1  ;;  %v6962_v2 = vmov 0.0  }
  0x72   :  { %512 = vmatprep.subr.mxu0 %v5007_v11  ;;  %583 = vmatprep.subr.mxu1 %v5009_v20 }
  0x73   :  { %513 = vmatpush1.msra.mxu0 %v5013_v29  ;;  %584 = vmatpush1.msra.mxu1 %v5015_v38 }
  0x74   :  { %514 = vmatprep.subr.mxu0 %v5017_v47  ;;  %585 = vmatprep.subr.mxu1 %v5019_v56 }
  0x75   :  { %515 = vmatpush1.msra.mxu0 %v5023_v0  ;;  %548 = vmatprep.mubr.f32.mxu0 %v6962_v2 }
  0x76   :  { %586 = vmatpush1.msra.mxu1 %v5027_v1  ;;  %619 = vmatprep.mubr.f32.mxu1 %v6962_v2 }
  0x77   :  { %549 = vmatmul.mubr.f32.vlgmr.msra.gmra.mxu0 %v6962_v2  ;;  %620 = vmatmul.mubr.f32.vlgmr.msra.gmra.mxu1 %v6962_v2 }
  0x78   :  { %724 = vmatprep.subr.mxu0 %v4806_v3  ;;  %795 = vmatprep.subr.mxu1 %v4808_v4 }
  0x79   :  { %725 = vmatpush1.msra.mxu0 %v4810_v5  ;;  %796 = vmatpush1.msra.mxu1 %v4812_v6 }
  0x7a   :  { %726 = vmatprep.subr.mxu0 %v4814_v7  ;;  %797 = vmatprep.subr.mxu1 %v4816_v8 }
  0x7b   :  { %727 = vmatpush1.msra.mxu0 %v4822_v9  ;;  %798 = vmatpush1.msra.mxu1 %v4824_v10 }
  0x7c   :  { %728 = vmatprep.subr.mxu0 %v4833_v12  ;;  %799 = vmatprep.subr.mxu1 %v4835_v13 }
  0x7d   :  { %729 = vmatpush1.msra.mxu0 %v4839_v14  ;;  %800 = vmatpush1.msra.mxu1 %v4841_v15 }
  0x7e   :  { %730 = vmatprep.subr.mxu0 %v4843_v16  ;;  %801 = vmatprep.subr.mxu1 %v4845_v17 }
  0x7f   :  { %731 = vmatpush1.msra.mxu0 %v4851_v18  ;;  %802 = vmatpush1.msra.mxu1 %v4853_v19 }
  0x80   :  { %732 = vmatprep.subr.mxu0 %v4862_v21  ;;  %803 = vmatprep.subr.mxu1 %v4864_v22 }
  0x81   :  { %733 = vmatpush1.msra.mxu0 %v4868_v23  ;;  %804 = vmatpush1.msra.mxu1 %v4870_v24 }
  0x82   :  { %734 = vmatprep.subr.mxu0 %v4872_v25  ;;  %805 = vmatprep.subr.mxu1 %v4874_v26 }
  0x83   :  { %735 = vmatpush1.msra.mxu0 %v4880_v27  ;;  %806 = vmatpush1.msra.mxu1 %v4882_v28 }
  0x84   :  { %736 = vmatprep.subr.mxu0 %v4891_v30  ;;  %807 = vmatprep.subr.mxu1 %v4893_v31 }
  0x85   :  { %737 = vmatpush1.msra.mxu0 %v4897_v32  ;;  %808 = vmatpush1.msra.mxu1 %v4899_v33 }
  0x86   :  { %738 = vmatprep.subr.mxu0 %v4901_v34  ;;  %809 = vmatprep.subr.mxu1 %v4903_v35 }
  0x87   :  { %739 = vmatpush1.msra.mxu0 %v4909_v36  ;;  %810 = vmatpush1.msra.mxu1 %v4911_v37 }
  0x88   :  { %740 = vmatprep.subr.mxu0 %v4920_v39  ;;  %811 = vmatprep.subr.mxu1 %v4922_v40 }
  0x89   :  { %741 = vmatpush1.msra.mxu0 %v4926_v41  ;;  %812 = vmatpush1.msra.mxu1 %v4928_v42 }
  0x8a   :  { %742 = vmatprep.subr.mxu0 %v4930_v43  ;;  %813 = vmatprep.subr.mxu1 %v4932_v44 }
  0x8b   :  { %743 = vmatpush1.msra.mxu0 %v4938_v45  ;;  %814 = vmatpush1.msra.mxu1 %v4940_v46 }
  0x8c   :  { %744 = vmatprep.subr.mxu0 %v4949_v48  ;;  %815 = vmatprep.subr.mxu1 %v4951_v49 }
  0x8d   :  { %745 = vmatpush1.msra.mxu0 %v4955_v50  ;;  %816 = vmatpush1.msra.mxu1 %v4957_v51 }
  0x8e   :  { %746 = vmatprep.subr.mxu0 %v4959_v52  ;;  %817 = vmatprep.subr.mxu1 %v4961_v53  ;;  %v6963_v52 = vld [vmem:[#allocation23_spill] sm:$0xff] }
  0x8f   :  { %747 = vmatpush1.msra.mxu0 %v4967_v54  ;;  %818 = vmatpush1.msra.mxu1 %v4969_v55 }
  0x90   :  { %748 = vmatprep.subr.mxu0 %v4978_v57  ;;  %819 = vmatprep.subr.mxu1 %v4980_v58 }
  0x91   :  { %749 = vmatpush1.msra.mxu0 %v4984_v59  ;;  %820 = vmatpush1.msra.mxu1 %v4986_v60 }
  0x92   :  { %750 = vmatprep.subr.mxu0 %v4988_v61  ;;  %821 = vmatprep.subr.mxu1 %v4990_v62 }
  0x93   :  { %751 = vmatpush1.msra.mxu0 %v4996_v63  ;;  %822 = vmatpush1.msra.mxu1 %v6963_v52 }
  0x94   :  { %752 = vmatprep.subr.mxu0 %v5007_v11  ;;  %823 = vmatprep.subr.mxu1 %v5009_v20  ;;  %v138_v20 = vlaneseq }
  0x95   :  { %753 = vmatpush1.msra.mxu0 %v5013_v29  ;;  %824 = vmatpush1.msra.mxu1 %v5015_v38 }
  0x96   :  { %754 = vmatprep.subr.mxu0 %v5017_v47  ;;  %825 = vmatprep.subr.mxu1 %v5019_v56  ;;  %v5105_v29 = vshrl.u32 %v138_v20, 7 }
  0x97   :  { %755 = vmatpush1.msra.mxu0 %v5023_v0  ;;  %788 = vmatprep.mubr.f32.mxu0 %v6962_v2 }
  0x98   :  { %826 = vmatpush1.msra.mxu1 %v5027_v1  ;;  %859 = vmatprep.mubr.f32.mxu1 %v6962_v2  ;;  %6964 = vst [vmem:[#allocation32_spill] sm:$0xff] %v5105_v29  ;;  %v6782_v56 = vsub.s32 0, %v5105_v29  ;;  %v6784_v0 = vsub.s32 2, %v5105_v29  ;;  %v136_v1 = vld [vmem:[%s6757_s3] sm:$0xf]  ;;  %v6789_v20 = vsub.s32 3, %v5105_v29 }
  0x99   :  { %965 = vmatprep.subr.mxu0 %v4806_v3  ;;  %1036 = vmatprep.subr.mxu1 %v4808_v4  ;;  %v6788_v4 = vsub.s32 1, %v5105_v29 }
  0x9a   :  { %v141_v11 = vrot.slane %v136_v1, %v6782_v56  ;;  %v5126_v52 = vrot.slane %v136_v1, %v6784_v0  ;;  %v5132_v60 = vrot.slane %v136_v1, %v6789_v20 }
  0x9b   :  { %v145_v61 = vrot.slane %v136_v1, %v6788_v4 }
 0x107   :  { %v5107_v38 = vpop.f32.mrf.mxu0  ;;  %v5109_v47 = vpop.f32.mrf.mxu1 }
 0x109   :  { %v5116_v2 = vpop.f32.mrf.mxu0  ;;  %v5118_v3 = vpop.f32.mrf.mxu1 }
 0x10d   :  { %v230_v63 = vpop.f32.mrf.mxu0  ;;  %v343_v62 = vpop.f32.mrf.mxu1 }
 0x10e   :  { %v5134_v59 = vadd.f32 %v230_v63, %v141_v11  ;;  %v5137_v58 = vadd.f32 %v343_v62, %v5126_v52 }
 0x10f   :  { %v232_v57 = vpop.f32.mrf.mxu0  ;;  %v345_v56 = vpop.f32.mrf.mxu1 }
 0x110   :  { %6965 = vst [vmem:[#allocation33_spill] sm:$0xff] %v5137_v58  ;;  %v5139_v55 = vadd.f32 %v232_v57, %v145_v61  ;;  %v5142_v0 = vadd.f32 %v345_v56, %v5132_v60 }
 0x112   :  { %6966 = vst [vmem:[#allocation34_spill] sm:$0xff] %v5139_v55  ;;  %6967 = vst [vmem:[#allocation35_spill] sm:$0xff] %v5142_v0 }
 0x113   :  { %v236_v54 = vpop.f32.mrf.mxu0  ;;  %v349_v53 = vpop.f32.mrf.mxu1 }
 0x114   :  { %v5144_v51 = vadd.f32 %v236_v54, %v141_v11  ;;  %v5147_v4 = vadd.f32 %v349_v53, %v5126_v52 }
 0x115   :  { %v238_v1 = vpop.f32.mrf.mxu0  ;;  %v351_v63 = vpop.f32.mrf.mxu1 }
 0x116   :  { %6968 = vst [vmem:[#allocation36_spill] sm:$0xff] %v5144_v51  ;;  %6969 = vst [vmem:[#allocation37_spill] sm:$0xff] %v5147_v4  ;;  %v5149_v20 = vadd.f32 %v238_v1, %v145_v61  ;;  %v5152_v62 = vadd.f32 %v351_v63, %v5132_v60 }
 0x118   :  { %6970 = vst [vmem:[#allocation38_spill] sm:$0xff] %v5149_v20  ;;  %6971 = vst [vmem:[#allocation39_spill] sm:$0xff] %v5152_v62 }
 0x119   :  { %v242_v29 = vpop.f32.mrf.mxu0  ;;  %v355_v57 = vpop.f32.mrf.mxu1 }
 0x11a   :  { %v5154_v58 = vadd.f32 %v242_v29, %v141_v11  ;;  %v5157_v56 = vadd.f32 %v355_v57, %v5126_v52 }
 0x11b   :  { %v244_v0 = vpop.f32.mrf.mxu0  ;;  %v357_v54 = vpop.f32.mrf.mxu1 }
 0x11c   :  { %6972 = vst [vmem:[#allocation40_spill] sm:$0xff] %v5154_v58  ;;  %6973 = vst [vmem:[#allocation41_spill] sm:$0xff] %v5157_v56  ;;  %v5159_v51 = vadd.f32 %v244_v0, %v145_v61  ;;  %v5162_v53 = vadd.f32 %v357_v54, %v5132_v60 }
 0x11e   :  { %6974 = vst [vmem:[#allocation42_spill] sm:$0xff] %v5159_v51  ;;  %6975 = vst [vmem:[#allocation43_spill] sm:$0xff] %v5162_v53 }
 0x11f   :  { %v248_v4 = vpop.f32.mrf.mxu0  ;;  %v361_v1 = vpop.f32.mrf.mxu1 }
 0x120   :  { %v5164_v20 = vadd.f32 %v248_v4, %v141_v11  ;;  %v5167_v63 = vadd.f32 %v361_v1, %v5126_v52 }
 0x121   :  { %v250_v62 = vpop.f32.mrf.mxu0  ;;  %v363_v29 = vpop.f32.mrf.mxu1 }
 0x122   :  { %6976 = vst [vmem:[#allocation44_spill] sm:$0xff] %v5164_v20  ;;  %6977 = vst [vmem:[#allocation45_spill] sm:$0xff] %v5167_v63  ;;  %v5169_v58 = vadd.f32 %v250_v62, %v145_v61  ;;  %v5172_v57 = vadd.f32 %v363_v29, %v5132_v60 }
 0x124   :  { %6978 = vst [vmem:[#allocation46_spill] sm:$0xff] %v5169_v58  ;;  %6979 = vst [vmem:[#allocation47_spill] sm:$0xff] %v5172_v57 }
 0x125   :  { %v254_v56 = vpop.f32.mrf.mxu0  ;;  %v367_v0 = vpop.f32.mrf.mxu1 }
 0x126   :  { %v5174_v51 = vadd.f32 %v254_v56, %v141_v11  ;;  %v5177_v54 = vadd.f32 %v367_v0, %v5126_v52 }
 0x127   :  { %v256_v53 = vpop.f32.mrf.mxu0  ;;  %v369_v4 = vpop.f32.mrf.mxu1 }
 0x128   :  { %6980 = vst [vmem:[#allocation48_spill] sm:$0xff] %v5174_v51  ;;  %6981 = vst [vmem:[#allocation49_spill] sm:$0xff] %v5177_v54  ;;  %v5179_v20 = vadd.f32 %v256_v53, %v145_v61  ;;  %v5182_v1 = vadd.f32 %v369_v4, %v5132_v60 }
 0x12a   :  { %6982 = vst [vmem:[#allocation50_spill] sm:$0xff] %v5179_v20  ;;  %6983 = vst [vmem:[#allocation51_spill] sm:$0xff] %v5182_v1 }
 0x12b   :  { %v260_v63 = vpop.f32.mrf.mxu0  ;;  %v373_v62 = vpop.f32.mrf.mxu1 }
 0x12c   :  { %v5184_v58 = vadd.f32 %v260_v63, %v141_v11  ;;  %v5187_v29 = vadd.f32 %v373_v62, %v5126_v52 }
 0x12d   :  { %v262_v57 = vpop.f32.mrf.mxu0  ;;  %v375_v56 = vpop.f32.mrf.mxu1 }
 0x12e   :  { %6984 = vst [vmem:[#allocation52_spill] sm:$0xff] %v5184_v58  ;;  %6985 = vst [vmem:[#allocation53_spill] sm:$0xff] %v5187_v29  ;;  %v5189_v51 = vadd.f32 %v262_v57, %v145_v61  ;;  %v5192_v0 = vadd.f32 %v375_v56, %v5132_v60  ;;  %v225_v57 = vadd.f32 %v5107_v38, %v141_v11 }
 0x12f   :  { %v227_v56 = vadd.f32 %v5116_v2, %v145_v61 }
 0x130   :  { %6986 = vst [vmem:[#allocation54_spill] sm:$0xff] %v5189_v51  ;;  %6987 = vst [vmem:[#allocation55_spill] sm:$0xff] %v5192_v0 }
 0x131   :  { %v266_v54 = vpop.f32.mrf.mxu0  ;;  %v379_v53 = vpop.f32.mrf.mxu1 }
 0x132   :  { %v5194_v20 = vadd.f32 %v266_v54, %v141_v11  ;;  %v5197_v4 = vadd.f32 %v379_v53, %v5126_v52 }
 0x133   :  { %v268_v1 = vpop.f32.mrf.mxu0  ;;  %v381_v63 = vpop.f32.mrf.mxu1 }
 0x134   :  { %6988 = vst [vmem:[#allocation56_spill] sm:$0xff] %v5194_v20  ;;  %6989 = vst [vmem:[#allocation57_spill] sm:$0xff] %v5197_v4  ;;  %v5199_v58 = vadd.f32 %v268_v1, %v145_v61  ;;  %v5202_v62 = vadd.f32 %v381_v63, %v5132_v60  ;;  %v340_v1 = vadd.f32 %v5118_v3, %v5132_v60 }
 0x135   :  { %v338_v63 = vadd.f32 %v5109_v47, %v5126_v52 }
 0x136   :  { %6990 = vst [vmem:[#allocation58_spill] sm:$0xff] %v5199_v58  ;;  %6991 = vst [vmem:[#allocation59_spill] sm:$0xff] %v5202_v62 }
 0x137   :  { %v550_v29 = vpop.f32.mrf.mxu0  ;;  %v621_v20 = vpop.f32.mrf.mxu1 }
 0x138   :  { %v626_v0 = vadd.f32 %v550_v29, %v225_v57  ;;  %v628_v62 = vadd.f32 %v621_v20, %v338_v63 }
 0x139   :  { %v552_v51 = vpop.f32.mrf.mxu0  ;;  %v623_v4 = vpop.f32.mrf.mxu1 }
 0x13a   :  { %v4253_v55 = vmul.f32 -1.442695, %v626_v0  ;;  %v627_v54 = vadd.f32 %v552_v51, %v227_v56  ;;  %v629_v58 = vadd.f32 %v623_v4, %v340_v1 }
 0x13c   :  { %4364 = vpow2.f32 %v4253_v55  ;;  %v4254_v53 = vmul.f32 -1.442695, %v627_v54  ;;  %v4255_v11 = vmul.f32 -1.442695, %v629_v58 }
 0x13e   :  { %4366 = vpow2.f32 %v4254_v53 }
 0x13f   :  { %4368 = vpow2.f32 %v4255_v11 }
 0x149   :  { %v4365_v38 = vpop.eup %4364 }
 0x14a   :  { %v633_v61 = vadd.f32 1.0, %v4365_v38 }
 0x14b   :  { %v4367_v2 = vpop.eup %4366 }
 0x14c   :  { %4370 = vrcp.f32 %v633_v61  ;;  %v639_v51 = vadd.f32 1.0, %v4367_v2  ;;  %v4369_v55 = vpop.eup %4368  ;;  %v5295_v2 = vld [vmem:[#allocation6 + $0x1e8] sm:$0xff] }
 0x14d   :  { %4372 = vtanh.f32 %v628_v62  ;;  %v646_v56 = vadd.f32 1.0, %v4369_v55  ;;  %v5301_v55 = vld [vmem:[#allocation6 + $0x1e0] sm:$0xff] }
 0x14e   :  { %4374 = vrcp.f32 %v639_v51  ;;  %v5297_v51 = vld [vmem:[#allocation6 + $0x1f8] sm:$0xff] }
 0x14f   :  { %4376 = vrcp.f32 %v646_v56  ;;  %v5313_v56 = vld [vmem:[#allocation6 + $0x1c0] sm:$0xff] }
 0x159   :  { %v4371_v29 = vpop.eup %4370 }
 0x15a   :  { %v4373_v0 = vpop.eup %4372 }
 0x15b   :  { %v4375_v57 = vpop.eup %4374  ;;  %v650_v3 = vmul.f32 %v4373_v0, %v4371_v29  ;;  %v5303_v29 = vld [vmem:[#allocation6 + $0x1f0] sm:$0xff]  ;;  %v5307_v0 = vld [vmem:[#allocation6 + $0x1c8] sm:$0xff] }
 0x15c   :  { %v649_v60 = vmul.f32 0.0, %v4375_v57  ;;  %v4377_v52 = vpop.eup %4376  ;;  %v5309_v57 = vld [vmem:[#allocation6 + $0x1d8] sm:$0xff] }
 0x15e   :  { %v5210_v4 = vadd.f32 %v650_v3, %v649_v60  ;;  %v5315_v60 = vld [vmem:[#allocation6 + $0x1d0] sm:$0xff]  ;;  %v5319_v3 = vld [vmem:[#allocation6 + $0x1a8] sm:$0xff] }
 0x160   :  { %4378 = vtanh.f32 %v5210_v4 }
 0x16d   :  { %v4379_v58 = vpop.eup %4378 }
 0x16e   :  { %v5213_v47 = vmul.f32 %v4379_v58, %v4377_v52  ;;  %v5325_v52 = vld [vmem:[#allocation6 + $0x1a0] sm:$0xff]  ;;  %v5327_v58 = vld [vmem:[#allocation6 + $0x1b0] sm:$0xff] }
 0x170   :  { %6992 = vst [vmem:[#allocation60_spill] sm:$0xff] %v5213_v47  ;;  %789 = vmatmul.mubr.f32.vlgmr.msra.gmra.mxu0 %v5213_v47  ;;  %860 = vmatmul.mubr.f32.vlgmr.msra.gmra.mxu1 %v5213_v47  ;;  %v5473_v47 = vld [vmem:[#allocation6 + $0x18] sm:$0xff] }
 0x171   :  { %966 = vmatpush1.msra.mxu0 %v4810_v5  ;;  %1037 = vmatpush1.msra.mxu1 %v4812_v6  ;;  %v6993_v5 = vld [vmem:[#allocation11_spill] sm:$0xff]  ;;  %v6994_v6 = vld [vmem:[#allocation12_spill] sm:$0xff] }
 0x172   :  { %967 = vmatprep.subr.mxu0 %v4814_v7  ;;  %1038 = vmatprep.subr.mxu1 %v4816_v8  ;;  %v6995_v7 = vld [vmem:[#allocation13_spill] sm:$0xff]  ;;  %v6996_v8 = vld [vmem:[#allocation14_spill] sm:$0xff]  ;;  %7019 = vst [vmem:[#allocation12_spill] sm:$0xff] %v5295_v2 }
 0x173   :  { %968 = vmatpush1.msra.mxu0 %v4822_v9  ;;  %1039 = vmatpush1.msra.mxu1 %v4824_v10  ;;  %v6997_v9 = vld [vmem:[#allocation15_spill] sm:$0xff]  ;;  %v6998_v10 = vld [vmem:[#allocation16_spill] sm:$0xff]  ;;  %7020 = vst [vmem:[#allocation13_spill] sm:$0xff] %v5297_v51 }
 0x174   :  { %969 = vmatprep.subr.mxu0 %v4833_v12  ;;  %1040 = vmatprep.subr.mxu1 %v4835_v13  ;;  %v6999_v12 = vld [vmem:[#allocation17_spill] sm:$0xff]  ;;  %v7000_v13 = vld [vmem:[#allocation18_spill] sm:$0xff] }
 0x175   :  { %970 = vmatpush1.msra.mxu0 %v4839_v14  ;;  %1041 = vmatpush1.msra.mxu1 %v4841_v15  ;;  %v7001_v14 = vld [vmem:[#allocation19_spill] sm:$0xff]  ;;  %v7002_v15 = vld [vmem:[#allocation20_spill] sm:$0xff] }
 0x176   :  { %971 = vmatprep.subr.mxu0 %v4843_v16  ;;  %1042 = vmatprep.subr.mxu1 %v4845_v17  ;;  %v7003_v16 = vld [vmem:[#allocation21_spill] sm:$0xff]  ;;  %v7004_v17 = vld [vmem:[#allocation22_spill] sm:$0xff] }
 0x177   :  { %972 = vmatpush1.msra.mxu0 %v4851_v18  ;;  %1043 = vmatpush1.msra.mxu1 %v4853_v19  ;;  %v7005_v18 = vld [vmem:[#allocation23_spill] sm:$0xff]  ;;  %v7006_v19 = vld [vmem:[#allocation24_spill] sm:$0xff] }
 0x178   :  { %973 = vmatprep.subr.mxu0 %v4862_v21  ;;  %1044 = vmatprep.subr.mxu1 %v4864_v22  ;;  %v7007_v21 = vld [vmem:[#allocation25_spill] sm:$0xff]  ;;  %v7008_v22 = vld [vmem:[#allocation26_spill] sm:$0xff] }
 0x179   :  { %974 = vmatpush1.msra.mxu0 %v4868_v23  ;;  %1045 = vmatpush1.msra.mxu1 %v4870_v24  ;;  %v7009_v23 = vld [vmem:[#allocation27_spill] sm:$0xff]  ;;  %v7010_v24 = vld [vmem:[#allocation28_spill] sm:$0xff] }
 0x17a   :  { %975 = vmatprep.subr.mxu0 %v4872_v25  ;;  %1046 = vmatprep.subr.mxu1 %v4874_v26  ;;  %v7011_v25 = vld [vmem:[#allocation29_spill] sm:$0xff]  ;;  %v7012_v26 = vld [vmem:[#allocation30_spill] sm:$0xff]  ;;  %7035 = vst [vmem:[#allocation28_spill] sm:$0xff] %v5473_v47 }
 0x17b   :  { %976 = vmatpush1.msra.mxu0 %v4880_v27  ;;  %1047 = vmatpush1.msra.mxu1 %v4882_v28  ;;  %v7013_v27 = vmov 0.0   ;;  %v7014_v28 = vld [vmem:[#allocation31_spill] sm:$0xff] }
 0x17c   :  { %977 = vmatprep.subr.mxu0 %v4891_v30  ;;  %1048 = vmatprep.subr.mxu1 %v4893_v31 }
 0x17d   :  { %978 = vmatpush1.msra.mxu0 %v4897_v32  ;;  %1049 = vmatpush1.msra.mxu1 %v4899_v33 }
 0x17e   :  { %979 = vmatprep.subr.mxu0 %v4901_v34  ;;  %1050 = vmatprep.subr.mxu1 %v4903_v35  ;;  %v7015_v34 = vld [vmem:[#allocation34_spill] sm:$0xff] }
 0x17f   :  { %980 = vmatpush1.msra.mxu0 %v4909_v36  ;;  %1051 = vmatpush1.msra.mxu1 %v4911_v37 }
 0x180   :  { %981 = vmatprep.subr.mxu0 %v4920_v39  ;;  %1052 = vmatprep.subr.mxu1 %v4922_v40  ;;  %v7016_v40 = vld [vmem:[#allocation35_spill] sm:$0xff] }
 0x181   :  { %982 = vmatpush1.msra.mxu0 %v4926_v41  ;;  %1053 = vmatpush1.msra.mxu1 %v4928_v42  ;;  %v7017_v42 = vld [vmem:[#allocation33_spill] sm:$0xff] }
 0x182   :  { %983 = vmatprep.subr.mxu0 %v4930_v43  ;;  %1054 = vmatprep.subr.mxu1 %v4932_v44 }
 0x183   :  { %984 = vmatpush1.msra.mxu0 %v4938_v45  ;;  %1055 = vmatpush1.msra.mxu1 %v4940_v46 }
 0x184   :  { %985 = vmatprep.subr.mxu0 %v4949_v48  ;;  %1056 = vmatprep.subr.mxu1 %v4951_v49 }
 0x185   :  { %986 = vmatpush1.msra.mxu0 %v4955_v50  ;;  %1057 = vmatpush1.msra.mxu1 %v6993_v5  ;;  %v5331_v5 = vld [vmem:[#allocation6 + $0x188] sm:$0xff] }
 0x186   :  { %987 = vmatprep.subr.mxu0 %v6994_v6  ;;  %1058 = vmatprep.subr.mxu1 %v6995_v7  ;;  %v5333_v6 = vld [vmem:[#allocation6 + $0x198] sm:$0xff]  ;;  %v5337_v7 = vld [vmem:[#allocation6 + $0x180] sm:$0xff] }
 0x187   :  { %988 = vmatpush1.msra.mxu0 %v6996_v8  ;;  %1059 = vmatpush1.msra.mxu1 %v6997_v9  ;;  %v5339_v8 = vld [vmem:[#allocation6 + $0x190] sm:$0xff]  ;;  %v5343_v9 = vld [vmem:[#allocation6 + $0x168] sm:$0xff] }
 0x188   :  { %989 = vmatprep.subr.mxu0 %v6998_v10  ;;  %1060 = vmatprep.subr.mxu1 %v6999_v12  ;;  %v5345_v10 = vld [vmem:[#allocation6 + $0x178] sm:$0xff]  ;;  %v5349_v12 = vld [vmem:[#allocation6 + $0x160] sm:$0xff] }
 0x189   :  { %990 = vmatpush1.msra.mxu0 %v7000_v13  ;;  %1061 = vmatpush1.msra.mxu1 %v7001_v14  ;;  %v5351_v13 = vld [vmem:[#allocation6 + $0x170] sm:$0xff]  ;;  %v5355_v14 = vld [vmem:[#allocation6 + $0x148] sm:$0xff] }
 0x18a   :  { %991 = vmatprep.subr.mxu0 %v7002_v15  ;;  %1062 = vmatprep.subr.mxu1 %v7003_v16  ;;  %v5357_v15 = vld [vmem:[#allocation6 + $0x158] sm:$0xff]  ;;  %v5361_v16 = vld [vmem:[#allocation6 + $0x140] sm:$0xff] }
 0x18b   :  { %992 = vmatpush1.msra.mxu0 %v7004_v17  ;;  %1063 = vmatpush1.msra.mxu1 %v7005_v18  ;;  %v5363_v17 = vld [vmem:[#allocation6 + $0x150] sm:$0xff]  ;;  %v5367_v18 = vld [vmem:[#allocation6 + $0x128] sm:$0xff] }
 0x18c   :  { %993 = vmatprep.subr.mxu0 %v7006_v19  ;;  %1064 = vmatprep.subr.mxu1 %v7007_v21  ;;  %v5369_v19 = vld [vmem:[#allocation6 + $0x138] sm:$0xff]  ;;  %v5373_v21 = vld [vmem:[#allocation6 + $0x120] sm:$0xff] }
 0x18d   :  { %994 = vmatpush1.msra.mxu0 %v7008_v22  ;;  %1065 = vmatpush1.msra.mxu1 %v7009_v23  ;;  %v5375_v22 = vld [vmem:[#allocation6 + $0x130] sm:$0xff]  ;;  %v5379_v23 = vld [vmem:[#allocation6 + $0x108] sm:$0xff] }
 0x18e   :  { %995 = vmatprep.subr.mxu0 %v7010_v24  ;;  %1066 = vmatprep.subr.mxu1 %v7011_v25  ;;  %v5381_v24 = vld [vmem:[#allocation6 + $0x118] sm:$0xff]  ;;  %v5383_v25 = vld [vmem:[#allocation6 + $0x100] sm:$0xff] }
 0x18f   :  { %996 = vmatpush1.msra.mxu0 %v7012_v26  ;;  %1029 = vmatprep.mubr.f32.mxu0 %v7013_v27  ;;  %v5387_v26 = vld [vmem:[#allocation6 + $0x110] sm:$0xff] }
 0x190   :  { %1067 = vmatpush1.msra.mxu1 %v7014_v28  ;;  %1100 = vmatprep.mubr.f32.mxu1 %v7013_v27  ;;  %v5389_v28 = vld [vmem:[#allocation6 + $0xe8] sm:$0xff] }
 0x191   :  { %1206 = vmatprep.subr.mxu0 %v5295_v2  ;;  %1277 = vmatprep.subr.mxu1 %v5297_v51 }
 0x230   :  { %v790_v30 = vpop.f32.mrf.mxu0  ;;  %v861_v36 = vpop.f32.mrf.mxu1 }
 0x231   :  { %v866_v31 = vadd.f32 %v790_v30, %v5134_v59  ;;  %v868_v43 = vadd.f32 %v861_v36, %v7017_v42  ;;  %v5391_v30 = vld [vmem:[#allocation6 + $0xf8] sm:$0xff]  ;;  %v5407_v36 = vld [vmem:[#allocation6 + $0xd0] sm:$0xff]  ;;  %v5423_v42 = vld [vmem:[#allocation6 + $0x88] sm:$0xff] }
 0x232   :  { %v792_v32 = vpop.f32.mrf.mxu0  ;;  %v863_v39 = vpop.f32.mrf.mxu1 }
 0x233   :  { %v4256_v33 = vmul.f32 -1.442695, %v866_v31  ;;  %v867_v35 = vadd.f32 %v792_v32, %v7015_v34  ;;  %v869_v41 = vadd.f32 %v863_v39, %v7016_v40  ;;  %v5395_v31 = vld [vmem:[#allocation6 + $0xe0] sm:$0xff]  ;;  %v5397_v32 = vld [vmem:[#allocation6 + $0xf0] sm:$0xff]  ;;  %v5403_v34 = vld [vmem:[#allocation6 + $0xd8] sm:$0xff] }
 0x234   :  { %v5413_v39 = vld [vmem:[#allocation6 + $0xb8] sm:$0xff]  ;;  %v5417_v40 = vld [vmem:[#allocation6 + $0xa0] sm:$0xff] }
 0x235   :  { %4380 = vpow2.f32 %v4256_v33  ;;  %v4257_v37 = vmul.f32 -1.442695, %v867_v35  ;;  %v4258_v44 = vmul.f32 -1.442695, %v869_v41  ;;  %v5399_v33 = vld [vmem:[#allocation6 + $0xc8] sm:$0xff]  ;;  %v5405_v35 = vld [vmem:[#allocation6 + $0xc0] sm:$0xff] }
 0x236   :  { %v5419_v41 = vld [vmem:[#allocation6 + $0xb0] sm:$0xff] }
 0x237   :  { %4382 = vpow2.f32 %v4257_v37  ;;  %v5411_v37 = vld [vmem:[#allocation6 + $0xa8] sm:$0xff] }
 0x238   :  { %4384 = vtanh.f32 %v868_v43  ;;  %v5425_v43 = vld [vmem:[#allocation6 + $0x98] sm:$0xff] }
 0x239   :  { %4386 = vpow2.f32 %v4258_v44  ;;  %v5429_v44 = vld [vmem:[#allocation6 + $0x80] sm:$0xff] }
 0x242   :  { %v4381_v45 = vpop.eup %4380 }
 0x243   :  { %v873_v46 = vadd.f32 1.0, %v4381_v45  ;;  %v5431_v45 = vld [vmem:[#allocation6 + $0x90] sm:$0xff] }
 0x244   :  { %v4383_v48 = vpop.eup %4382  ;;  %7021 = vst [vmem:[#allocation14_spill] sm:$0xff] %v5431_v45 }
 0x245   :  { %4388 = vrcp.f32 %v873_v46  ;;  %v879_v49 = vadd.f32 1.0, %v4383_v48  ;;  %v4385_v50 = vpop.eup %4384  ;;  %v5435_v46 = vld [vmem:[#allocation6 + $0x68] sm:$0xff]  ;;  %v5437_v48 = vld [vmem:[#allocation6 + $0x78] sm:$0xff] }
 0x246   :  { %v4387_v59 = vpop.eup %4386  ;;  %7022 = vst [vmem:[#allocation15_spill] sm:$0xff] %v5435_v46  ;;  %7023 = vst [vmem:[#allocation16_spill] sm:$0xff] %v5437_v48 }
 0x247   :  { %4390 = vrcp.f32 %v879_v49  ;;  %v886_v53 = vadd.f32 1.0, %v4387_v59  ;;  %v5441_v49 = vld [vmem:[#allocation6 + $0x60] sm:$0xff]  ;;  %v5447_v59 = vld [vmem:[#allocation6 + $0x48] sm:$0xff] }
 0x248   :  { %7024 = vst [vmem:[#allocation17_spill] sm:$0xff] %v5441_v49  ;;  %7026 = vst [vmem:[#allocation19_spill] sm:$0xff] %v5447_v59 }
 0x249   :  { %4392 = vrcp.f32 %v886_v53  ;;  %v5459_v53 = vld [vmem:[#allocation6 + $0x28] sm:$0xff] }
 0x24a   :  { %7030 = vst [vmem:[#allocation23_spill] sm:$0xff] %v5459_v53 }
 0x252   :  { %v4389_v20 = vpop.eup %4388 }
 0x253   :  { %v890_v62 = vmul.f32 %v4389_v20, %v4385_v50  ;;  %v5443_v50 = vld [vmem:[#allocation6 + $0x70] sm:$0xff]  ;;  %v5449_v20 = vld [vmem:[#allocation6 + $0x58] sm:$0xff] }
 0x254   :  { %v4391_v54 = vpop.eup %4390  ;;  %7025 = vst [vmem:[#allocation18_spill] sm:$0xff] %v5443_v50  ;;  %7027 = vst [vmem:[#allocation20_spill] sm:$0xff] %v5449_v20 }
 0x255   :  { %v889_v1 = vmul.f32 %v4391_v54, %v5210_v4  ;;  %v5321_v4 = vld [vmem:[#allocation6 + $0x1b8] sm:$0xff]  ;;  %v5455_v54 = vld [vmem:[#allocation6 + $0x50] sm:$0xff] }
 0x256   :  { %v4393_v11 = vpop.eup %4392  ;;  %7029 = vst [vmem:[#allocation22_spill] sm:$0xff] %v5455_v54 }
 0x257   :  { %v5286_v63 = vadd.f32 %v890_v62, %v889_v1  ;;  %v5453_v62 = vld [vmem:[#allocation6 + $0x40] sm:$0xff]  ;;  %v5461_v1 = vld [vmem:[#allocation6 + $0x38] sm:$0xff] }
 0x258   :  { %7028 = vst [vmem:[#allocation21_spill] sm:$0xff] %v5453_v62  ;;  %7031 = vst [vmem:[#allocation24_spill] sm:$0xff] %v5461_v1 }
 0x259   :  { %4394 = vtanh.f32 %v5286_v63 }
 0x266   :  { %v4395_v38 = vpop.eup %4394 }
 0x267   :  { %v5289_v61 = vmul.f32 %v4395_v38, %v4393_v11  ;;  %v5465_v11 = vld [vmem:[#allocation6 + $0x20] sm:$0xff]  ;;  %v5467_v38 = vld [vmem:[#allocation6 + $0x30] sm:$0xff] }
 0x268   :  { %7032 = vst [vmem:[#allocation25_spill] sm:$0xff] %v5465_v11  ;;  %7033 = vst [vmem:[#allocation26_spill] sm:$0xff] %v5467_v38 }
 0x269   :  { %7018 = vst [vmem:[#allocation11_spill] sm:$0xff] %v5289_v61  ;;  %1030 = vmatmul.mubr.f32.vlgmr.msra.gmra.mxu0 %v5289_v61  ;;  %1101 = vmatmul.mubr.f32.vlgmr.msra.gmra.mxu1 %v5289_v61  ;;  %v5471_v61 = vld [vmem:[#allocation6 + $0x8] sm:$0xff] }
 0x26a   :  { %1270 = vmatprep.mubr.f32.mxu0 %v7013_v27  ;;  %1341 = vmatprep.mubr.f32.mxu1 %v7013_v27  ;;  %7034 = vst [vmem:[#allocation27_spill] sm:$0xff] %v5471_v61  ;;  %v5477_v27 = vld [vmem:[#allocation6] sm:$0xff] }
 0x26b   :  { %1207 = vmatpush1.msra.mxu0 %v5301_v55  ;;  %1278 = vmatpush1.msra.mxu1 %v5303_v29  ;;  %7036 = vst [vmem:[#allocation29_spill] sm:$0xff] %v5477_v27 }
 0x26c   :  { %1208 = vmatprep.subr.mxu0 %v5307_v0  ;;  %1279 = vmatprep.subr.mxu1 %v5309_v57 }
 0x26d   :  { %1209 = vmatpush1.msra.mxu0 %v5313_v56  ;;  %1280 = vmatpush1.msra.mxu1 %v5315_v60 }
 0x26e   :  { %1210 = vmatprep.subr.mxu0 %v5319_v3  ;;  %1281 = vmatprep.subr.mxu1 %v5321_v4 }
 0x26f   :  { %1211 = vmatpush1.msra.mxu0 %v5325_v52  ;;  %1282 = vmatpush1.msra.mxu1 %v5327_v58 }
 0x270   :  { %1212 = vmatprep.subr.mxu0 %v5331_v5  ;;  %1283 = vmatprep.subr.mxu1 %v5333_v6 }
 0x271   :  { %1213 = vmatpush1.msra.mxu0 %v5337_v7  ;;  %1284 = vmatpush1.msra.mxu1 %v5339_v8 }
 0x272   :  { %1214 = vmatprep.subr.mxu0 %v5343_v9  ;;  %1285 = vmatprep.subr.mxu1 %v5345_v10 }
 0x273   :  { %1215 = vmatpush1.msra.mxu0 %v5349_v12  ;;  %1286 = vmatpush1.msra.mxu1 %v5351_v13 }
 0x274   :  { %1216 = vmatprep.subr.mxu0 %v5355_v14  ;;  %1287 = vmatprep.subr.mxu1 %v5357_v15 }
 0x275   :  { %1217 = vmatpush1.msra.mxu0 %v5361_v16  ;;  %1288 = vmatpush1.msra.mxu1 %v5363_v17 }
 0x276   :  { %1218 = vmatprep.subr.mxu0 %v5367_v18  ;;  %1289 = vmatprep.subr.mxu1 %v5369_v19 }
 0x277   :  { %1219 = vmatpush1.msra.mxu0 %v5373_v21  ;;  %1290 = vmatpush1.msra.mxu1 %v5375_v22 }
 0x278   :  { %1220 = vmatprep.subr.mxu0 %v5379_v23  ;;  %1291 = vmatprep.subr.mxu1 %v5381_v24 }
 0x279   :  { %1221 = vmatpush1.msra.mxu0 %v5383_v25  ;;  %1292 = vmatpush1.msra.mxu1 %v5387_v26 }
 0x27a   :  { %1222 = vmatprep.subr.mxu0 %v5389_v28  ;;  %1293 = vmatprep.subr.mxu1 %v5391_v30 }
 0x27b   :  { %1223 = vmatpush1.msra.mxu0 %v5395_v31  ;;  %1294 = vmatpush1.msra.mxu1 %v5397_v32 }
 0x27c   :  { %1224 = vmatprep.subr.mxu0 %v5399_v33  ;;  %1295 = vmatprep.subr.mxu1 %v5403_v34 }
 0x27d   :  { %1225 = vmatpush1.msra.mxu0 %v5405_v35  ;;  %1296 = vmatpush1.msra.mxu1 %v5407_v36 }
 0x27e   :  { %1226 = vmatprep.subr.mxu0 %v5411_v37  ;;  %1297 = vmatprep.subr.mxu1 %v5413_v39 }
 0x27f   :  { %1227 = vmatpush1.msra.mxu0 %v5417_v40  ;;  %1298 = vmatpush1.msra.mxu1 %v5419_v41 }
 0x280   :  { %1228 = vmatprep.subr.mxu0 %v5423_v42  ;;  %1299 = vmatprep.subr.mxu1 %v5425_v43 }
 0x281   :  { %1229 = vmatpush1.msra.mxu0 %v5429_v44  ;;  %1300 = vmatpush1.msra.mxu1 %v5431_v45 }
 0x282   :  { %1230 = vmatprep.subr.mxu0 %v5435_v46  ;;  %1301 = vmatprep.subr.mxu1 %v5437_v48  ;;  %v7041_v48 = vld [vmem:[#allocation37_spill] sm:$0xff] }
 0x283   :  { %1231 = vmatpush1.msra.mxu0 %v5441_v49  ;;  %1302 = vmatpush1.msra.mxu1 %v5443_v50  ;;  %v7040_v49 = vld [vmem:[#allocation39_spill] sm:$0xff] }
 0x284   :  { %1232 = vmatprep.subr.mxu0 %v5447_v59  ;;  %1303 = vmatprep.subr.mxu1 %v5449_v20  ;;  %v5479_v59 = vld [vmem:[#allocation6 + $0x10] sm:$0xff] }
 0x285   :  { %1233 = vmatpush1.msra.mxu0 %v5453_v62  ;;  %1304 = vmatpush1.msra.mxu1 %v5455_v54  ;;  %7037 = vst [vmem:[#allocation30_spill] sm:$0xff] %v5479_v59 }
 0x286   :  { %1234 = vmatprep.subr.mxu0 %v5459_v53  ;;  %1305 = vmatprep.subr.mxu1 %v5461_v1  ;;  %v7038_v53 = vld [vmem:[#allocation36_spill] sm:$0xff] }
 0x287   :  { %1235 = vmatpush1.msra.mxu0 %v5465_v11  ;;  %1306 = vmatpush1.msra.mxu1 %v5467_v38  ;;  %v7039_v11 = vld [vmem:[#allocation38_spill] sm:$0xff] }
 0x288   :  { %1236 = vmatprep.subr.mxu0 %v5471_v61  ;;  %1307 = vmatprep.subr.mxu1 %v5473_v47 }
 0x289   :  { %1237 = vmatpush1.msra.mxu0 %v5477_v27  ;;  %1308 = vmatpush1.msra.mxu1 %v5479_v59 }
 0x28a   :  { %1447 = vmatprep.subr.mxu0 %v5295_v2  ;;  %1518 = vmatprep.subr.mxu1 %v5297_v51 }
 0x329   :  { %v1031_v1 = vpop.f32.mrf.mxu0  ;;  %v1102_v38 = vpop.f32.mrf.mxu1 }
 0x32a   :  { %v1107_v54 = vadd.f32 %v1031_v1, %v7038_v53  ;;  %v1109_v59 = vadd.f32 %v1102_v38, %v7041_v48  ;;  %v7049_v38 = vld [vmem:[#allocation20_spill] sm:$0xff] }
 0x32b   :  { %v1033_v62 = vpop.f32.mrf.mxu0  ;;  %v1104_v47 = vpop.f32.mrf.mxu1 }
 0x32c   :  { %v4259_v20 = vmul.f32 -1.442695, %v1107_v54  ;;  %v1108_v50 = vadd.f32 %v1033_v62, %v7039_v11  ;;  %v1110_v27 = vadd.f32 %v1104_v47, %v7040_v49  ;;  %v7047_v49 = vld [vmem:[#allocation18_spill] sm:$0xff] }
 0x32e   :  { %4396 = vpow2.f32 %v4259_v20  ;;  %v4260_v61 = vmul.f32 -1.442695, %v1108_v50  ;;  %v4261_v46 = vmul.f32 -1.442695, %v1110_v27 }
 0x330   :  { %4398 = vpow2.f32 %v4260_v61 }
 0x331   :  { %4400 = vtanh.f32 %v1109_v59  ;;  %v7048_v59 = vld [vmem:[#allocation19_spill] sm:$0xff] }
 0x332   :  { %4402 = vpow2.f32 %v4261_v46  ;;  %v7046_v46 = vld [vmem:[#allocation17_spill] sm:$0xff] }
 0x33b   :  { %v4397_v2 = vpop.eup %4396 }
 0x33c   :  { %v1114_v45 = vadd.f32 1.0, %v4397_v2 }
 0x33d   :  { %v4399_v51 = vpop.eup %4398 }
 0x33e   :  { %4404 = vrcp.f32 %v1114_v45  ;;  %v1120_v53 = vadd.f32 1.0, %v4399_v51  ;;  %v4401_v54 = vpop.eup %4400  ;;  %v7044_v51 = vld [vmem:[#allocation15_spill] sm:$0xff]  ;;  %v7045_v45 = vld [vmem:[#allocation16_spill] sm:$0xff] }
 0x33f   :  { %v4403_v62 = vpop.eup %4402 }
 0x340   :  { %4406 = vrcp.f32 %v1120_v53  ;;  %v1127_v61 = vadd.f32 1.0, %v4403_v62  ;;  %v7050_v53 = vld [vmem:[#allocation21_spill] sm:$0xff]  ;;  %v7052_v62 = vld [vmem:[#allocation23_spill] sm:$0xff] }
 0x342   :  { %4408 = vrcp.f32 %v1127_v61  ;;  %v7056_v61 = vld [vmem:[#allocation27_spill] sm:$0xff] }
 0x34b   :  { %v4405_v20 = vpop.eup %4404 }
 0x34c   :  { %v1131_v1 = vmul.f32 %v4405_v20, %v4401_v54  ;;  %v7051_v54 = vld [vmem:[#allocation22_spill] sm:$0xff]  ;;  %v7053_v20 = vld [vmem:[#allocation24_spill] sm:$0xff] }
 0x34d   :  { %v4407_v50 = vpop.eup %4406 }
 0x34e   :  { %v1130_v11 = vmul.f32 %v4407_v50, %v5286_v63  ;;  %v7043_v63 = vld [vmem:[#allocation14_spill] sm:$0xff] }
 0x34f   :  { %v4409_v27 = vpop.eup %4408  ;;  %v7055_v50 = vld [vmem:[#allocation26_spill] sm:$0xff] }
 0x350   :  { %v5494_v47 = vadd.f32 %v1131_v1, %v1130_v11  ;;  %v7054_v1 = vld [vmem:[#allocation25_spill] sm:$0xff]  ;;  %v7057_v11 = vld [vmem:[#allocation28_spill] sm:$0xff] }
 0x352   :  { %4410 = vtanh.f32 %v5494_v47 }
 0x35f   :  { %v4411_v2 = vpop.eup %4410 }
 0x360   :  { %v5497_v48 = vmul.f32 %v4411_v2, %v4409_v27  ;;  %v7058_v27 = vld [vmem:[#allocation29_spill] sm:$0xff]  ;;  %v7059_v2 = vmov 0.0  }
 0x362   :  { %7042 = vst [vmem:[#allocation31_spill] sm:$0xff] %v5497_v48  ;;  %1271 = vmatmul.mubr.f32.vlgmr.msra.gmra.mxu0 %v5497_v48  ;;  %1342 = vmatmul.mubr.f32.vlgmr.msra.gmra.mxu1 %v5497_v48  ;;  %v7060_v48 = vld [vmem:[#allocation30_spill] sm:$0xff] }
 0x363   :  { %1448 = vmatpush1.msra.mxu0 %v5301_v55  ;;  %1519 = vmatpush1.msra.mxu1 %v5303_v29 }
 0x364   :  { %1449 = vmatprep.subr.mxu0 %v5307_v0  ;;  %1520 = vmatprep.subr.mxu1 %v5309_v57 }
 0x365   :  { %1450 = vmatpush1.msra.mxu0 %v5313_v56  ;;  %1521 = vmatpush1.msra.mxu1 %v5315_v60 }
 0x366   :  { %1451 = vmatprep.subr.mxu0 %v5319_v3  ;;  %1522 = vmatprep.subr.mxu1 %v5321_v4 }
 0x367   :  { %1452 = vmatpush1.msra.mxu0 %v5325_v52  ;;  %1523 = vmatpush1.msra.mxu1 %v5327_v58 }
 0x368   :  { %1453 = vmatprep.subr.mxu0 %v5331_v5  ;;  %1524 = vmatprep.subr.mxu1 %v5333_v6 }
 0x369   :  { %1454 = vmatpush1.msra.mxu0 %v5337_v7  ;;  %1525 = vmatpush1.msra.mxu1 %v5339_v8 }
 0x36a   :  { %1455 = vmatprep.subr.mxu0 %v5343_v9  ;;  %1526 = vmatprep.subr.mxu1 %v5345_v10 }
 0x36b   :  { %1456 = vmatpush1.msra.mxu0 %v5349_v12  ;;  %1527 = vmatpush1.msra.mxu1 %v5351_v13 }
 0x36c   :  { %1457 = vmatprep.subr.mxu0 %v5355_v14  ;;  %1528 = vmatprep.subr.mxu1 %v5357_v15 }
 0x36d   :  { %1458 = vmatpush1.msra.mxu0 %v5361_v16  ;;  %1529 = vmatpush1.msra.mxu1 %v5363_v17 }
 0x36e   :  { %1459 = vmatprep.subr.mxu0 %v5367_v18  ;;  %1530 = vmatprep.subr.mxu1 %v5369_v19 }
 0x36f   :  { %1460 = vmatpush1.msra.mxu0 %v5373_v21  ;;  %1531 = vmatpush1.msra.mxu1 %v5375_v22 }
 0x370   :  { %1461 = vmatprep.subr.mxu0 %v5379_v23  ;;  %1532 = vmatprep.subr.mxu1 %v5381_v24 }
 0x371   :  { %1462 = vmatpush1.msra.mxu0 %v5383_v25  ;;  %1533 = vmatpush1.msra.mxu1 %v5387_v26 }
 0x372   :  { %1463 = vmatprep.subr.mxu0 %v5389_v28  ;;  %1534 = vmatprep.subr.mxu1 %v5391_v30 }
 0x373   :  { %1464 = vmatpush1.msra.mxu0 %v5395_v31  ;;  %1535 = vmatpush1.msra.mxu1 %v5397_v32 }
 0x374   :  { %1465 = vmatprep.subr.mxu0 %v5399_v33  ;;  %1536 = vmatprep.subr.mxu1 %v5403_v34 }
 0x375   :  { %1466 = vmatpush1.msra.mxu0 %v5405_v35  ;;  %1537 = vmatpush1.msra.mxu1 %v5407_v36 }
 0x376   :  { %1467 = vmatprep.subr.mxu0 %v5411_v37  ;;  %1538 = vmatprep.subr.mxu1 %v5413_v39 }
 0x377   :  { %1468 = vmatpush1.msra.mxu0 %v5417_v40  ;;  %1539 = vmatpush1.msra.mxu1 %v5419_v41 }
 0x378   :  { %1469 = vmatprep.subr.mxu0 %v5423_v42  ;;  %1540 = vmatprep.subr.mxu1 %v5425_v43 }
 0x379   :  { %1470 = vmatpush1.msra.mxu0 %v5429_v44  ;;  %1541 = vmatpush1.msra.mxu1 %v7043_v63 }
 0x37a   :  { %1471 = vmatprep.subr.mxu0 %v7044_v51  ;;  %1542 = vmatprep.subr.mxu1 %v7045_v45  ;;  %v7066_v45 = vld [vmem:[#allocation41_spill] sm:$0xff] }
 0x37b   :  { %1472 = vmatpush1.msra.mxu0 %v7046_v46  ;;  %1543 = vmatpush1.msra.mxu1 %v7047_v49  ;;  %v7065_v46 = vld [vmem:[#allocation43_spill] sm:$0xff] }
 0x37c   :  { %1473 = vmatprep.subr.mxu0 %v7048_v59  ;;  %1544 = vmatprep.subr.mxu1 %v7049_v38 }
 0x37d   :  { %1474 = vmatpush1.msra.mxu0 %v7050_v53  ;;  %1545 = vmatpush1.msra.mxu1 %v7051_v54  ;;  %v7061_v54 = vld [vmem:[#allocation12_spill] sm:$0xff] }
 0x37e   :  { %1475 = vmatprep.subr.mxu0 %v7052_v62  ;;  %1546 = vmatprep.subr.mxu1 %v7053_v20  ;;  %v7062_v62 = vld [vmem:[#allocation13_spill] sm:$0xff] }
 0x37f   :  { %1476 = vmatpush1.msra.mxu0 %v7054_v1  ;;  %1547 = vmatpush1.msra.mxu1 %v7055_v50  ;;  %v7063_v1 = vld [vmem:[#allocation40_spill] sm:$0xff] }
 0x380   :  { %1477 = vmatprep.subr.mxu0 %v7056_v61  ;;  %1548 = vmatprep.subr.mxu1 %v7057_v11  ;;  %v7064_v61 = vld [vmem:[#allocation42_spill] sm:$0xff] }
 0x381   :  { %1478 = vmatpush1.msra.mxu0 %v7058_v27  ;;  %1511 = vmatprep.mubr.f32.mxu0 %v7059_v2 }
 0x382   :  { %1549 = vmatpush1.msra.mxu1 %v7060_v48  ;;  %1582 = vmatprep.mubr.f32.mxu1 %v7059_v2 }
 0x383   :  { %1688 = vmatprep.subr.mxu0 %v7061_v54  ;;  %1759 = vmatprep.subr.mxu1 %v7062_v62 }
 0x422   :  { %v1272_v20 = vpop.f32.mrf.mxu0  ;;  %v1343_v11 = vpop.f32.mrf.mxu1 }
 0x423   :  { %v1348_v53 = vadd.f32 %v1272_v20, %v7063_v1  ;;  %v1350_v2 = vadd.f32 %v1343_v11, %v7066_v45  ;;  %v7073_v11 = vld [vmem:[#allocation19_spill] sm:$0xff] }
 0x424   :  { %v1274_v50 = vpop.f32.mrf.mxu0  ;;  %v1345_v49 = vpop.f32.mrf.mxu1 }
 0x425   :  { %v4262_v38 = vmul.f32 -1.442695, %v1348_v53  ;;  %v1349_v59 = vadd.f32 %v1274_v50, %v7064_v61  ;;  %v1351_v48 = vadd.f32 %v1345_v49, %v7065_v46 }
 0x427   :  { %4412 = vpow2.f32 %v4262_v38  ;;  %v4263_v27 = vmul.f32 -1.442695, %v1349_v59  ;;  %v4264_v51 = vmul.f32 -1.442695, %v1351_v48 }
 0x429   :  { %4414 = vpow2.f32 %v4263_v27 }
 0x42a   :  { %4416 = vtanh.f32 %v1350_v2  ;;  %v7074_v2 = vld [vmem:[#allocation20_spill] sm:$0xff] }
 0x42b   :  { %4418 = vpow2.f32 %v4264_v51  ;;  %v7070_v51 = vld [vmem:[#allocation16_spill] sm:$0xff] }
 0x434   :  { %v4413_v54 = vpop.eup %4412 }
 0x435   :  { %v1355_v63 = vadd.f32 1.0, %v4413_v54  ;;  %v7071_v54 = vld [vmem:[#allocation17_spill] sm:$0xff] }
 0x436   :  { %v4415_v62 = vpop.eup %4414 }
 0x437   :  { %4420 = vrcp.f32 %v1355_v63  ;;  %v1361_v20 = vadd.f32 1.0, %v4415_v62  ;;  %v4417_v53 = vpop.eup %4416  ;;  %v7069_v63 = vld [vmem:[#allocation15_spill] sm:$0xff]  ;;  %v7072_v62 = vld [vmem:[#allocation18_spill] sm:$0xff] }
 0x438   :  { %v4419_v1 = vpop.eup %4418 }
 0x439   :  { %4422 = vrcp.f32 %v1361_v20  ;;  %v1368_v61 = vadd.f32 1.0, %v4419_v1  ;;  %v7075_v20 = vld [vmem:[#allocation21_spill] sm:$0xff]  ;;  %v7077_v1 = vld [vmem:[#allocation23_spill] sm:$0xff] }
 0x43b   :  { %4424 = vrcp.f32 %v1368_v61  ;;  %v7081_v61 = vld [vmem:[#allocation27_spill] sm:$0xff] }
 0x444   :  { %v4421_v38 = vpop.eup %4420 }
 0x445   :  { %v1372_v50 = vmul.f32 %v4421_v38, %v4417_v53  ;;  %v7076_v53 = vld [vmem:[#allocation22_spill] sm:$0xff]  ;;  %v7078_v38 = vld [vmem:[#allocation24_spill] sm:$0xff] }
 0x446   :  { %v4423_v59 = vpop.eup %4422 }
 0x447   :  { %v1371_v27 = vmul.f32 %v4423_v59, %v5494_v47  ;;  %v7068_v47 = vld [vmem:[#allocation14_spill] sm:$0xff] }
 0x448   :  { %v4425_v48 = vpop.eup %4424  ;;  %v7080_v59 = vld [vmem:[#allocation26_spill] sm:$0xff] }
 0x449   :  { %v5572_v46 = vadd.f32 %v1372_v50, %v1371_v27  ;;  %v7079_v50 = vld [vmem:[#allocation25_spill] sm:$0xff]  ;;  %v7082_v27 = vld [vmem:[#allocation28_spill] sm:$0xff] }
 0x44b   :  { %4426 = vtanh.f32 %v5572_v46 }
 0x458   :  { %v4427_v45 = vpop.eup %4426 }
 0x459   :  { %v5575_v49 = vmul.f32 %v4427_v45, %v4425_v48  ;;  %v7083_v48 = vld [vmem:[#allocation29_spill] sm:$0xff]  ;;  %v7084_v45 = vmov 0.0  }
 0x45b   :  { %7067 = vst [vmem:[#allocation34_spill] sm:$0xff] %v5575_v49  ;;  %1512 = vmatmul.mubr.f32.vlgmr.msra.gmra.mxu0 %v5575_v49  ;;  %1583 = vmatmul.mubr.f32.vlgmr.msra.gmra.mxu1 %v5575_v49  ;;  %v7085_v49 = vld [vmem:[#allocation30_spill] sm:$0xff] }
 0x45c   :  { %1689 = vmatpush1.msra.mxu0 %v5301_v55  ;;  %1760 = vmatpush1.msra.mxu1 %v5303_v29 }
 0x45d   :  { %1690 = vmatprep.subr.mxu0 %v5307_v0  ;;  %1761 = vmatprep.subr.mxu1 %v5309_v57 }
 0x45e   :  { %1691 = vmatpush1.msra.mxu0 %v5313_v56  ;;  %1762 = vmatpush1.msra.mxu1 %v5315_v60 }
 0x45f   :  { %1692 = vmatprep.subr.mxu0 %v5319_v3  ;;  %1763 = vmatprep.subr.mxu1 %v5321_v4 }
 0x460   :  { %1693 = vmatpush1.msra.mxu0 %v5325_v52  ;;  %1764 = vmatpush1.msra.mxu1 %v5327_v58 }
 0x461   :  { %1694 = vmatprep.subr.mxu0 %v5331_v5  ;;  %1765 = vmatprep.subr.mxu1 %v5333_v6 }
 0x462   :  { %1695 = vmatpush1.msra.mxu0 %v5337_v7  ;;  %1766 = vmatpush1.msra.mxu1 %v5339_v8 }
 0x463   :  { %1696 = vmatprep.subr.mxu0 %v5343_v9  ;;  %1767 = vmatprep.subr.mxu1 %v5345_v10 }
 0x464   :  { %1697 = vmatpush1.msra.mxu0 %v5349_v12  ;;  %1768 = vmatpush1.msra.mxu1 %v5351_v13 }
 0x465   :  { %1698 = vmatprep.subr.mxu0 %v5355_v14  ;;  %1769 = vmatprep.subr.mxu1 %v5357_v15 }
 0x466   :  { %1699 = vmatpush1.msra.mxu0 %v5361_v16  ;;  %1770 = vmatpush1.msra.mxu1 %v5363_v17 }
 0x467   :  { %1700 = vmatprep.subr.mxu0 %v5367_v18  ;;  %1771 = vmatprep.subr.mxu1 %v5369_v19 }
 0x468   :  { %1701 = vmatpush1.msra.mxu0 %v5373_v21  ;;  %1772 = vmatpush1.msra.mxu1 %v5375_v22 }
 0x469   :  { %1702 = vmatprep.subr.mxu0 %v5379_v23  ;;  %1773 = vmatprep.subr.mxu1 %v5381_v24 }
 0x46a   :  { %1703 = vmatpush1.msra.mxu0 %v5383_v25  ;;  %1774 = vmatpush1.msra.mxu1 %v5387_v26 }
 0x46b   :  { %1704 = vmatprep.subr.mxu0 %v5389_v28  ;;  %1775 = vmatprep.subr.mxu1 %v5391_v30 }
 0x46c   :  { %1705 = vmatpush1.msra.mxu0 %v5395_v31  ;;  %1776 = vmatpush1.msra.mxu1 %v5397_v32 }
 0x46d   :  { %1706 = vmatprep.subr.mxu0 %v5399_v33  ;;  %1777 = vmatprep.subr.mxu1 %v5403_v34 }
 0x46e   :  { %1707 = vmatpush1.msra.mxu0 %v5405_v35  ;;  %1778 = vmatpush1.msra.mxu1 %v5407_v36 }
 0x46f   :  { %1708 = vmatprep.subr.mxu0 %v5411_v37  ;;  %1779 = vmatprep.subr.mxu1 %v5413_v39 }
 0x470   :  { %1709 = vmatpush1.msra.mxu0 %v5417_v40  ;;  %1780 = vmatpush1.msra.mxu1 %v5419_v41 }
 0x471   :  { %1710 = vmatprep.subr.mxu0 %v5423_v42  ;;  %1781 = vmatprep.subr.mxu1 %v5425_v43 }
 0x472   :  { %1711 = vmatpush1.msra.mxu0 %v5429_v44  ;;  %1782 = vmatpush1.msra.mxu1 %v7068_v47 }
 0x473   :  { %1712 = vmatprep.subr.mxu0 %v7069_v63  ;;  %1783 = vmatprep.subr.mxu1 %v7070_v51  ;;  %v7091_v51 = vld [vmem:[#allocation45_spill] sm:$0xff] }
 0x474   :  { %1713 = vmatpush1.msra.mxu0 %v7071_v54  ;;  %1784 = vmatpush1.msra.mxu1 %v7072_v62  ;;  %v7090_v54 = vld [vmem:[#allocation47_spill] sm:$0xff] }
 0x475   :  { %1714 = vmatprep.subr.mxu0 %v7073_v11  ;;  %1785 = vmatprep.subr.mxu1 %v7074_v2 }
 0x476   :  { %1715 = vmatpush1.msra.mxu0 %v7075_v20  ;;  %1786 = vmatpush1.msra.mxu1 %v7076_v53  ;;  %v7086_v53 = vld [vmem:[#allocation12_spill] sm:$0xff] }
 0x477   :  { %1716 = vmatprep.subr.mxu0 %v7077_v1  ;;  %1787 = vmatprep.subr.mxu1 %v7078_v38  ;;  %v7087_v1 = vld [vmem:[#allocation13_spill] sm:$0xff] }
 0x478   :  { %1717 = vmatpush1.msra.mxu0 %v7079_v50  ;;  %1788 = vmatpush1.msra.mxu1 %v7080_v59  ;;  %v7088_v50 = vld [vmem:[#allocation44_spill] sm:$0xff] }
 0x479   :  { %1718 = vmatprep.subr.mxu0 %v7081_v61  ;;  %1789 = vmatprep.subr.mxu1 %v7082_v27  ;;  %v7089_v61 = vld [vmem:[#allocation46_spill] sm:$0xff] }
 0x47a   :  { %1719 = vmatpush1.msra.mxu0 %v7083_v48  ;;  %1752 = vmatprep.mubr.f32.mxu0 %v7084_v45 }
 0x47b   :  { %1790 = vmatpush1.msra.mxu1 %v7085_v49  ;;  %1823 = vmatprep.mubr.f32.mxu1 %v7084_v45 }
 0x47c   :  { %1929 = vmatprep.subr.mxu0 %v7086_v53  ;;  %2000 = vmatprep.subr.mxu1 %v7087_v1 }
 0x51b   :  { %v1513_v38 = vpop.f32.mrf.mxu0  ;;  %v1584_v27 = vpop.f32.mrf.mxu1 }
 0x51c   :  { %v1589_v20 = vadd.f32 %v1513_v38, %v7088_v50  ;;  %v1591_v45 = vadd.f32 %v1584_v27, %v7091_v51  ;;  %v2167_v27 = vld [vmem:[#allocation6 + $0x1e8] sm:$0xff] }
 0x51d   :  { %v1515_v59 = vpop.f32.mrf.mxu0  ;;  %v1586_v62 = vpop.f32.mrf.mxu1 }
 0x51e   :  { %v4265_v2 = vmul.f32 -1.442695, %v1589_v20  ;;  %v1590_v11 = vadd.f32 %v1515_v59, %v7089_v61  ;;  %v1592_v49 = vadd.f32 %v1586_v62, %v7090_v54 }
 0x520   :  { %4428 = vpow2.f32 %v4265_v2  ;;  %v4266_v48 = vmul.f32 -1.442695, %v1590_v11  ;;  %v4267_v63 = vmul.f32 -1.442695, %v1592_v49 }
 0x522   :  { %4430 = vpow2.f32 %v4266_v48 }
 0x523   :  { %4432 = vtanh.f32 %v1591_v45  ;;  %v2169_v45 = vld [vmem:[#allocation6 + $0x1f8] sm:$0xff] }
 0x524   :  { %4434 = vpow2.f32 %v4267_v63 }
 0x52d   :  { %v4429_v53 = vpop.eup %4428 }
 0x52e   :  { %v1596_v47 = vadd.f32 1.0, %v4429_v53  ;;  %v2166_v53 = vld [vmem:[#allocation6 + $0x1e0] sm:$0xff] }
 0x52f   :  { %v4431_v1 = vpop.eup %4430 }
 0x530   :  { %4436 = vrcp.f32 %v1596_v47  ;;  %v1602_v38 = vadd.f32 1.0, %v4431_v1  ;;  %v4433_v20 = vpop.eup %4432  ;;  %v2168_v1 = vld [vmem:[#allocation6 + $0x1f0] sm:$0xff] }
 0x531   :  { %v4435_v50 = vpop.eup %4434 }
 0x532   :  { %4438 = vrcp.f32 %v1602_v38  ;;  %v1609_v61 = vadd.f32 1.0, %v4435_v50  ;;  %v2163_v38 = vld [vmem:[#allocation6 + $0x1c8] sm:$0xff]  ;;  %v2162_v50 = vld [vmem:[#allocation6 + $0x1c0] sm:$0xff] }
 0x534   :  { %4440 = vrcp.f32 %v1609_v61  ;;  %v2158_v61 = vld [vmem:[#allocation6 + $0x1a0] sm:$0xff] }
 0x53d   :  { %v4437_v2 = vpop.eup %4436 }
 0x53e   :  { %v1613_v59 = vmul.f32 %v4437_v2, %v4433_v20  ;;  %v2165_v20 = vld [vmem:[#allocation6 + $0x1d8] sm:$0xff]  ;;  %v2164_v2 = vld [vmem:[#allocation6 + $0x1d0] sm:$0xff] }
 0x53f   :  { %v4439_v11 = vpop.eup %4438 }
 0x540   :  { %v1612_v48 = vmul.f32 %v4439_v11, %v5572_v46  ;;  %v2161_v11 = vld [vmem:[#allocation6 + $0x1b8] sm:$0xff] }
 0x541   :  { %v4441_v49 = vpop.eup %4440 }
 0x542   :  { %v5650_v54 = vadd.f32 %v1613_v59, %v1612_v48  ;;  %v2159_v59 = vld [vmem:[#allocation6 + $0x1a8] sm:$0xff]  ;;  %v2160_v48 = vld [vmem:[#allocation6 + $0x1b0] sm:$0xff] }
 0x544   :  { %4442 = vtanh.f32 %v5650_v54 }
 0x551   :  { %v4443_v51 = vpop.eup %4442 }
 0x552   :  { %v5653_v62 = vmul.f32 %v4443_v51, %v4441_v49  ;;  %v2157_v49 = vld [vmem:[#allocation6 + $0x198] sm:$0xff]  ;;  %v2154_v51 = vld [vmem:[#allocation6 + $0x180] sm:$0xff] }
 0x554   :  { %1753 = vmatmul.mubr.f32.vlgmr.msra.gmra.mxu0 %v5653_v62  ;;  %1824 = vmatmul.mubr.f32.vlgmr.msra.gmra.mxu1 %v5653_v62 }
 0x555   :  { %1930 = vmatpush1.msra.mxu0 %v5301_v55  ;;  %2001 = vmatpush1.msra.mxu1 %v5303_v29  ;;  %v7092_v55 = vld [vmem:[#allocation14_spill] sm:$0xff]  ;;  %v7093_v29 = vld [vmem:[#allocation15_spill] sm:$0xff] }
 0x556   :  { %1931 = vmatprep.subr.mxu0 %v5307_v0  ;;  %2002 = vmatprep.subr.mxu1 %v5309_v57  ;;  %v7094_v0 = vld [vmem:[#allocation16_spill] sm:$0xff]  ;;  %v7095_v57 = vld [vmem:[#allocation17_spill] sm:$0xff] }
 0x557   :  { %1932 = vmatpush1.msra.mxu0 %v5313_v56  ;;  %2003 = vmatpush1.msra.mxu1 %v5315_v60  ;;  %v7096_v56 = vld [vmem:[#allocation18_spill] sm:$0xff]  ;;  %v7097_v60 = vld [vmem:[#allocation19_spill] sm:$0xff] }
 0x558   :  { %1933 = vmatprep.subr.mxu0 %v5319_v3  ;;  %2004 = vmatprep.subr.mxu1 %v5321_v4  ;;  %v7098_v3 = vld [vmem:[#allocation20_spill] sm:$0xff]  ;;  %v7099_v4 = vld [vmem:[#allocation21_spill] sm:$0xff] }
 0x559   :  { %1934 = vmatpush1.msra.mxu0 %v5325_v52  ;;  %2005 = vmatpush1.msra.mxu1 %v5327_v58  ;;  %v7100_v52 = vld [vmem:[#allocation22_spill] sm:$0xff]  ;;  %v7101_v58 = vld [vmem:[#allocation23_spill] sm:$0xff] }
 0x55a   :  { %1935 = vmatprep.subr.mxu0 %v5331_v5  ;;  %2006 = vmatprep.subr.mxu1 %v5333_v6  ;;  %v7102_v5 = vld [vmem:[#allocation24_spill] sm:$0xff]  ;;  %v7103_v6 = vld [vmem:[#allocation25_spill] sm:$0xff] }
 0x55b   :  { %1936 = vmatpush1.msra.mxu0 %v5337_v7  ;;  %2007 = vmatpush1.msra.mxu1 %v5339_v8  ;;  %v7104_v7 = vld [vmem:[#allocation26_spill] sm:$0xff]  ;;  %v7105_v8 = vld [vmem:[#allocation27_spill] sm:$0xff] }
 0x55c   :  { %1937 = vmatprep.subr.mxu0 %v5343_v9  ;;  %2008 = vmatprep.subr.mxu1 %v5345_v10  ;;  %v7106_v9 = vld [vmem:[#allocation28_spill] sm:$0xff]  ;;  %v7107_v10 = vld [vmem:[#allocation29_spill] sm:$0xff] }
 0x55d   :  { %1938 = vmatpush1.msra.mxu0 %v5349_v12  ;;  %2009 = vmatpush1.msra.mxu1 %v5351_v13  ;;  %v7108_v12 = vmov 0.0   ;;  %v7109_v13 = vld [vmem:[#allocation30_spill] sm:$0xff] }
 0x55e   :  { %1939 = vmatprep.subr.mxu0 %v5355_v14  ;;  %2010 = vmatprep.subr.mxu1 %v5357_v15  ;;  %v7110_v15 = vld [vmem:[#allocation48_spill] sm:$0xff] }
 0x55f   :  { %1940 = vmatpush1.msra.mxu0 %v5361_v16  ;;  %2011 = vmatpush1.msra.mxu1 %v5363_v17 }
 0x560   :  { %1941 = vmatprep.subr.mxu0 %v5367_v18  ;;  %2012 = vmatprep.subr.mxu1 %v5369_v19  ;;  %v7111_v19 = vld [vmem:[#allocation50_spill] sm:$0xff] }
 0x561   :  { %1942 = vmatpush1.msra.mxu0 %v5373_v21  ;;  %2013 = vmatpush1.msra.mxu1 %v5375_v22 }
 0x562   :  { %1943 = vmatprep.subr.mxu0 %v5379_v23  ;;  %2014 = vmatprep.subr.mxu1 %v5381_v24 }
 0x563   :  { %1944 = vmatpush1.msra.mxu0 %v5383_v25  ;;  %2015 = vmatpush1.msra.mxu1 %v5387_v26  ;;  %v7112_v25 = vld [vmem:[#allocation51_spill] sm:$0xff] }
 0x564   :  { %1945 = vmatprep.subr.mxu0 %v5389_v28  ;;  %2016 = vmatprep.subr.mxu1 %v5391_v30  ;;  %v7113_v28 = vld [vmem:[#allocation49_spill] sm:$0xff] }
 0x565   :  { %1946 = vmatpush1.msra.mxu0 %v5395_v31  ;;  %2017 = vmatpush1.msra.mxu1 %v5397_v32 }
 0x566   :  { %1947 = vmatprep.subr.mxu0 %v5399_v33  ;;  %2018 = vmatprep.subr.mxu1 %v5403_v34 }
 0x567   :  { %1948 = vmatpush1.msra.mxu0 %v5405_v35  ;;  %2019 = vmatpush1.msra.mxu1 %v5407_v36 }
 0x568   :  { %1949 = vmatprep.subr.mxu0 %v5411_v37  ;;  %2020 = vmatprep.subr.mxu1 %v5413_v39 }
 0x569   :  { %1950 = vmatpush1.msra.mxu0 %v5417_v40  ;;  %2021 = vmatpush1.msra.mxu1 %v5419_v41 }
 0x56a   :  { %1951 = vmatprep.subr.mxu0 %v5423_v42  ;;  %2022 = vmatprep.subr.mxu1 %v5425_v43 }
 0x56b   :  { %1952 = vmatpush1.msra.mxu0 %v5429_v44  ;;  %2023 = vmatpush1.msra.mxu1 %v7092_v55  ;;  %v2156_v55 = vld [vmem:[#allocation6 + $0x190] sm:$0xff] }
 0x56c   :  { %1953 = vmatprep.subr.mxu0 %v7093_v29  ;;  %2024 = vmatprep.subr.mxu1 %v7094_v0  ;;  %v2151_v29 = vld [vmem:[#allocation6 + $0x168] sm:$0xff]  ;;  %v2153_v0 = vld [vmem:[#allocation6 + $0x178] sm:$0xff] }
 0x56d   :  { %1954 = vmatpush1.msra.mxu0 %v7095_v57  ;;  %2025 = vmatpush1.msra.mxu1 %v7096_v56  ;;  %v2150_v57 = vld [vmem:[#allocation6 + $0x160] sm:$0xff]  ;;  %v2152_v56 = vld [vmem:[#allocation6 + $0x170] sm:$0xff] }
 0x56e   :  { %1955 = vmatprep.subr.mxu0 %v7097_v60  ;;  %2026 = vmatprep.subr.mxu1 %v7098_v3  ;;  %v2147_v60 = vld [vmem:[#allocation6 + $0x148] sm:$0xff]  ;;  %v2149_v3 = vld [vmem:[#allocation6 + $0x158] sm:$0xff] }
 0x56f   :  { %1956 = vmatpush1.msra.mxu0 %v7099_v4  ;;  %2027 = vmatpush1.msra.mxu1 %v7100_v52  ;;  %v2146_v4 = vld [vmem:[#allocation6 + $0x140] sm:$0xff]  ;;  %v2148_v52 = vld [vmem:[#allocation6 + $0x150] sm:$0xff] }
 0x570   :  { %1957 = vmatprep.subr.mxu0 %v7101_v58  ;;  %2028 = vmatprep.subr.mxu1 %v7102_v5  ;;  %v2143_v58 = vld [vmem:[#allocation6 + $0x128] sm:$0xff]  ;;  %v2145_v5 = vld [vmem:[#allocation6 + $0x138] sm:$0xff] }
 0x571   :  { %1958 = vmatpush1.msra.mxu0 %v7103_v6  ;;  %2029 = vmatpush1.msra.mxu1 %v7104_v7  ;;  %v2142_v6 = vld [vmem:[#allocation6 + $0x120] sm:$0xff]  ;;  %v2144_v7 = vld [vmem:[#allocation6 + $0x130] sm:$0xff] }
 0x572   :  { %1959 = vmatprep.subr.mxu0 %v7105_v8  ;;  %2030 = vmatprep.subr.mxu1 %v7106_v9  ;;  %v2139_v8 = vld [vmem:[#allocation6 + $0x108] sm:$0xff]  ;;  %v2141_v9 = vld [vmem:[#allocation6 + $0x118] sm:$0xff] }
 0x573   :  { %1960 = vmatpush1.msra.mxu0 %v7107_v10  ;;  %1993 = vmatprep.mubr.f32.mxu0 %v7108_v12  ;;  %v2138_v10 = vld [vmem:[#allocation6 + $0x100] sm:$0xff] }
 0x574   :  { %2031 = vmatpush1.msra.mxu1 %v7109_v13  ;;  %2064 = vmatprep.mubr.f32.mxu1 %v7108_v12  ;;  %v2140_v13 = vld [vmem:[#allocation6 + $0x110] sm:$0xff] }
 0x575   :  { %2170 = vmatprep.subr.mxu0 %v2167_v27  ;;  %2241 = vmatprep.subr.mxu1 %v2169_v45  ;;  %v2107_v27 = vld [vmem:[#allocation6 + $0x8] sm:$0xff]  ;;  %v2109_v45 = vld [vmem:[#allocation6 + $0x18] sm:$0xff] }
 0x614   :  { %v1754_v14 = vpop.f32.mrf.mxu0  ;;  %v1825_v22 = vpop.f32.mrf.mxu1 }
 0x615   :  { %v1830_v16 = vadd.f32 %v1754_v14, %v7110_v15  ;;  %v1832_v30 = vadd.f32 %v1825_v22, %v7113_v28  ;;  %v2135_v14 = vld [vmem:[#allocation6 + $0xe8] sm:$0xff]  ;;  %v2137_v15 = vld [vmem:[#allocation6 + $0xf8] sm:$0xff]  ;;  %v2132_v22 = vld [vmem:[#allocation6 + $0xd0] sm:$0xff] }
 0x616   :  { %v1756_v17 = vpop.f32.mrf.mxu0  ;;  %v1827_v24 = vpop.f32.mrf.mxu1  ;;  %v2123_v28 = vld [vmem:[#allocation6 + $0x88] sm:$0xff] }
 0x617   :  { %v4268_v18 = vmul.f32 -1.442695, %v1830_v16  ;;  %v1831_v21 = vadd.f32 %v1756_v17, %v7111_v19  ;;  %v1833_v26 = vadd.f32 %v1827_v24, %v7112_v25  ;;  %v2134_v16 = vld [vmem:[#allocation6 + $0xe0] sm:$0xff]  ;;  %v2136_v17 = vld [vmem:[#allocation6 + $0xf0] sm:$0xff]  ;;  %v2133_v19 = vld [vmem:[#allocation6 + $0xd8] sm:$0xff] }
 0x618   :  { %v2129_v24 = vld [vmem:[#allocation6 + $0xb8] sm:$0xff]  ;;  %v2126_v25 = vld [vmem:[#allocation6 + $0xa0] sm:$0xff] }
 0x619   :  { %4444 = vpow2.f32 %v4268_v18  ;;  %v4269_v23 = vmul.f32 -1.442695, %v1831_v21  ;;  %v4270_v31 = vmul.f32 -1.442695, %v1833_v26  ;;  %v2131_v18 = vld [vmem:[#allocation6 + $0xc8] sm:$0xff]  ;;  %v2130_v21 = vld [vmem:[#allocation6 + $0xc0] sm:$0xff] }
 0x61a   :  { %v2128_v26 = vld [vmem:[#allocation6 + $0xb0] sm:$0xff] }
 0x61b   :  { %4446 = vpow2.f32 %v4269_v23  ;;  %v2127_v23 = vld [vmem:[#allocation6 + $0xa8] sm:$0xff] }
 0x61c   :  { %4448 = vtanh.f32 %v1832_v30  ;;  %v2125_v30 = vld [vmem:[#allocation6 + $0x98] sm:$0xff] }
 0x61d   :  { %4450 = vpow2.f32 %v4270_v31  ;;  %v2122_v31 = vld [vmem:[#allocation6 + $0x80] sm:$0xff] }
 0x626   :  { %v4445_v32 = vpop.eup %4444 }
 0x627   :  { %v1837_v33 = vadd.f32 1.0, %v4445_v32  ;;  %v2124_v32 = vld [vmem:[#allocation6 + $0x90] sm:$0xff] }
 0x628   :  { %v4447_v34 = vpop.eup %4446 }
 0x629   :  { %4452 = vrcp.f32 %v1837_v33  ;;  %v1843_v35 = vadd.f32 1.0, %v4447_v34  ;;  %v4449_v36 = vpop.eup %4448  ;;  %v2119_v33 = vld [vmem:[#allocation6 + $0x68] sm:$0xff]  ;;  %v2121_v34 = vld [vmem:[#allocation6 + $0x78] sm:$0xff] }
 0x62a   :  { %v4451_v37 = vpop.eup %4450 }
 0x62b   :  { %4454 = vrcp.f32 %v1843_v35  ;;  %v1850_v42 = vadd.f32 1.0, %v4451_v37  ;;  %v2118_v35 = vld [vmem:[#allocation6 + $0x60] sm:$0xff]  ;;  %v2115_v37 = vld [vmem:[#allocation6 + $0x48] sm:$0xff] }
 0x62d   :  { %4456 = vrcp.f32 %v1850_v42  ;;  %v2111_v42 = vld [vmem:[#allocation6 + $0x28] sm:$0xff] }
 0x636   :  { %v4453_v39 = vpop.eup %4452 }
 0x637   :  { %v1854_v40 = vmul.f32 %v4453_v39, %v4449_v36  ;;  %v2120_v36 = vld [vmem:[#allocation6 + $0x70] sm:$0xff]  ;;  %v2117_v39 = vld [vmem:[#allocation6 + $0x58] sm:$0xff] }
 0x638   :  { %v4455_v41 = vpop.eup %4454 }
 0x639   :  { %v1853_v43 = vmul.f32 %v4455_v41, %v5650_v54  ;;  %v2155_v54 = vld [vmem:[#allocation6 + $0x188] sm:$0xff]  ;;  %v2116_v41 = vld [vmem:[#allocation6 + $0x50] sm:$0xff] }
 0x63a   :  { %v4457_v46 = vpop.eup %4456 }
 0x63b   :  { %v5726_v44 = vadd.f32 %v1854_v40, %v1853_v43  ;;  %v2114_v40 = vld [vmem:[#allocation6 + $0x40] sm:$0xff]  ;;  %v2113_v43 = vld [vmem:[#allocation6 + $0x38] sm:$0xff] }
 0x63d   :  { %4458 = vtanh.f32 %v5726_v44 }
 0x64a   :  { %v4459_v47 = vpop.eup %4458 }
 0x64b   :  { %v5729_v63 = vmul.f32 %v4459_v47, %v4457_v46  ;;  %v2110_v46 = vld [vmem:[#allocation6 + $0x20] sm:$0xff]  ;;  %v2112_v47 = vld [vmem:[#allocation6 + $0x30] sm:$0xff] }
 0x64d   :  { %1994 = vmatmul.mubr.f32.vlgmr.msra.gmra.mxu0 %v5729_v63  ;;  %2065 = vmatmul.mubr.f32.vlgmr.msra.gmra.mxu1 %v5729_v63 }
 0x64e   :  { %2234 = vmatprep.mubr.f32.mxu0 %v7108_v12  ;;  %2305 = vmatprep.mubr.f32.mxu1 %v7108_v12 }
 0x64f   :  { %2171 = vmatpush1.msra.mxu0 %v2166_v53  ;;  %2242 = vmatpush1.msra.mxu1 %v2168_v1  ;;  %v2106_v53 = vld [vmem:[#allocation6] sm:$0xff]  ;;  %v2108_v1 = vld [vmem:[#allocation6 + $0x10] sm:$0xff] }
 0x650   :  { %2172 = vmatprep.subr.mxu0 %v2163_v38  ;;  %2243 = vmatprep.subr.mxu1 %v2165_v20  ;;  %v2412_v38 = vld [vmem:[#allocation4 + $0x3e8] sm:$0xff]  ;;  %v2414_v20 = vld [vmem:[#allocation4 + $0x3f8] sm:$0xff] }
 0x651   :  { %2173 = vmatpush1.msra.mxu0 %v2162_v50  ;;  %2244 = vmatpush1.msra.mxu1 %v2164_v2  ;;  %v7114_v2 = vld [vmem:[#allocation52_spill] sm:$0xff] }
 0x652   :  { %2174 = vmatprep.subr.mxu0 %v2159_v59  ;;  %2245 = vmatprep.subr.mxu1 %v2161_v11 }
 0x653   :  { %2175 = vmatpush1.msra.mxu0 %v2158_v61  ;;  %2246 = vmatpush1.msra.mxu1 %v2160_v48  ;;  %v7115_v48 = vld [vmem:[#allocation54_spill] sm:$0xff] }
 0x654   :  { %2176 = vmatprep.subr.mxu0 %v2155_v54  ;;  %2247 = vmatprep.subr.mxu1 %v2157_v49 }
 0x655   :  { %2177 = vmatpush1.msra.mxu0 %v2154_v51  ;;  %2248 = vmatpush1.msra.mxu1 %v2156_v55 }
 0x656   :  { %2178 = vmatprep.subr.mxu0 %v2151_v29  ;;  %2249 = vmatprep.subr.mxu1 %v2153_v0  ;;  %v7116_v29 = vld [vmem:[#allocation55_spill] sm:$0xff] }
 0x657   :  { %2179 = vmatpush1.msra.mxu0 %v2150_v57  ;;  %2250 = vmatpush1.msra.mxu1 %v2152_v56  ;;  %v7117_v57 = vld [vmem:[#allocation53_spill] sm:$0xff] }
 0x658   :  { %2180 = vmatprep.subr.mxu0 %v2147_v60  ;;  %2251 = vmatprep.subr.mxu1 %v2149_v3 }
 0x659   :  { %2181 = vmatpush1.msra.mxu0 %v2146_v4  ;;  %2252 = vmatpush1.msra.mxu1 %v2148_v52 }
 0x65a   :  { %2182 = vmatprep.subr.mxu0 %v2143_v58  ;;  %2253 = vmatprep.subr.mxu1 %v2145_v5 }
 0x65b   :  { %2183 = vmatpush1.msra.mxu0 %v2142_v6  ;;  %2254 = vmatpush1.msra.mxu1 %v2144_v7 }
 0x65c   :  { %2184 = vmatprep.subr.mxu0 %v2139_v8  ;;  %2255 = vmatprep.subr.mxu1 %v2141_v9 }
 0x65d   :  { %2185 = vmatpush1.msra.mxu0 %v2138_v10  ;;  %2256 = vmatpush1.msra.mxu1 %v2140_v13 }
 0x65e   :  { %2186 = vmatprep.subr.mxu0 %v2135_v14  ;;  %2257 = vmatprep.subr.mxu1 %v2137_v15 }
 0x65f   :  { %2187 = vmatpush1.msra.mxu0 %v2134_v16  ;;  %2258 = vmatpush1.msra.mxu1 %v2136_v17 }
 0x660   :  { %2188 = vmatprep.subr.mxu0 %v2131_v18  ;;  %2259 = vmatprep.subr.mxu1 %v2133_v19  ;;  %v2411_v18 = vld [vmem:[#allocation4 + $0x3e0] sm:$0xff]  ;;  %v2413_v19 = vld [vmem:[#allocation4 + $0x3f0] sm:$0xff] }
 0x661   :  { %2189 = vmatpush1.msra.mxu0 %v2130_v21  ;;  %2260 = vmatpush1.msra.mxu1 %v2132_v22  ;;  %v2408_v21 = vld [vmem:[#allocation4 + $0x3c8] sm:$0xff]  ;;  %v2410_v22 = vld [vmem:[#allocation4 + $0x3d8] sm:$0xff] }
 0x662   :  { %2190 = vmatprep.subr.mxu0 %v2127_v23  ;;  %2261 = vmatprep.subr.mxu1 %v2129_v24  ;;  %v2407_v23 = vld [vmem:[#allocation4 + $0x3c0] sm:$0xff]  ;;  %v2409_v24 = vld [vmem:[#allocation4 + $0x3d0] sm:$0xff] }
 0x663   :  { %2191 = vmatpush1.msra.mxu0 %v2126_v25  ;;  %2262 = vmatpush1.msra.mxu1 %v2128_v26  ;;  %v2406_v25 = vld [vmem:[#allocation4 + $0x3b8] sm:$0xff]  ;;  %v2403_v26 = vld [vmem:[#allocation4 + $0x3a0] sm:$0xff] }
 0x664   :  { %2192 = vmatprep.subr.mxu0 %v2123_v28  ;;  %2263 = vmatprep.subr.mxu1 %v2125_v30  ;;  %v2405_v28 = vld [vmem:[#allocation4 + $0x3b0] sm:$0xff]  ;;  %v2400_v30 = vld [vmem:[#allocation4 + $0x388] sm:$0xff] }
 0x665   :  { %2193 = vmatpush1.msra.mxu0 %v2122_v31  ;;  %2264 = vmatpush1.msra.mxu1 %v2124_v32  ;;  %v2402_v31 = vld [vmem:[#allocation4 + $0x398] sm:$0xff]  ;;  %v2399_v32 = vld [vmem:[#allocation4 + $0x380] sm:$0xff] }
 0x666   :  { %2194 = vmatprep.subr.mxu0 %v2119_v33  ;;  %2265 = vmatprep.subr.mxu1 %v2121_v34  ;;  %v2401_v33 = vld [vmem:[#allocation4 + $0x390] sm:$0xff]  ;;  %v2396_v34 = vld [vmem:[#allocation4 + $0x368] sm:$0xff] }
 0x667   :  { %2195 = vmatpush1.msra.mxu0 %v2118_v35  ;;  %2266 = vmatpush1.msra.mxu1 %v2120_v36  ;;  %v2398_v35 = vld [vmem:[#allocation4 + $0x378] sm:$0xff]  ;;  %v2395_v36 = vld [vmem:[#allocation4 + $0x360] sm:$0xff] }
 0x668   :  { %2196 = vmatprep.subr.mxu0 %v2115_v37  ;;  %2267 = vmatprep.subr.mxu1 %v2117_v39  ;;  %v2397_v37 = vld [vmem:[#allocation4 + $0x370] sm:$0xff]  ;;  %v2392_v39 = vld [vmem:[#allocation4 + $0x348] sm:$0xff] }
 0x669   :  { %2197 = vmatpush1.msra.mxu0 %v2114_v40  ;;  %2268 = vmatpush1.msra.mxu1 %v2116_v41  ;;  %v2394_v40 = vld [vmem:[#allocation4 + $0x358] sm:$0xff]  ;;  %v2391_v41 = vld [vmem:[#allocation4 + $0x340] sm:$0xff] }
 0x66a   :  { %2198 = vmatprep.subr.mxu0 %v2111_v42  ;;  %2269 = vmatprep.subr.mxu1 %v2113_v43  ;;  %v2393_v42 = vld [vmem:[#allocation4 + $0x350] sm:$0xff]  ;;  %v2388_v43 = vld [vmem:[#allocation4 + $0x328] sm:$0xff] }
 0x66b   :  { %2199 = vmatpush1.msra.mxu0 %v2110_v46  ;;  %2270 = vmatpush1.msra.mxu1 %v2112_v47  ;;  %v2390_v46 = vld [vmem:[#allocation4 + $0x338] sm:$0xff]  ;;  %v2387_v47 = vld [vmem:[#allocation4 + $0x320] sm:$0xff] }
 0x66c   :  { %2200 = vmatprep.subr.mxu0 %v2107_v27  ;;  %2271 = vmatprep.subr.mxu1 %v2109_v45  ;;  %v2389_v27 = vld [vmem:[#allocation4 + $0x330] sm:$0xff]  ;;  %v2384_v45 = vld [vmem:[#allocation4 + $0x308] sm:$0xff] }
 0x66d   :  { %2201 = vmatpush1.msra.mxu0 %v2106_v53  ;;  %2272 = vmatpush1.msra.mxu1 %v2108_v1  ;;  %v2386_v53 = vld [vmem:[#allocation4 + $0x318] sm:$0xff]  ;;  %v2383_v1 = vld [vmem:[#allocation4 + $0x300] sm:$0xff] }
 0x66e   :  { %2438 = vmatprep.subr.mxu0 %v2412_v38  ;;  %2551 = vmatprep.subr.mxu1 %v2414_v20  ;;  %v2385_v38 = vld [vmem:[#allocation4 + $0x310] sm:$0xff]  ;;  %v2380_v20 = vld [vmem:[#allocation4 + $0x2e8] sm:$0xff] }
 0x70d   :  { %v1995_v50 = vpop.f32.mrf.mxu0  ;;  %v2066_v49 = vpop.f32.mrf.mxu1 }
 0x70e   :  { %v2071_v59 = vadd.f32 %v1995_v50, %v7114_v2  ;;  %v2073_v56 = vadd.f32 %v2066_v49, %v7117_v57  ;;  %v2382_v50 = vld [vmem:[#allocation4 + $0x2f8] sm:$0xff]  ;;  %v2379_v2 = vld [vmem:[#allocation4 + $0x2e0] sm:$0xff]  ;;  %v2372_v49 = vld [vmem:[#allocation4 + $0x2a8] sm:$0xff] }
 0x70f   :  { %v1997_v11 = vpop.f32.mrf.mxu0  ;;  %v2068_v55 = vpop.f32.mrf.mxu1  ;;  %v2370_v57 = vld [vmem:[#allocation4 + $0x298] sm:$0xff] }
 0x710   :  { %v4271_v61 = vmul.f32 -1.442695, %v2071_v59  ;;  %v2072_v54 = vadd.f32 %v1997_v11, %v7115_v48  ;;  %v2074_v0 = vadd.f32 %v2068_v55, %v7116_v29  ;;  %v2381_v59 = vld [vmem:[#allocation4 + $0x2f0] sm:$0xff]  ;;  %v2376_v11 = vld [vmem:[#allocation4 + $0x2c8] sm:$0xff]  ;;  %v2375_v48 = vld [vmem:[#allocation4 + $0x2c0] sm:$0xff] }
 0x711   :  { %v2371_v55 = vld [vmem:[#allocation4 + $0x2a0] sm:$0xff]  ;;  %v2373_v29 = vld [vmem:[#allocation4 + $0x2b0] sm:$0xff] }
 0x712   :  { %4460 = vpow2.f32 %v4271_v61  ;;  %v4272_v51 = vmul.f32 -1.442695, %v2072_v54  ;;  %v4273_v60 = vmul.f32 -1.442695, %v2074_v0  ;;  %v2378_v61 = vld [vmem:[#allocation4 + $0x2d8] sm:$0xff]  ;;  %v2377_v54 = vld [vmem:[#allocation4 + $0x2d0] sm:$0xff] }
 0x713   :  { %v2368_v0 = vld [vmem:[#allocation4 + $0x288] sm:$0xff] }
 0x714   :  { %4462 = vpow2.f32 %v4272_v51  ;;  %v2374_v51 = vld [vmem:[#allocation4 + $0x2b8] sm:$0xff] }
 0x715   :  { %4464 = vtanh.f32 %v2073_v56  ;;  %v2367_v56 = vld [vmem:[#allocation4 + $0x280] sm:$0xff] }
 0x716   :  { %4466 = vpow2.f32 %v4273_v60  ;;  %v2369_v60 = vld [vmem:[#allocation4 + $0x290] sm:$0xff] }
 0x71f   :  { %v4461_v3 = vpop.eup %4460 }
 0x720   :  { %v2078_v4 = vadd.f32 1.0, %v4461_v3  ;;  %v2364_v3 = vld [vmem:[#allocation4 + $0x268] sm:$0xff] }
 0x721   :  { %v4463_v52 = vpop.eup %4462 }
 0x722   :  { %4468 = vrcp.f32 %v2078_v4  ;;  %v2084_v58 = vadd.f32 1.0, %v4463_v52  ;;  %v4465_v5 = vpop.eup %4464  ;;  %v2366_v4 = vld [vmem:[#allocation4 + $0x278] sm:$0xff]  ;;  %v2363_v52 = vld [vmem:[#allocation4 + $0x260] sm:$0xff] }
 0x723   :  { %v4467_v6 = vpop.eup %4466 }
 0x724   :  { %4470 = vrcp.f32 %v2084_v58  ;;  %v2091_v10 = vadd.f32 1.0, %v4467_v6  ;;  %v2365_v58 = vld [vmem:[#allocation4 + $0x270] sm:$0xff]  ;;  %v2362_v6 = vld [vmem:[#allocation4 + $0x258] sm:$0xff] }
 0x726   :  { %4472 = vrcp.f32 %v2091_v10  ;;  %v2358_v10 = vld [vmem:[#allocation4 + $0x238] sm:$0xff] }
 0x72f   :  { %v4469_v7 = vpop.eup %4468 }
 0x730   :  { %v2095_v8 = vmul.f32 %v4469_v7, %v4465_v5  ;;  %v2360_v5 = vld [vmem:[#allocation4 + $0x248] sm:$0xff]  ;;  %v2359_v7 = vld [vmem:[#allocation4 + $0x240] sm:$0xff] }
 0x731   :  { %v4471_v9 = vpop.eup %4470 }
 0x732   :  { %v2094_v13 = vmul.f32 %v4471_v9, %v5726_v44  ;;  %v2404_v44 = vld [vmem:[#allocation4 + $0x3a8] sm:$0xff] }
 0x733   :  { %v4473_v15 = vpop.eup %4472  ;;  %v2356_v9 = vld [vmem:[#allocation4 + $0x228] sm:$0xff] }
 0x734   :  { %v5740_v14 = vadd.f32 %v2095_v8, %v2094_v13  ;;  %v2361_v8 = vld [vmem:[#allocation4 + $0x250] sm:$0xff]  ;;  %v2355_v13 = vld [vmem:[#allocation4 + $0x220] sm:$0xff] }
 0x736   :  { %4474 = vtanh.f32 %v5740_v14 }
 0x743   :  { %v4475_v16 = vpop.eup %4474 }
 0x744   :  { %v5743_v17 = vmul.f32 %v4475_v16, %v4473_v15  ;;  %v2357_v15 = vld [vmem:[#allocation4 + $0x230] sm:$0xff]  ;;  %v2352_v16 = vld [vmem:[#allocation4 + $0x208] sm:$0xff] }
 0x746   :  { %2235 = vmatmul.mubr.f32.vlgmr.msra.gmra.mxu0 %v5743_v17  ;;  %2306 = vmatmul.mubr.f32.vlgmr.msra.gmra.mxu1 %v5743_v17 }
 0x747   :  { %2439 = vmatpush1.msra.mxu0 %v2411_v18  ;;  %2552 = vmatpush1.msra.mxu1 %v2413_v19  ;;  %v2354_v18 = vld [vmem:[#allocation4 + $0x218] sm:$0xff]  ;;  %v2351_v19 = vld [vmem:[#allocation4 + $0x200] sm:$0xff] }
 0x748   :  { %2440 = vmatprep.subr.mxu0 %v2408_v21  ;;  %2553 = vmatprep.subr.mxu1 %v2410_v22  ;;  %v2353_v21 = vld [vmem:[#allocation4 + $0x210] sm:$0xff]  ;;  %v7118_v22 = vld [vmem:[#allocation60_spill] sm:$0xff] }
 0x749   :  { %2441 = vmatpush1.msra.mxu0 %v2407_v23  ;;  %2554 = vmatpush1.msra.mxu1 %v2409_v24  ;;  %v7119_v23 = vld [vmem:[#allocation11_spill] sm:$0xff] }
 0x74a   :  { %2442 = vmatprep.subr.mxu0 %v2404_v44  ;;  %2555 = vmatprep.subr.mxu1 %v2406_v25  ;;  %v7120_v24 = vld [vmem:[#allocation31_spill] sm:$0xff]  ;;  %v7121_v44 = vld [vmem:[#allocation34_spill] sm:$0xff] }
 0x74b   :  { %2443 = vmatpush1.msra.mxu0 %v2403_v26  ;;  %2556 = vmatpush1.msra.mxu1 %v2405_v28  ;;  %v5779_v25 = vld [vmem:[#allocation6 + $0x3f8] sm:$0xff]  ;;  %v5785_v26 = vld [vmem:[#allocation6 + $0x3f0] sm:$0xff] }
 0x74c   :  { %2444 = vmatprep.subr.mxu0 %v2400_v30  ;;  %2557 = vmatprep.subr.mxu1 %v2402_v31  ;;  %7123 = vst [vmem:[#allocation33_spill] sm:$0xff] %v5779_v25  ;;  %v5791_v28 = vld [vmem:[#allocation6 + $0x3d8] sm:$0xff]  ;;  %v5795_v30 = vld [vmem:[#allocation6 + $0x3c0] sm:$0xff]  ;;  %v5797_v31 = vld [vmem:[#allocation6 + $0x3d0] sm:$0xff] }
 0x74d   :  { %2445 = vmatpush1.msra.mxu0 %v2399_v32  ;;  %2558 = vmatpush1.msra.mxu1 %v2401_v33  ;;  %v5801_v32 = vld [vmem:[#allocation6 + $0x3a8] sm:$0xff]  ;;  %v5803_v33 = vld [vmem:[#allocation6 + $0x3b8] sm:$0xff] }
 0x74e   :  { %2446 = vmatprep.subr.mxu0 %v2396_v34  ;;  %2559 = vmatprep.subr.mxu1 %v2398_v35  ;;  %v5807_v34 = vld [vmem:[#allocation6 + $0x3a0] sm:$0xff]  ;;  %v5809_v35 = vld [vmem:[#allocation6 + $0x3b0] sm:$0xff] }
 0x74f   :  { %2447 = vmatpush1.msra.mxu0 %v2395_v36  ;;  %2560 = vmatpush1.msra.mxu1 %v2397_v37  ;;  %v5813_v36 = vld [vmem:[#allocation6 + $0x388] sm:$0xff]  ;;  %v5815_v37 = vld [vmem:[#allocation6 + $0x398] sm:$0xff] }
 0x750   :  { %2448 = vmatprep.subr.mxu0 %v2392_v39  ;;  %2561 = vmatprep.subr.mxu1 %v2394_v40  ;;  %v5819_v39 = vld [vmem:[#allocation6 + $0x380] sm:$0xff]  ;;  %v5821_v40 = vld [vmem:[#allocation6 + $0x390] sm:$0xff] }
 0x751   :  { %2449 = vmatpush1.msra.mxu0 %v2391_v41  ;;  %2562 = vmatpush1.msra.mxu1 %v2393_v42  ;;  %v5825_v41 = vld [vmem:[#allocation6 + $0x368] sm:$0xff]  ;;  %v5827_v42 = vld [vmem:[#allocation6 + $0x378] sm:$0xff] }
 0x752   :  { %2450 = vmatprep.subr.mxu0 %v2388_v43  ;;  %2563 = vmatprep.subr.mxu1 %v2390_v46  ;;  %v5831_v43 = vld [vmem:[#allocation6 + $0x360] sm:$0xff]  ;;  %v5833_v46 = vld [vmem:[#allocation6 + $0x370] sm:$0xff] }
 0x753   :  { %2451 = vmatpush1.msra.mxu0 %v2387_v47  ;;  %2564 = vmatpush1.msra.mxu1 %v2389_v27  ;;  %v5837_v47 = vld [vmem:[#allocation6 + $0x348] sm:$0xff]  ;;  %v5839_v27 = vld [vmem:[#allocation6 + $0x358] sm:$0xff] }
 0x754   :  { %2452 = vmatprep.subr.mxu0 %v2384_v45  ;;  %2565 = vmatprep.subr.mxu1 %v2386_v53  ;;  %v5843_v45 = vld [vmem:[#allocation6 + $0x340] sm:$0xff]  ;;  %v5845_v53 = vld [vmem:[#allocation6 + $0x350] sm:$0xff] }
 0x755   :  { %2453 = vmatpush1.msra.mxu0 %v2383_v1  ;;  %2566 = vmatpush1.msra.mxu1 %v2385_v38  ;;  %v5849_v1 = vld [vmem:[#allocation6 + $0x328] sm:$0xff]  ;;  %v5851_v38 = vld [vmem:[#allocation6 + $0x338] sm:$0xff] }
 0x756   :  { %2454 = vmatprep.subr.mxu0 %v2380_v20  ;;  %2567 = vmatprep.subr.mxu1 %v2382_v50  ;;  %v5855_v20 = vld [vmem:[#allocation6 + $0x320] sm:$0xff]  ;;  %v5857_v50 = vld [vmem:[#allocation6 + $0x330] sm:$0xff] }
 0x757   :  { %2455 = vmatpush1.msra.mxu0 %v2379_v2  ;;  %2568 = vmatpush1.msra.mxu1 %v2381_v59  ;;  %v5861_v2 = vld [vmem:[#allocation6 + $0x308] sm:$0xff]  ;;  %v5863_v59 = vld [vmem:[#allocation6 + $0x318] sm:$0xff] }
 0x758   :  { %2456 = vmatprep.subr.mxu0 %v2376_v11  ;;  %2569 = vmatprep.subr.mxu1 %v2378_v61  ;;  %v5867_v11 = vld [vmem:[#allocation6 + $0x300] sm:$0xff]  ;;  %v5869_v61 = vld [vmem:[#allocation6 + $0x310] sm:$0xff] }
 0x759   :  { %2457 = vmatpush1.msra.mxu0 %v2375_v48  ;;  %2570 = vmatpush1.msra.mxu1 %v2377_v54  ;;  %v5873_v48 = vld [vmem:[#allocation6 + $0x2e8] sm:$0xff]  ;;  %v5875_v54 = vld [vmem:[#allocation6 + $0x2f8] sm:$0xff] }
 0x75a   :  { %2458 = vmatprep.subr.mxu0 %v2372_v49  ;;  %2571 = vmatprep.subr.mxu1 %v2374_v51  ;;  %v5879_v49 = vld [vmem:[#allocation6 + $0x2e0] sm:$0xff]  ;;  %v5881_v51 = vld [vmem:[#allocation6 + $0x2f0] sm:$0xff] }
 0x75b   :  { %2459 = vmatpush1.msra.mxu0 %v2371_v55  ;;  %2572 = vmatpush1.msra.mxu1 %v2373_v29  ;;  %v5885_v55 = vld [vmem:[#allocation6 + $0x2c8] sm:$0xff]  ;;  %v5887_v29 = vld [vmem:[#allocation6 + $0x2d8] sm:$0xff] }
 0x75c   :  { %2460 = vmatprep.subr.mxu0 %v2368_v0  ;;  %2573 = vmatprep.subr.mxu1 %v2370_v57  ;;  %v5891_v0 = vld [vmem:[#allocation6 + $0x2c0] sm:$0xff]  ;;  %v5893_v57 = vld [vmem:[#allocation6 + $0x2d0] sm:$0xff] }
 0x75d   :  { %2461 = vmatpush1.msra.mxu0 %v2367_v56  ;;  %2574 = vmatpush1.msra.mxu1 %v2369_v60  ;;  %v5897_v56 = vld [vmem:[#allocation6 + $0x2a8] sm:$0xff]  ;;  %v5899_v60 = vld [vmem:[#allocation6 + $0x2b8] sm:$0xff] }
 0x75e   :  { %2462 = vmatprep.subr.mxu0 %v2364_v3  ;;  %2575 = vmatprep.subr.mxu1 %v2366_v4  ;;  %v5903_v3 = vld [vmem:[#allocation6 + $0x2a0] sm:$0xff]  ;;  %v5905_v4 = vld [vmem:[#allocation6 + $0x2b0] sm:$0xff] }
 0x75f   :  { %2463 = vmatpush1.msra.mxu0 %v2363_v52  ;;  %2576 = vmatpush1.msra.mxu1 %v2365_v58  ;;  %7124 = vst [vmem:[#allocation36_spill] sm:$0xff] %v5905_v4  ;;  %v5909_v52 = vld [vmem:[#allocation6 + $0x288] sm:$0xff]  ;;  %v5911_v58 = vld [vmem:[#allocation6 + $0x298] sm:$0xff] }
 0x760   :  { %2464 = vmatprep.subr.mxu0 %v2360_v5  ;;  %2577 = vmatprep.subr.mxu1 %v2362_v6  ;;  %7125 = vst [vmem:[#allocation38_spill] sm:$0xff] %v5909_v52  ;;  %7126 = vst [vmem:[#allocation39_spill] sm:$0xff] %v5911_v58  ;;  %v5915_v5 = vld [vmem:[#allocation6 + $0x280] sm:$0xff]  ;;  %v5917_v6 = vld [vmem:[#allocation6 + $0x290] sm:$0xff] }
 0x761   :  { %2465 = vmatpush1.msra.mxu0 %v2359_v7  ;;  %2578 = vmatpush1.msra.mxu1 %v2361_v8  ;;  %7127 = vst [vmem:[#allocation37_spill] sm:$0xff] %v5915_v5  ;;  %7128 = vst [vmem:[#allocation40_spill] sm:$0xff] %v5917_v6  ;;  %v5921_v7 = vld [vmem:[#allocation6 + $0x268] sm:$0xff]  ;;  %v5923_v8 = vld [vmem:[#allocation6 + $0x278] sm:$0xff] }
 0x762   :  { %2466 = vmatprep.subr.mxu0 %v2356_v9  ;;  %2579 = vmatprep.subr.mxu1 %v2358_v10  ;;  %7129 = vst [vmem:[#allocation42_spill] sm:$0xff] %v5921_v7  ;;  %7130 = vst [vmem:[#allocation43_spill] sm:$0xff] %v5923_v8  ;;  %v5927_v9 = vld [vmem:[#allocation6 + $0x260] sm:$0xff]  ;;  %v5929_v10 = vld [vmem:[#allocation6 + $0x270] sm:$0xff] }
 0x763   :  { %2467 = vmatpush1.msra.mxu0 %v2355_v13  ;;  %2580 = vmatpush1.msra.mxu1 %v2357_v15  ;;  %7131 = vst [vmem:[#allocation41_spill] sm:$0xff] %v5927_v9  ;;  %7132 = vst [vmem:[#allocation12_spill] sm:$0xff] %v5929_v10  ;;  %v5933_v13 = vld [vmem:[#allocation6 + $0x248] sm:$0xff]  ;;  %v5935_v15 = vld [vmem:[#allocation6 + $0x258] sm:$0xff] }
 0x764   :  { %2468 = vmatprep.subr.mxu0 %v2352_v16  ;;  %2581 = vmatprep.subr.mxu1 %v2354_v18  ;;  %7133 = vst [vmem:[#allocation13_spill] sm:$0xff] %v5933_v13  ;;  %7134 = vst [vmem:[#allocation44_spill] sm:$0xff] %v5935_v15  ;;  %v5939_v16 = vld [vmem:[#allocation6 + $0x240] sm:$0xff]  ;;  %v5941_v18 = vld [vmem:[#allocation6 + $0x250] sm:$0xff] }
 0x765   :  { %2469 = vmatpush1.msra.mxu0 %v2351_v19  ;;  %2502 = vmatprep.mubr.f32.mxu0 %v7108_v12  ;;  %7135 = vst [vmem:[#allocation46_spill] sm:$0xff] %v5939_v16  ;;  %7136 = vst [vmem:[#allocation47_spill] sm:$0xff] %v5941_v18  ;;  %v5945_v19 = vld [vmem:[#allocation6 + $0x228] sm:$0xff] }
 0x766   :  { %2582 = vmatpush1.msra.mxu1 %v2353_v21  ;;  %2615 = vmatprep.mubr.f32.mxu1 %v7108_v12  ;;  %7137 = vst [vmem:[#allocation45_spill] sm:$0xff] %v5945_v19  ;;  %v5947_v21 = vld [vmem:[#allocation6 + $0x238] sm:$0xff] }
 0x767   :  { %2503 = vmatmul.mubr.f32.vlgmr.msra.gmra.mxu0 %v7118_v22  ;;  %2616 = vmatmul.mubr.f32.vlgmr.msra.gmra.mxu1 %v7118_v22  ;;  %7138 = vst [vmem:[#allocation14_spill] sm:$0xff] %v5947_v21  ;;  %v5951_v22 = vld [vmem:[#allocation6 + $0x220] sm:$0xff] }
 0x768   :  { %2508 = vmatprep.mubr.f32.mxu0 %v7108_v12  ;;  %2621 = vmatprep.mubr.f32.mxu1 %v7108_v12  ;;  %7139 = vst [vmem:[#allocation15_spill] sm:$0xff] %v5951_v22 }
 0x769   :  { %2836 = vmatprep.subr.mxu1 %v5779_v25 }
 0x76a   :  { %2837 = vmatpush1.msra.mxu1 %v5785_v26 }
 0x76b   :  { %2509 = vmatmul.mubr.f32.gmra.mxu0 %v7119_v23  ;;  %2622 = vmatmul.mubr.f32.gmra.mxu1 %v7119_v23  ;;  %v5953_v23 = vld [vmem:[#allocation6 + $0x230] sm:$0xff] }
 0x76c   :  { %2514 = vmatprep.mubr.f32.mxu0 %v7108_v12  ;;  %2627 = vmatprep.mubr.f32.mxu1 %v7108_v12  ;;  %7140 = vst [vmem:[#allocation16_spill] sm:$0xff] %v5953_v23 }
 0x76d   :  { %2838 = vmatprep.subr.mxu1 %v5791_v28 }
 0x76e   :  { %2839 = vmatpush1.msra.mxu1 %v5797_v31 }
 0x76f   :  { %2515 = vmatmul.mubr.f32.gmra.mxu0 %v7120_v24  ;;  %2628 = vmatmul.mubr.f32.gmra.mxu1 %v7120_v24  ;;  %v5957_v24 = vld [vmem:[#allocation6 + $0x208] sm:$0xff] }
 0x770   :  { %2520 = vmatprep.mubr.f32.mxu0 %v7108_v12  ;;  %2633 = vmatprep.mubr.f32.mxu1 %v7108_v12  ;;  %7141 = vst [vmem:[#allocation17_spill] sm:$0xff] %v5957_v24 }
 0x771   :  { %2840 = vmatprep.subr.mxu1 %v5803_v33 }
 0x772   :  { %2841 = vmatpush1.msra.mxu1 %v5809_v35 }
 0x773   :  { %2521 = vmatmul.mubr.f32.gmra.mxu0 %v7121_v44  ;;  %2634 = vmatmul.mubr.f32.gmra.mxu1 %v7121_v44  ;;  %v5959_v44 = vld [vmem:[#allocation6 + $0x218] sm:$0xff] }
 0x774   :  { %2526 = vmatprep.mubr.f32.mxu0 %v7108_v12  ;;  %2639 = vmatprep.mubr.f32.mxu1 %v7108_v12  ;;  %7142 = vst [vmem:[#allocation18_spill] sm:$0xff] %v5959_v44 }
 0x775   :  { %2842 = vmatprep.subr.mxu1 %v5815_v37 }
 0x776   :  { %2843 = vmatpush1.msra.mxu1 %v5821_v40 }
 0x777   :  { %2527 = vmatmul.mubr.f32.gmra.mxu0 %v5653_v62  ;;  %2640 = vmatmul.mubr.f32.gmra.mxu1 %v5653_v62  ;;  %v5777_v62 = vld [vmem:[#allocation6 + $0x3e8] sm:$0xff] }
 0x778   :  { %2532 = vmatprep.mubr.f32.mxu0 %v7108_v12  ;;  %2645 = vmatprep.mubr.f32.mxu1 %v7108_v12  ;;  %7122 = vst [vmem:[#allocation35_spill] sm:$0xff] %v5777_v62 }
 0x779   :  { %2765 = vmatprep.subr.mxu0 %v5777_v62  ;;  %2844 = vmatprep.subr.mxu1 %v5827_v42 }
 0x77a   :  { %2845 = vmatpush1.msra.mxu1 %v5833_v46 }
 0x77b   :  { %2533 = vmatmul.mubr.f32.gmra.mxu0 %v5729_v63  ;;  %2646 = vmatmul.mubr.f32.gmra.mxu1 %v5729_v63  ;;  %v5783_v63 = vld [vmem:[#allocation6 + $0x3e0] sm:$0xff] }
 0x77c   :  { %2538 = vmatprep.mubr.f32.mxu0 %v7108_v12  ;;  %2651 = vmatprep.mubr.f32.mxu1 %v7108_v12 }
 0x77d   :  { %2766 = vmatpush1.msra.mxu0 %v5783_v63  ;;  %2846 = vmatprep.subr.mxu1 %v5839_v27 }
 0x77e   :  { %2847 = vmatpush1.msra.mxu1 %v5845_v53 }
 0x77f   :  { %2539 = vmatmul.mubr.f32.gmra.mxu0 %v5743_v17  ;;  %2652 = vmatmul.mubr.f32.gmra.mxu1 %v5743_v17  ;;  %v5789_v17 = vld [vmem:[#allocation6 + $0x3c8] sm:$0xff] }
 0x780   :  { %2544 = vmatprep.mubr.f32.mxu0 %v7108_v12  ;;  %2657 = vmatprep.mubr.f32.mxu1 %v7108_v12 }
 0x781   :  { %2767 = vmatprep.subr.mxu0 %v5789_v17  ;;  %2848 = vmatprep.subr.mxu1 %v5851_v38 }
 0x782   :  { %2768 = vmatpush1.msra.mxu0 %v5795_v30  ;;  %2849 = vmatpush1.msra.mxu1 %v5857_v50 }
 0x783   :  { %2769 = vmatprep.subr.mxu0 %v5801_v32  ;;  %2850 = vmatprep.subr.mxu1 %v5863_v59 }
 0x784   :  { %2770 = vmatpush1.msra.mxu0 %v5807_v34  ;;  %2851 = vmatpush1.msra.mxu1 %v5869_v61 }
 0x785   :  { %2771 = vmatprep.subr.mxu0 %v5813_v36  ;;  %2852 = vmatprep.subr.mxu1 %v5875_v54 }
 0x786   :  { %2772 = vmatpush1.msra.mxu0 %v5819_v39  ;;  %2853 = vmatpush1.msra.mxu1 %v5881_v51 }
 0x787   :  { %2773 = vmatprep.subr.mxu0 %v5825_v41  ;;  %2854 = vmatprep.subr.mxu1 %v5887_v29 }
 0x788   :  { %2774 = vmatpush1.msra.mxu0 %v5831_v43  ;;  %2855 = vmatpush1.msra.mxu1 %v5893_v57 }
 0x789   :  { %2775 = vmatprep.subr.mxu0 %v5837_v47  ;;  %2856 = vmatprep.subr.mxu1 %v5899_v60 }
 0x78a   :  { %2776 = vmatpush1.msra.mxu0 %v5843_v45  ;;  %2857 = vmatpush1.msra.mxu1 %v5905_v4 }
 0x78b   :  { %2777 = vmatprep.subr.mxu0 %v5849_v1  ;;  %2858 = vmatprep.subr.mxu1 %v5911_v58 }
 0x78c   :  { %2778 = vmatpush1.msra.mxu0 %v5855_v20  ;;  %2859 = vmatpush1.msra.mxu1 %v5917_v6 }
 0x78d   :  { %2779 = vmatprep.subr.mxu0 %v5861_v2  ;;  %2860 = vmatprep.subr.mxu1 %v5923_v8  ;;  %v7147_v8 = vld [vmem:[#allocation59_spill] sm:$0xff] }
 0x78e   :  { %2780 = vmatpush1.msra.mxu0 %v5867_v11  ;;  %2861 = vmatpush1.msra.mxu1 %v5929_v10 }
 0x78f   :  { %2781 = vmatprep.subr.mxu0 %v5873_v48  ;;  %2862 = vmatprep.subr.mxu1 %v5935_v15 }
 0x790   :  { %2782 = vmatpush1.msra.mxu0 %v5879_v49  ;;  %2863 = vmatpush1.msra.mxu1 %v5941_v18  ;;  %v5961_v18 = vld [vmem:[#allocation6 + $0x200] sm:$0xff] }
 0x791   :  { %2783 = vmatprep.subr.mxu0 %v5885_v55  ;;  %2864 = vmatprep.subr.mxu1 %v5947_v21  ;;  %7143 = vst [vmem:[#allocation19_spill] sm:$0xff] %v5961_v18 }
 0x792   :  { %2784 = vmatpush1.msra.mxu0 %v5891_v0  ;;  %2865 = vmatpush1.msra.mxu1 %v5953_v23 }
 0x793   :  { %2785 = vmatprep.subr.mxu0 %v5897_v56  ;;  %2866 = vmatprep.subr.mxu1 %v5959_v44 }
 0x794   :  { %2786 = vmatpush1.msra.mxu0 %v5903_v3 }
 0x795   :  { %2787 = vmatprep.subr.mxu0 %v5909_v52 }
 0x796   :  { %2788 = vmatpush1.msra.mxu0 %v5915_v5 }
 0x797   :  { %2789 = vmatprep.subr.mxu0 %v5921_v7  ;;  %v7148_v7 = vld [vmem:[#allocation57_spill] sm:$0xff] }
 0x798   :  { %2790 = vmatpush1.msra.mxu0 %v5927_v9 }
 0x799   :  { %2791 = vmatprep.subr.mxu0 %v5933_v13  ;;  %v7146_v13 = vld [vmem:[#allocation58_spill] sm:$0xff] }
 0x79a   :  { %2792 = vmatpush1.msra.mxu0 %v5939_v16 }
 0x79b   :  { %2793 = vmatprep.subr.mxu0 %v5945_v19  ;;  %v5965_v19 = vld [vmem:[#allocation6 + $0x210] sm:$0xff] }
 0x79c   :  { %2794 = vmatpush1.msra.mxu0 %v5951_v22  ;;  %7144 = vst [vmem:[#allocation20_spill] sm:$0xff] %v5965_v19  ;;  %2867 = vmatpush1.msra.mxu1 %v5965_v19  ;;  %v7145_v22 = vld [vmem:[#allocation56_spill] sm:$0xff] }
 0x79d   :  { %2795 = vmatprep.subr.mxu0 %v5957_v24  ;;  %3010 = vmatprep.subr.mxu1 %v5779_v25 }
 0x79e   :  { %2796 = vmatpush1.msra.mxu0 %v5961_v18 }
 0x79f   :  { %2939 = vmatprep.subr.mxu0 %v5777_v62 }
 0x806   :  { %v2236_v23 = vpop.f32.mrf.mxu0  ;;  %v2307_v24 = vpop.f32.mrf.mxu1 }
 0x807   :  { %v2312_v21 = vadd.f32 %v2236_v23, %v7145_v22  ;;  %v2314_v19 = vadd.f32 %v2307_v24, %v7148_v7  ;;  %v7155_v24 = vld [vmem:[#allocation13_spill] sm:$0xff] }
 0x808   :  { %v2238_v16 = vpop.f32.mrf.mxu0  ;;  %v2309_v9 = vpop.f32.mrf.mxu1 }
 0x809   :  { %v4274_v15 = vmul.f32 -1.442695, %v2312_v21  ;;  %v2313_v10 = vadd.f32 %v2238_v16, %v7146_v13  ;;  %v2315_v18 = vadd.f32 %v2309_v9, %v7147_v8 }
 0x80b   :  { %4476 = vpow2.f32 %v4274_v15  ;;  %v4275_v44 = vmul.f32 -1.442695, %v2313_v10  ;;  %v4276_v6 = vmul.f32 -1.442695, %v2315_v18  ;;  %v7153_v18 = vld [vmem:[#allocation41_spill] sm:$0xff] }
 0x80d   :  { %4478 = vpow2.f32 %v4275_v44 }
 0x80e   :  { %4480 = vtanh.f32 %v2314_v19  ;;  %v7154_v19 = vld [vmem:[#allocation12_spill] sm:$0xff] }
 0x80f   :  { %4482 = vpow2.f32 %v4276_v6  ;;  %v7152_v6 = vld [vmem:[#allocation43_spill] sm:$0xff] }
 0x818   :  { %v4477_v62 = vpop.eup %4476 }
 0x819   :  { %v2319_v5 = vadd.f32 1.0, %v4477_v62 }
 0x81a   :  { %v4479_v25 = vpop.eup %4478 }
 0x81b   :  { %4484 = vrcp.f32 %v2319_v5  ;;  %v2325_v22 = vadd.f32 1.0, %v4479_v25  ;;  %v4481_v21 = vpop.eup %4480  ;;  %v7150_v25 = vld [vmem:[#allocation40_spill] sm:$0xff]  ;;  %v7151_v5 = vld [vmem:[#allocation42_spill] sm:$0xff] }
 0x81c   :  { %v4483_v13 = vpop.eup %4482 }
 0x81d   :  { %4486 = vrcp.f32 %v2325_v22  ;;  %v2332_v23 = vadd.f32 1.0, %v4483_v13  ;;  %v7156_v22 = vld [vmem:[#allocation44_spill] sm:$0xff]  ;;  %v7158_v13 = vld [vmem:[#allocation47_spill] sm:$0xff] }
 0x81f   :  { %4488 = vrcp.f32 %v2332_v23  ;;  %v7162_v23 = vld [vmem:[#allocation16_spill] sm:$0xff] }
 0x828   :  { %v4485_v15 = vpop.eup %4484 }
 0x829   :  { %v2336_v16 = vmul.f32 %v4485_v15, %v4481_v21  ;;  %v7157_v21 = vld [vmem:[#allocation46_spill] sm:$0xff]  ;;  %v7159_v15 = vld [vmem:[#allocation45_spill] sm:$0xff] }
 0x82a   :  { %v4487_v10 = vpop.eup %4486 }
 0x82b   :  { %v2335_v44 = vmul.f32 %v4487_v10, %v5740_v14  ;;  %v7149_v14 = vld [vmem:[#allocation37_spill] sm:$0xff]  ;;  %v7161_v10 = vld [vmem:[#allocation15_spill] sm:$0xff] }
 0x82c   :  { %v4489_v7 = vpop.eup %4488 }
 0x82d   :  { %v2337_v8 = vadd.f32 %v2336_v16, %v2335_v44  ;;  %v7160_v16 = vld [vmem:[#allocation14_spill] sm:$0xff]  ;;  %v7163_v44 = vld [vmem:[#allocation17_spill] sm:$0xff] }
 0x82f   :  { %4490 = vtanh.f32 %v2337_v8  ;;  %v7164_v8 = vld [vmem:[#allocation18_spill] sm:$0xff] }
 0x83c   :  { %v4491_v9 = vpop.eup %4490 }
 0x83d   :  { %v2339_v62 = vmul.f32 %v4491_v9, %v4489_v7  ;;  %v7165_v7 = vld [vmem:[#allocation19_spill] sm:$0xff]  ;;  %v7166_v9 = vld [vmem:[#allocation20_spill] sm:$0xff] }
 0x83f   :  { %2545 = vmatmul.mubr.f32.gmra.mxu0 %v2339_v62  ;;  %2658 = vmatmul.mubr.f32.gmra.mxu1 %v2339_v62  ;;  %v7167_v62 = vld [vmem:[#allocation35_spill] sm:$0xff] }
 0x840   :  { %2829 = vmatprep.mubr.f32.mxu0 %v7108_v12  ;;  %2900 = vmatprep.mubr.f32.mxu1 %v7108_v12 }
 0x843   :  { %2830 = vmatmul.mubr.f32.vlgmr.msra.gmra.mxu0 %v7108_v12  ;;  %2901 = vmatmul.mubr.f32.vlgmr.msra.gmra.mxu1 %v7108_v12 }
 0x844   :  { %2940 = vmatpush1.msra.mxu0 %v5783_v63  ;;  %3011 = vmatpush1.msra.mxu1 %v5785_v26 }
 0x845   :  { %2941 = vmatprep.subr.mxu0 %v5789_v17  ;;  %3012 = vmatprep.subr.mxu1 %v5791_v28 }
 0x846   :  { %2942 = vmatpush1.msra.mxu0 %v5795_v30  ;;  %3013 = vmatpush1.msra.mxu1 %v5797_v31 }
 0x847   :  { %2943 = vmatprep.subr.mxu0 %v5801_v32  ;;  %3014 = vmatprep.subr.mxu1 %v5803_v33 }
 0x848   :  { %2944 = vmatpush1.msra.mxu0 %v5807_v34  ;;  %3015 = vmatpush1.msra.mxu1 %v5809_v35 }
 0x849   :  { %2945 = vmatprep.subr.mxu0 %v5813_v36  ;;  %3016 = vmatprep.subr.mxu1 %v5815_v37 }
 0x84a   :  { %2946 = vmatpush1.msra.mxu0 %v5819_v39  ;;  %3017 = vmatpush1.msra.mxu1 %v5821_v40 }
 0x84b   :  { %2947 = vmatprep.subr.mxu0 %v5825_v41  ;;  %3018 = vmatprep.subr.mxu1 %v5827_v42 }
 0x84c   :  { %2948 = vmatpush1.msra.mxu0 %v5831_v43  ;;  %3019 = vmatpush1.msra.mxu1 %v5833_v46 }
 0x84d   :  { %2949 = vmatprep.subr.mxu0 %v5837_v47  ;;  %3020 = vmatprep.subr.mxu1 %v5839_v27 }
 0x84e   :  { %2950 = vmatpush1.msra.mxu0 %v5843_v45  ;;  %3021 = vmatpush1.msra.mxu1 %v5845_v53 }
 0x84f   :  { %2951 = vmatprep.subr.mxu0 %v5849_v1  ;;  %3022 = vmatprep.subr.mxu1 %v5851_v38 }
 0x850   :  { %2952 = vmatpush1.msra.mxu0 %v5855_v20  ;;  %3023 = vmatpush1.msra.mxu1 %v5857_v50 }
 0x851   :  { %2953 = vmatprep.subr.mxu0 %v5861_v2  ;;  %3024 = vmatprep.subr.mxu1 %v5863_v59 }
 0x852   :  { %2954 = vmatpush1.msra.mxu0 %v5867_v11  ;;  %3025 = vmatpush1.msra.mxu1 %v5869_v61 }
 0x853   :  { %2955 = vmatprep.subr.mxu0 %v5873_v48  ;;  %3026 = vmatprep.subr.mxu1 %v5875_v54 }
 0x854   :  { %2956 = vmatpush1.msra.mxu0 %v5879_v49  ;;  %3027 = vmatpush1.msra.mxu1 %v5881_v51 }
 0x855   :  { %2957 = vmatprep.subr.mxu0 %v5885_v55  ;;  %3028 = vmatprep.subr.mxu1 %v5887_v29 }
 0x856   :  { %2958 = vmatpush1.msra.mxu0 %v5891_v0  ;;  %3029 = vmatpush1.msra.mxu1 %v5893_v57 }
 0x857   :  { %2959 = vmatprep.subr.mxu0 %v5897_v56  ;;  %3030 = vmatprep.subr.mxu1 %v5899_v60 }
 0x858   :  { %2960 = vmatpush1.msra.mxu0 %v5903_v3  ;;  %3031 = vmatpush1.msra.mxu1 %v5905_v4 }
 0x859   :  { %2961 = vmatprep.subr.mxu0 %v5909_v52  ;;  %3032 = vmatprep.subr.mxu1 %v5911_v58 }
 0x85a   :  { %2962 = vmatpush1.msra.mxu0 %v7149_v14  ;;  %3033 = vmatpush1.msra.mxu1 %v7150_v25 }
 0x85b   :  { %2963 = vmatprep.subr.mxu0 %v7151_v5  ;;  %3034 = vmatprep.subr.mxu1 %v7152_v6 }
 0x85c   :  { %2964 = vmatpush1.msra.mxu0 %v7153_v18  ;;  %3035 = vmatpush1.msra.mxu1 %v7154_v19 }
 0x85d   :  { %2965 = vmatprep.subr.mxu0 %v7155_v24  ;;  %3036 = vmatprep.subr.mxu1 %v7156_v22 }
 0x85e   :  { %2966 = vmatpush1.msra.mxu0 %v7157_v21  ;;  %3037 = vmatpush1.msra.mxu1 %v7158_v13 }
 0x85f   :  { %2967 = vmatprep.subr.mxu0 %v7159_v15  ;;  %3038 = vmatprep.subr.mxu1 %v7160_v16  ;;  %v7168_v15 = vld [vmem:[#allocation33_spill] sm:$0xff]  ;;  %v2504_v16 = vpop.f32.mrf.mxu0 }
 0x860   :  { %2968 = vmatpush1.msra.mxu0 %v7161_v10  ;;  %3039 = vmatpush1.msra.mxu1 %v7162_v23  ;;  %v2617_v10 = vpop.f32.mrf.mxu1 }
 0x861   :  { %2969 = vmatprep.subr.mxu0 %v7163_v44  ;;  %3040 = vmatprep.subr.mxu1 %v7164_v8  ;;  %v2506_v13 = vpop.f32.mrf.mxu0 }
 0x862   :  { %2970 = vmatpush1.msra.mxu0 %v7165_v7  ;;  %3003 = vmatprep.mubr.f32.mxu0 %v7108_v12  ;;  %v2619_v23 = vpop.f32.mrf.mxu1 }
 0x863   :  { %3041 = vmatpush1.msra.mxu1 %v7166_v9  ;;  %3074 = vmatprep.mubr.f32.mxu1 %v7108_v12  ;;  %v6046_v21 = vpop.f32.mrf.mxu0 }
 0x864   :  { %3113 = vmatprep.subr.mxu0 %v7167_v62  ;;  %3184 = vmatprep.subr.mxu1 %v7168_v15  ;;  %7169 = vst [vmem:[#allocation21_spill] sm:$0xff] %v6046_v21  ;;  %v6048_v44 = vpop.f32.mrf.mxu1 }
 0x865   :  { %7170 = vst [vmem:[#allocation22_spill] sm:$0xff] %v6048_v44  ;;  %v6050_v8 = vpop.f32.mrf.mxu0 }
 0x866   :  { %7171 = vst [vmem:[#allocation23_spill] sm:$0xff] %v6050_v8  ;;  %v6052_v7 = vpop.f32.mrf.mxu1 }
 0x867   :  { %7172 = vst [vmem:[#allocation24_spill] sm:$0xff] %v6052_v7  ;;  %v6054_v22 = vpop.f32.mrf.mxu0 }
 0x868   :  { %7173 = vst [vmem:[#allocation25_spill] sm:$0xff] %v6054_v22  ;;  %v6056_v9 = vpop.f32.mrf.mxu1 }
 0x869   :  { %7174 = vst [vmem:[#allocation26_spill] sm:$0xff] %v6056_v9  ;;  %v6058_v12 = vpop.f32.mrf.mxu0 }
 0x86a   :  { %7175 = vst [vmem:[#allocation27_spill] sm:$0xff] %v6058_v12  ;;  %v6060_v62 = vpop.f32.mrf.mxu1 }
 0x86b   :  { %7176 = vst [vmem:[#allocation28_spill] sm:$0xff] %v6060_v62  ;;  %v6062_v15 = vpop.f32.mrf.mxu0 }
 0x86c   :  { %7177 = vst [vmem:[#allocation29_spill] sm:$0xff] %v6062_v15  ;;  %v6064_v24 = vpop.f32.mrf.mxu1 }
 0x86d   :  { %7178 = vst [vmem:[#allocation30_spill] sm:$0xff] %v6064_v24  ;;  %v6066_v19 = vpop.f32.mrf.mxu0 }
 0x86e   :  { %7179 = vst [vmem:[#allocation48_spill] sm:$0xff] %v6066_v19  ;;  %v6068_v21 = vpop.f32.mrf.mxu1 }
 0x86f   :  { %7180 = vst [vmem:[#allocation50_spill] sm:$0xff] %v6068_v21  ;;  %v6070_v44 = vpop.f32.mrf.mxu0 }
 0x870   :  { %7181 = vst [vmem:[#allocation51_spill] sm:$0xff] %v6070_v44  ;;  %v6072_v8 = vpop.f32.mrf.mxu1 }
 0x871   :  { %7182 = vst [vmem:[#allocation49_spill] sm:$0xff] %v6072_v8  ;;  %v6074_v7 = vpop.f32.mrf.mxu0  ;;  %v4277_v8 = vld [vmem:[%s6757_s3 + $0x4] sm:$0xf] }
 0x872   :  { %7183 = vst [vmem:[#allocation52_spill] sm:$0xff] %v6074_v7  ;;  %v6076_v22 = vpop.f32.mrf.mxu1  ;;  %v7192_v7 = vld [vmem:[#allocation32_spill] sm:$0xff] }
 0x873   :  { %7184 = vst [vmem:[#allocation54_spill] sm:$0xff] %v6076_v22  ;;  %v6078_v9 = vpop.f32.mrf.mxu0  ;;  %v7193_v22 = vsub.s32 0, %v7192_v7 }
 0x874   :  { %7185 = vst [vmem:[#allocation55_spill] sm:$0xff] %v6078_v9  ;;  %v6080_v12 = vpop.f32.mrf.mxu1 }
 0x875   :  { %7186 = vst [vmem:[#allocation53_spill] sm:$0xff] %v6080_v12  ;;  %v6082_v62 = vpop.f32.mrf.mxu0  ;;  %v6097_v21 = vrot.slane %v4277_v8, %v7193_v22 }
 0x876   :  { %7187 = vst [vmem:[#allocation60_spill] sm:$0xff] %v6082_v62  ;;  %v6084_v15 = vpop.f32.mrf.mxu1 }
 0x877   :  { %7188 = vst [vmem:[#allocation11_spill] sm:$0xff] %v6084_v15  ;;  %v6086_v24 = vpop.f32.mrf.mxu0  ;;  %7194 = vst [vmem:[#allocation58_spill] sm:$0xff] %v6097_v21  ;;  %v7197_v15 = vsub.s32 1, %v7192_v7  ;;  %v2505_v18 = vadd.f32 %v2504_v16, %v6097_v21 }
 0x878   :  { %7189 = vst [vmem:[#allocation31_spill] sm:$0xff] %v6086_v24  ;;  %v6088_v19 = vpop.f32.mrf.mxu1 }
 0x879   :  { %7190 = vst [vmem:[#allocation34_spill] sm:$0xff] %v6088_v19  ;;  %v6093_v44 = vpop.f32.mrf.mxu0  ;;  %v6105_v62 = vrot.slane %v4277_v8, %v7197_v15  ;;  %v7201_v15 = vsub.s32 3, %v7192_v7 }
 0x87a   :  { %7191 = vst [vmem:[#allocation56_spill] sm:$0xff] %v6093_v44  ;;  %v6099_v9 = vpop.f32.mrf.mxu1 }
 0x87b   :  { %7195 = vst [vmem:[#allocation59_spill] sm:$0xff] %v6099_v9  ;;  %v2507_v44 = vadd.f32 %v2506_v13, %v6105_v62  ;;  %v6117_v52 = vrot.slane %v4277_v8, %v7201_v15 }
 0x87d   :  { %7202 = vst [vmem:[#allocation63_spill] sm:$0xff] %v6117_v52  ;;  %v2620_v16 = vadd.f32 %v2619_v23, %v6117_v52 }
 0x8ff   :  { %v6101_v12 = vpop.f32.mrf.mxu0  ;;  %v6107_v24 = vpop.f32.mrf.mxu1 }
 0x900   :  { %7196 = vst [vmem:[#allocation57_spill] sm:$0xff] %v6101_v12  ;;  %7198 = vst [vmem:[#allocation32_spill] sm:$0xff] %v6107_v24 }
 0x901   :  { %v6109_v19 = vpop.f32.mrf.mxu0  ;;  %v6113_v5 = vpop.f32.mrf.mxu1 }
 0x902   :  { %7199 = vst [vmem:[#allocation61_spill] sm:$0xff] %v6109_v19  ;;  %7200 = vst [vmem:[#allocation62_spill] sm:$0xff] %v6113_v5  ;;  %v7203_v19 = vsub.s32 2, %v7192_v7 }
 0x903   :  { %v2831_v6 = vpop.f32.mrf.mxu0  ;;  %v2902_v12 = vpop.f32.mrf.mxu1 }
 0x904   :  { %v2907_v22 = vadd.f32 %v2831_v6, %v2505_v18  ;;  %v6122_v13 = vrot.slane %v4277_v8, %v7203_v19 }
 0x905   :  { %v2833_v25 = vpop.f32.mrf.mxu0  ;;  %v2904_v24 = vpop.f32.mrf.mxu1 }
 0x906   :  { %v4278_v9 = vmul.f32 -1.442695, %v2907_v22  ;;  %v2908_v14 = vadd.f32 %v2833_v25, %v2507_v44  ;;  %v2910_v5 = vadd.f32 %v2904_v24, %v2620_v16  ;;  %v2618_v6 = vadd.f32 %v2617_v10, %v6122_v13  ;;  %v7205_v16 = vld [vmem:[#allocation39_spill] sm:$0xff] }
 0x908   :  { %4492 = vpow2.f32 %v4278_v9  ;;  %v4279_v58 = vmul.f32 -1.442695, %v2908_v14  ;;  %v4280_v18 = vmul.f32 -1.442695, %v2910_v5  ;;  %v2909_v44 = vadd.f32 %v2902_v12, %v2618_v6  ;;  %v7206_v6 = vld [vmem:[#allocation37_spill] sm:$0xff] }
 0x90a   :  { %4494 = vpow2.f32 %v4279_v58 }
 0x90b   :  { %4496 = vpow2.f32 %v4280_v18  ;;  %v7207_v18 = vld [vmem:[#allocation40_spill] sm:$0xff] }
 0x915   :  { %v4493_v25 = vpop.eup %4492 }
 0x916   :  { %v2914_v9 = vadd.f32 1.0, %v4493_v25  ;;  %v7208_v25 = vld [vmem:[#allocation42_spill] sm:$0xff] }
 0x917   :  { %v4495_v14 = vpop.eup %4494 }
 0x918   :  { %4498 = vrcp.f32 %v2914_v9  ;;  %v2920_v22 = vadd.f32 1.0, %v4495_v14  ;;  %v4497_v58 = vpop.eup %4496  ;;  %v7210_v9 = vld [vmem:[#allocation41_spill] sm:$0xff]  ;;  %v7211_v14 = vld [vmem:[#allocation12_spill] sm:$0xff] }
 0x919   :  { %4500 = vtanh.f32 %v2909_v44  ;;  %v2927_v7 = vadd.f32 1.0, %v4497_v58  ;;  %v7209_v44 = vld [vmem:[#allocation43_spill] sm:$0xff]  ;;  %v7213_v58 = vld [vmem:[#allocation44_spill] sm:$0xff] }
 0x91a   :  { %4502 = vrcp.f32 %v2920_v22  ;;  %v7212_v22 = vld [vmem:[#allocation13_spill] sm:$0xff] }
 0x91b   :  { %4504 = vrcp.f32 %v2927_v7  ;;  %v7216_v7 = vld [vmem:[#allocation45_spill] sm:$0xff] }
 0x925   :  { %v4499_v15 = vpop.eup %4498 }
 0x926   :  { %v4501_v23 = vpop.eup %4500 }
 0x927   :  { %v4503_v52 = vpop.eup %4502  ;;  %v2931_v8 = vmul.f32 %v4501_v23, %v4499_v15  ;;  %v7214_v15 = vld [vmem:[#allocation46_spill] sm:$0xff]  ;;  %v7215_v23 = vld [vmem:[#allocation47_spill] sm:$0xff] }
 0x928   :  { %v2930_v19 = vmul.f32 0.0, %v4503_v52  ;;  %v4505_v12 = vpop.eup %4504  ;;  %v7204_v52 = vld [vmem:[#allocation38_spill] sm:$0xff] }
 0x92a   :  { %v6125_v24 = vadd.f32 %v2931_v8, %v2930_v19  ;;  %v7217_v19 = vld [vmem:[#allocation14_spill] sm:$0xff]  ;;  %v7218_v8 = vld [vmem:[#allocation15_spill] sm:$0xff] }
 0x92c   :  { %4506 = vtanh.f32 %v6125_v24 }
 0x939   :  { %v4507_v5 = vpop.eup %4506 }
 0x93a   :  { %v2934_v10 = vmul.f32 %v4507_v5, %v4505_v12  ;;  %v7219_v12 = vld [vmem:[#allocation16_spill] sm:$0xff]  ;;  %v7220_v5 = vld [vmem:[#allocation17_spill] sm:$0xff] }
 0x93c   :  { %3004 = vmatmul.mubr.f32.vlgmr.msra.gmra.mxu0 %v2934_v10  ;;  %3075 = vmatmul.mubr.f32.vlgmr.msra.gmra.mxu1 %v2934_v10  ;;  %v7221_v10 = vld [vmem:[#allocation18_spill] sm:$0xff] }
 0x93d   :  { %3114 = vmatpush1.msra.mxu0 %v5783_v63  ;;  %3185 = vmatpush1.msra.mxu1 %v5785_v26 }
 0x93e   :  { %3115 = vmatprep.subr.mxu0 %v5789_v17  ;;  %3186 = vmatprep.subr.mxu1 %v5791_v28 }
 0x93f   :  { %3116 = vmatpush1.msra.mxu0 %v5795_v30  ;;  %3187 = vmatpush1.msra.mxu1 %v5797_v31 }
 0x940   :  { %3117 = vmatprep.subr.mxu0 %v5801_v32  ;;  %3188 = vmatprep.subr.mxu1 %v5803_v33 }
 0x941   :  { %3118 = vmatpush1.msra.mxu0 %v5807_v34  ;;  %3189 = vmatpush1.msra.mxu1 %v5809_v35 }
 0x942   :  { %3119 = vmatprep.subr.mxu0 %v5813_v36  ;;  %3190 = vmatprep.subr.mxu1 %v5815_v37 }
 0x943   :  { %3120 = vmatpush1.msra.mxu0 %v5819_v39  ;;  %3191 = vmatpush1.msra.mxu1 %v5821_v40 }
 0x944   :  { %3121 = vmatprep.subr.mxu0 %v5825_v41  ;;  %3192 = vmatprep.subr.mxu1 %v5827_v42 }
 0x945   :  { %3122 = vmatpush1.msra.mxu0 %v5831_v43  ;;  %3193 = vmatpush1.msra.mxu1 %v5833_v46 }
 0x946   :  { %3123 = vmatprep.subr.mxu0 %v5837_v47  ;;  %3194 = vmatprep.subr.mxu1 %v5839_v27 }
 0x947   :  { %3124 = vmatpush1.msra.mxu0 %v5843_v45  ;;  %3195 = vmatpush1.msra.mxu1 %v5845_v53 }
 0x948   :  { %3125 = vmatprep.subr.mxu0 %v5849_v1  ;;  %3196 = vmatprep.subr.mxu1 %v5851_v38 }
 0x949   :  { %3126 = vmatpush1.msra.mxu0 %v5855_v20  ;;  %3197 = vmatpush1.msra.mxu1 %v5857_v50 }
 0x94a   :  { %3127 = vmatprep.subr.mxu0 %v5861_v2  ;;  %3198 = vmatprep.subr.mxu1 %v5863_v59 }
 0x94b   :  { %3128 = vmatpush1.msra.mxu0 %v5867_v11  ;;  %3199 = vmatpush1.msra.mxu1 %v5869_v61 }
 0x94c   :  { %3129 = vmatprep.subr.mxu0 %v5873_v48  ;;  %3200 = vmatprep.subr.mxu1 %v5875_v54 }
 0x94d   :  { %3130 = vmatpush1.msra.mxu0 %v5879_v49  ;;  %3201 = vmatpush1.msra.mxu1 %v5881_v51 }
 0x94e   :  { %3131 = vmatprep.subr.mxu0 %v5885_v55  ;;  %3202 = vmatprep.subr.mxu1 %v5887_v29 }
 0x94f   :  { %3132 = vmatpush1.msra.mxu0 %v5891_v0  ;;  %3203 = vmatpush1.msra.mxu1 %v5893_v57 }
 0x950   :  { %3133 = vmatprep.subr.mxu0 %v5897_v56  ;;  %3204 = vmatprep.subr.mxu1 %v5899_v60 }
 0x951   :  { %3134 = vmatpush1.msra.mxu0 %v5903_v3  ;;  %3205 = vmatpush1.msra.mxu1 %v5905_v4 }
 0x952   :  { %3135 = vmatprep.subr.mxu0 %v7204_v52  ;;  %3206 = vmatprep.subr.mxu1 %v7205_v16  ;;  %v7231_v16 = vld [vmem:[#allocation22_spill] sm:$0xff] }
 0x953   :  { %3136 = vmatpush1.msra.mxu0 %v7206_v6  ;;  %3207 = vmatpush1.msra.mxu1 %v7207_v18  ;;  %v7229_v18 = vld [vmem:[#allocation63_spill] sm:$0xff] }
 0x954   :  { %3137 = vmatprep.subr.mxu0 %v7208_v25  ;;  %3208 = vmatprep.subr.mxu1 %v7209_v44 }
 0x955   :  { %3138 = vmatpush1.msra.mxu0 %v7210_v9  ;;  %3209 = vmatpush1.msra.mxu1 %v7211_v14  ;;  %v7222_v14 = vld [vmem:[#allocation19_spill] sm:$0xff] }
 0x956   :  { %3139 = vmatprep.subr.mxu0 %v7212_v22  ;;  %3210 = vmatprep.subr.mxu1 %v7213_v58  ;;  %v7223_v22 = vmov 0.0   ;;  %v7224_v58 = vld [vmem:[#allocation20_spill] sm:$0xff] }
 0x957   :  { %3140 = vmatpush1.msra.mxu0 %v7214_v15  ;;  %3211 = vmatpush1.msra.mxu1 %v7215_v23  ;;  %v7225_v23 = vld [vmem:[#allocation35_spill] sm:$0xff] }
 0x958   :  { %3141 = vmatprep.subr.mxu0 %v7216_v7  ;;  %3212 = vmatprep.subr.mxu1 %v7217_v19  ;;  %v7226_v7 = vld [vmem:[#allocation33_spill] sm:$0xff] }
 0x959   :  { %3142 = vmatpush1.msra.mxu0 %v7218_v8  ;;  %3213 = vmatpush1.msra.mxu1 %v7219_v12  ;;  %v7227_v8 = vld [vmem:[#allocation21_spill] sm:$0xff] }
 0x95a   :  { %3143 = vmatprep.subr.mxu0 %v7220_v5  ;;  %3214 = vmatprep.subr.mxu1 %v7221_v10  ;;  %v2511_v19 = vadd.f32 %v7227_v8, %v6097_v21  ;;  %v7228_v5 = vld [vmem:[#allocation23_spill] sm:$0xff]  ;;  %v2624_v8 = vadd.f32 %v7231_v16, %v6122_v13 }
 0x95b   :  { %3144 = vmatpush1.msra.mxu0 %v7222_v14  ;;  %3177 = vmatprep.mubr.f32.mxu0 %v7223_v22  ;;  %v2513_v15 = vadd.f32 %v7228_v5, %v6105_v62 }
 0x95c   :  { %3215 = vmatpush1.msra.mxu1 %v7224_v58  ;;  %3248 = vmatprep.mubr.f32.mxu1 %v7223_v22 }
 0x95d   :  { %3287 = vmatprep.subr.mxu0 %v7225_v23  ;;  %3358 = vmatprep.subr.mxu1 %v7226_v7  ;;  %v7230_v23 = vld [vmem:[#allocation24_spill] sm:$0xff] }
 0x95e   :  { %v2626_v6 = vadd.f32 %v7230_v23, %v7229_v18 }
 0x9fc   :  { %v3005_v12 = vpop.f32.mrf.mxu0  ;;  %v3076_v25 = vpop.f32.mrf.mxu1 }
 0x9fd   :  { %v3081_v10 = vadd.f32 %v3005_v12, %v2511_v19  ;;  %v3083_v21 = vadd.f32 %v3076_v25, %v2624_v8  ;;  %v7244_v25 = vld [vmem:[#allocation47_spill] sm:$0xff] }
 0x9fe   :  { %v3007_v9 = vpop.f32.mrf.mxu0  ;;  %v3078_v22 = vpop.f32.mrf.mxu1  ;;  %v7247_v8 = vld [vmem:[#allocation15_spill] sm:$0xff] }
 0x9ff   :  { %v4281_v14 = vmul.f32 -1.442695, %v3081_v10  ;;  %v3082_v44 = vadd.f32 %v3007_v9, %v2513_v15  ;;  %v3084_v7 = vadd.f32 %v3078_v22, %v2626_v6  ;;  %v7246_v10 = vld [vmem:[#allocation14_spill] sm:$0xff] }
 0xa01   :  { %4508 = vpow2.f32 %v4281_v14  ;;  %v4282_v58 = vmul.f32 -1.442695, %v3082_v44  ;;  %v4283_v52 = vmul.f32 -1.442695, %v3084_v7  ;;  %v7245_v7 = vld [vmem:[#allocation45_spill] sm:$0xff] }
 0xa03   :  { %4510 = vpow2.f32 %v4282_v58 }
 0xa04   :  { %4512 = vtanh.f32 %v3083_v21 }
 0xa05   :  { %4514 = vpow2.f32 %v4283_v52  ;;  %v7243_v52 = vld [vmem:[#allocation46_spill] sm:$0xff] }
 0xa0e   :  { %v4509_v4 = vpop.eup %4508 }
 0xa0f   :  { %v3088_v5 = vadd.f32 1.0, %v4509_v4 }
 0xa10   :  { %v4511_v19 = vpop.eup %4510 }
 0xa11   :  { %4516 = vrcp.f32 %v3088_v5  ;;  %v3094_v9 = vadd.f32 1.0, %v4511_v19  ;;  %v4513_v44 = vpop.eup %4512  ;;  %v7248_v5 = vld [vmem:[#allocation16_spill] sm:$0xff]  ;;  %v7249_v19 = vld [vmem:[#allocation17_spill] sm:$0xff] }
 0xa12   :  { %v4515_v14 = vpop.eup %4514 }
 0xa13   :  { %4518 = vrcp.f32 %v3094_v9  ;;  %v3101_v23 = vadd.f32 1.0, %v4515_v14  ;;  %v7250_v9 = vld [vmem:[#allocation18_spill] sm:$0xff]  ;;  %v7252_v14 = vmov 0.0  }
 0xa15   :  { %4520 = vrcp.f32 %v3101_v23  ;;  %v7256_v23 = vld [vmem:[#allocation58_spill] sm:$0xff] }
 0xa1e   :  { %v4517_v58 = vpop.eup %4516 }
 0xa1f   :  { %v3105_v15 = vmul.f32 %v4517_v58, %v4513_v44  ;;  %v7251_v44 = vld [vmem:[#allocation19_spill] sm:$0xff]  ;;  %v7253_v58 = vld [vmem:[#allocation20_spill] sm:$0xff] }
 0xa20   :  { %v4519_v12 = vpop.eup %4518 }
 0xa21   :  { %v3104_v6 = vmul.f32 %v4519_v12, %v6125_v24  ;;  %v7242_v24 = vld [vmem:[#allocation44_spill] sm:$0xff]  ;;  %v7255_v12 = vld [vmem:[#allocation33_spill] sm:$0xff] }
 0xa22   :  { %v4521_v4 = vpop.eup %4520 }
 0xa23   :  { %v6203_v22 = vadd.f32 %v3105_v15, %v3104_v6  ;;  %v7254_v15 = vld [vmem:[#allocation35_spill] sm:$0xff]  ;;  %v7257_v6 = vld [vmem:[#allocation25_spill] sm:$0xff] }
 0xa25   :  { %4522 = vtanh.f32 %v6203_v22 }
 0xa32   :  { %v4523_v21 = vpop.eup %4522 }
 0xa33   :  { %v3108_v16 = vmul.f32 %v4523_v21, %v4521_v4  ;;  %v2517_v4 = vadd.f32 %v7257_v6, %v7256_v23 }
 0xa35   :  { %3178 = vmatmul.mubr.f32.vlgmr.msra.gmra.mxu0 %v3108_v16  ;;  %3249 = vmatmul.mubr.f32.vlgmr.msra.gmra.mxu1 %v3108_v16  ;;  %v7258_v16 = vld [vmem:[#allocation27_spill] sm:$0xff] }
 0xa36   :  { %3288 = vmatpush1.msra.mxu0 %v5783_v63  ;;  %3359 = vmatpush1.msra.mxu1 %v5785_v26  ;;  %v7232_v63 = vld [vmem:[#allocation36_spill] sm:$0xff]  ;;  %v7233_v26 = vld [vmem:[#allocation38_spill] sm:$0xff] }
 0xa37   :  { %3289 = vmatprep.subr.mxu0 %v5789_v17  ;;  %3360 = vmatprep.subr.mxu1 %v5791_v28  ;;  %v7234_v17 = vld [vmem:[#allocation39_spill] sm:$0xff]  ;;  %v7235_v28 = vld [vmem:[#allocation37_spill] sm:$0xff] }
 0xa38   :  { %3290 = vmatpush1.msra.mxu0 %v5795_v30  ;;  %3361 = vmatpush1.msra.mxu1 %v5797_v31  ;;  %v7236_v30 = vld [vmem:[#allocation40_spill] sm:$0xff]  ;;  %v7237_v31 = vld [vmem:[#allocation42_spill] sm:$0xff] }
 0xa39   :  { %3291 = vmatprep.subr.mxu0 %v5801_v32  ;;  %3362 = vmatprep.subr.mxu1 %v5803_v33  ;;  %v7238_v32 = vld [vmem:[#allocation43_spill] sm:$0xff]  ;;  %v7239_v33 = vld [vmem:[#allocation41_spill] sm:$0xff] }
 0xa3a   :  { %3292 = vmatpush1.msra.mxu0 %v5807_v34  ;;  %3363 = vmatpush1.msra.mxu1 %v5809_v35  ;;  %v7240_v34 = vld [vmem:[#allocation12_spill] sm:$0xff]  ;;  %v7241_v35 = vld [vmem:[#allocation13_spill] sm:$0xff] }
 0xa3b   :  { %3293 = vmatprep.subr.mxu0 %v5813_v36  ;;  %3364 = vmatprep.subr.mxu1 %v5815_v37 }
 0xa3c   :  { %3294 = vmatpush1.msra.mxu0 %v5819_v39  ;;  %3365 = vmatpush1.msra.mxu1 %v5821_v40 }
 0xa3d   :  { %3295 = vmatprep.subr.mxu0 %v5825_v41  ;;  %3366 = vmatprep.subr.mxu1 %v5827_v42 }
 0xa3e   :  { %3296 = vmatpush1.msra.mxu0 %v5831_v43  ;;  %3367 = vmatpush1.msra.mxu1 %v5833_v46 }
 0xa3f   :  { %3297 = vmatprep.subr.mxu0 %v5837_v47  ;;  %3368 = vmatprep.subr.mxu1 %v5839_v27 }
 0xa40   :  { %3298 = vmatpush1.msra.mxu0 %v5843_v45  ;;  %3369 = vmatpush1.msra.mxu1 %v5845_v53 }
 0xa41   :  { %3299 = vmatprep.subr.mxu0 %v5849_v1  ;;  %3370 = vmatprep.subr.mxu1 %v5851_v38 }
 0xa42   :  { %3300 = vmatpush1.msra.mxu0 %v5855_v20  ;;  %3371 = vmatpush1.msra.mxu1 %v5857_v50 }
 0xa43   :  { %3301 = vmatprep.subr.mxu0 %v5861_v2  ;;  %3372 = vmatprep.subr.mxu1 %v5863_v59 }
 0xa44   :  { %3302 = vmatpush1.msra.mxu0 %v5867_v11  ;;  %3373 = vmatpush1.msra.mxu1 %v5869_v61 }
 0xa45   :  { %3303 = vmatprep.subr.mxu0 %v5873_v48  ;;  %3374 = vmatprep.subr.mxu1 %v5875_v54 }
 0xa46   :  { %3304 = vmatpush1.msra.mxu0 %v5879_v49  ;;  %3375 = vmatpush1.msra.mxu1 %v5881_v51 }
 0xa47   :  { %3305 = vmatprep.subr.mxu0 %v5885_v55  ;;  %3376 = vmatprep.subr.mxu1 %v5887_v29 }
 0xa48   :  { %3306 = vmatpush1.msra.mxu0 %v5891_v0  ;;  %3377 = vmatpush1.msra.mxu1 %v5893_v57 }
 0xa49   :  { %3307 = vmatprep.subr.mxu0 %v5897_v56  ;;  %3378 = vmatprep.subr.mxu1 %v5899_v60 }
 0xa4a   :  { %3308 = vmatpush1.msra.mxu0 %v5903_v3  ;;  %3379 = vmatpush1.msra.mxu1 %v7232_v63 }
 0xa4b   :  { %3309 = vmatprep.subr.mxu0 %v7233_v26  ;;  %3380 = vmatprep.subr.mxu1 %v7234_v17 }
 0xa4c   :  { %3310 = vmatpush1.msra.mxu0 %v7235_v28  ;;  %3381 = vmatpush1.msra.mxu1 %v7236_v30 }
 0xa4d   :  { %3311 = vmatprep.subr.mxu0 %v7237_v31  ;;  %3382 = vmatprep.subr.mxu1 %v7238_v32 }
 0xa4e   :  { %3312 = vmatpush1.msra.mxu0 %v7239_v33  ;;  %3383 = vmatpush1.msra.mxu1 %v7240_v34 }
 0xa4f   :  { %3313 = vmatprep.subr.mxu0 %v7241_v35  ;;  %3384 = vmatprep.subr.mxu1 %v7242_v24 }
 0xa50   :  { %3314 = vmatpush1.msra.mxu0 %v7243_v52  ;;  %3385 = vmatpush1.msra.mxu1 %v7244_v25  ;;  %v7260_v25 = vld [vmem:[#allocation26_spill] sm:$0xff] }
 0xa51   :  { %3315 = vmatprep.subr.mxu0 %v7245_v7  ;;  %3386 = vmatprep.subr.mxu1 %v7246_v10  ;;  %v2630_v6 = vadd.f32 %v7260_v25, %v6122_v13 }
 0xa52   :  { %3316 = vmatpush1.msra.mxu0 %v7247_v8  ;;  %3387 = vmatpush1.msra.mxu1 %v7248_v5 }
 0xa53   :  { %3317 = vmatprep.subr.mxu0 %v7249_v19  ;;  %3388 = vmatprep.subr.mxu1 %v7250_v9  ;;  %v2519_v19 = vadd.f32 %v7258_v16, %v6105_v62 }
 0xa54   :  { %3318 = vmatpush1.msra.mxu0 %v7251_v44  ;;  %3351 = vmatprep.mubr.f32.mxu0 %v7252_v14 }
 0xa55   :  { %3389 = vmatpush1.msra.mxu1 %v7253_v58  ;;  %3422 = vmatprep.mubr.f32.mxu1 %v7252_v14 }
 0xa56   :  { %3461 = vmatprep.subr.mxu0 %v7254_v15  ;;  %3532 = vmatprep.subr.mxu1 %v7255_v12  ;;  %v7259_v15 = vld [vmem:[#allocation28_spill] sm:$0xff] }
 0xa57   :  { %v2632_v7 = vadd.f32 %v7259_v15, %v7229_v18  ;;  %v6290_v15 = vld [vmem:[#allocation6 + $0x3c8] sm:$0xff] }
 0xaf5   :  { %v3179_v21 = vpop.f32.mrf.mxu0  ;;  %v3250_v10 = vpop.f32.mrf.mxu1 }
 0xaf6   :  { %v3255_v9 = vadd.f32 %v3179_v21, %v2517_v4  ;;  %v3257_v23 = vadd.f32 %v3250_v10, %v2630_v6  ;;  %v6299_v6 = vld [vmem:[#allocation6 + $0x3d0] sm:$0xff] }
 0xaf7   :  { %v3181_v5 = vpop.f32.mrf.mxu0  ;;  %v3252_v14 = vpop.f32.mrf.mxu1 }
 0xaf8   :  { %v4284_v44 = vmul.f32 -1.442695, %v3255_v9  ;;  %v3256_v8 = vadd.f32 %v3181_v5, %v2519_v19  ;;  %v3258_v12 = vadd.f32 %v3252_v14, %v2632_v7 }
 0xafa   :  { %4524 = vpow2.f32 %v4284_v44  ;;  %v4285_v58 = vmul.f32 -1.442695, %v3256_v8  ;;  %v4286_v52 = vmul.f32 -1.442695, %v3258_v12  ;;  %v6296_v12 = vld [vmem:[#allocation6 + $0x3c0] sm:$0xff] }
 0xafc   :  { %4526 = vpow2.f32 %v4285_v58 }
 0xafd   :  { %4528 = vtanh.f32 %v3257_v23  ;;  %v6287_v23 = vld [vmem:[#allocation6 + $0x3f0] sm:$0xff] }
 0xafe   :  { %4530 = vpow2.f32 %v4286_v52  ;;  %v6284_v52 = vld [vmem:[#allocation6 + $0x3e0] sm:$0xff] }
 0xb07   :  { %v4525_v24 = vpop.eup %4524 }
 0xb08   :  { %v3262_v16 = vadd.f32 1.0, %v4525_v24 }
 0xb09   :  { %v4527_v4 = vpop.eup %4526 }
 0xb0a   :  { %4532 = vrcp.f32 %v3262_v16  ;;  %v3268_v5 = vadd.f32 1.0, %v4527_v4  ;;  %v4529_v8 = vpop.eup %4528  ;;  %v6302_v16 = vld [vmem:[#allocation6 + $0x3a8] sm:$0xff]  ;;  %v6305_v4 = vld [vmem:[#allocation6 + $0x3b8] sm:$0xff] }
 0xb0b   :  { %v4531_v19 = vpop.eup %4530 }
 0xb0c   :  { %4534 = vrcp.f32 %v3268_v5  ;;  %v3275_v21 = vadd.f32 1.0, %v4531_v19  ;;  %v6308_v5 = vld [vmem:[#allocation6 + $0x3a0] sm:$0xff] }
 0xb0e   :  { %4536 = vrcp.f32 %v3275_v21 }
 0xb17   :  { %v4533_v9 = vpop.eup %4532 }
 0xb18   :  { %v3279_v44 = vmul.f32 %v4533_v9, %v4529_v8  ;;  %v6311_v8 = vld [vmem:[#allocation6 + $0x3b0] sm:$0xff] }
 0xb19   :  { %v4535_v58 = vpop.eup %4534 }
 0xb1a   :  { %v3278_v7 = vmul.f32 %v4535_v58, %v6203_v22  ;;  %v6293_v22 = vld [vmem:[#allocation6 + $0x3d8] sm:$0xff] }
 0xb1b   :  { %v4537_v24 = vpop.eup %4536 }
 0xb1c   :  { %v6281_v14 = vadd.f32 %v3279_v44, %v3278_v7 }
 0xb1e   :  { %4538 = vtanh.f32 %v6281_v14 }
 0xb2b   :  { %v4539_v25 = vpop.eup %4538 }
 0xb2c   :  { %v3282_v10 = vmul.f32 %v4539_v25, %v4537_v24 }
 0xb2e   :  { %3352 = vmatmul.mubr.f32.vlgmr.msra.gmra.mxu0 %v3282_v10  ;;  %3423 = vmatmul.mubr.f32.vlgmr.msra.gmra.mxu1 %v3282_v10  ;;  %v6399_v10 = vld [vmem:[#allocation6 + $0x398] sm:$0xff] }
 0xb2f   :  { %3462 = vmatpush1.msra.mxu0 %v6284_v52  ;;  %3533 = vmatpush1.msra.mxu1 %v6287_v23 }
 0xb30   :  { %3463 = vmatprep.subr.mxu0 %v6290_v15  ;;  %3534 = vmatprep.subr.mxu1 %v6293_v22 }
 0xb31   :  { %3464 = vmatpush1.msra.mxu0 %v6296_v12  ;;  %3535 = vmatpush1.msra.mxu1 %v6299_v6 }
 0xb32   :  { %3465 = vmatprep.subr.mxu0 %v6302_v16  ;;  %3536 = vmatprep.subr.mxu1 %v6305_v4 }
 0xb33   :  { %3466 = vmatpush1.msra.mxu0 %v6308_v5  ;;  %3537 = vmatpush1.msra.mxu1 %v6311_v8 }
 0xb34   :  { %3467 = vmatprep.subr.mxu0 %v5813_v36  ;;  %3538 = vmatprep.subr.mxu1 %v5815_v37  ;;  %v7261_v36 = vld [vmem:[#allocation44_spill] sm:$0xff]  ;;  %v7262_v37 = vld [vmem:[#allocation46_spill] sm:$0xff] }
 0xb35   :  { %3468 = vmatpush1.msra.mxu0 %v5819_v39  ;;  %3539 = vmatpush1.msra.mxu1 %v5821_v40  ;;  %v7263_v39 = vld [vmem:[#allocation47_spill] sm:$0xff]  ;;  %v7264_v40 = vld [vmem:[#allocation45_spill] sm:$0xff] }
 0xb36   :  { %3469 = vmatprep.subr.mxu0 %v5825_v41  ;;  %3540 = vmatprep.subr.mxu1 %v5827_v42  ;;  %v7265_v41 = vld [vmem:[#allocation14_spill] sm:$0xff]  ;;  %v7266_v42 = vld [vmem:[#allocation15_spill] sm:$0xff] }
 0xb37   :  { %3470 = vmatpush1.msra.mxu0 %v5831_v43  ;;  %3541 = vmatpush1.msra.mxu1 %v5833_v46  ;;  %v7267_v43 = vld [vmem:[#allocation16_spill] sm:$0xff]  ;;  %v7268_v46 = vld [vmem:[#allocation17_spill] sm:$0xff] }
 0xb38   :  { %3471 = vmatprep.subr.mxu0 %v5837_v47  ;;  %3542 = vmatprep.subr.mxu1 %v5839_v27  ;;  %v7269_v47 = vld [vmem:[#allocation18_spill] sm:$0xff]  ;;  %v7270_v27 = vld [vmem:[#allocation19_spill] sm:$0xff] }
 0xb39   :  { %3472 = vmatpush1.msra.mxu0 %v5843_v45  ;;  %3543 = vmatpush1.msra.mxu1 %v5845_v53  ;;  %v7271_v45 = vmov 0.0   ;;  %v7272_v53 = vld [vmem:[#allocation20_spill] sm:$0xff] }
 0xb3a   :  { %3473 = vmatprep.subr.mxu0 %v5849_v1  ;;  %3544 = vmatprep.subr.mxu1 %v5851_v38  ;;  %v6368_v1 = vld [vmem:[#allocation6 + $0x3e8] sm:$0xff]  ;;  %v6371_v38 = vld [vmem:[#allocation6 + $0x3f8] sm:$0xff] }
 0xb3b   :  { %3474 = vmatpush1.msra.mxu0 %v5855_v20  ;;  %3545 = vmatpush1.msra.mxu1 %v5857_v50  ;;  %7273 = vst [vmem:[#allocation21_spill] sm:$0xff] %v6368_v1  ;;  %7274 = vst [vmem:[#allocation23_spill] sm:$0xff] %v6371_v38  ;;  %v7275_v20 = vld [vmem:[#allocation58_spill] sm:$0xff]  ;;  %v7276_v50 = vld [vmem:[#allocation29_spill] sm:$0xff] }
 0xb3c   :  { %3475 = vmatprep.subr.mxu0 %v5861_v2  ;;  %3546 = vmatprep.subr.mxu1 %v5863_v59  ;;  %v2523_v2 = vadd.f32 %v7276_v50, %v7275_v20  ;;  %v6435_v50 = vld [vmem:[#allocation6 + $0x338] sm:$0xff] }
 0xb3d   :  { %3476 = vmatpush1.msra.mxu0 %v5867_v11  ;;  %3547 = vmatpush1.msra.mxu1 %v5869_v61  ;;  %v7277_v11 = vld [vmem:[#allocation48_spill] sm:$0xff] }
 0xb3e   :  { %3477 = vmatprep.subr.mxu0 %v5873_v48  ;;  %3548 = vmatprep.subr.mxu1 %v5875_v54  ;;  %v2525_v61 = vadd.f32 %v7277_v11, %v6105_v62  ;;  %v6444_v11 = vld [vmem:[#allocation6 + $0x308] sm:$0xff] }
 0xb3f   :  { %3478 = vmatpush1.msra.mxu0 %v5879_v49  ;;  %3549 = vmatpush1.msra.mxu1 %v5881_v51 }
 0xb40   :  { %3479 = vmatprep.subr.mxu0 %v5885_v55  ;;  %3550 = vmatprep.subr.mxu1 %v5887_v29 }
 0xb41   :  { %3480 = vmatpush1.msra.mxu0 %v5891_v0  ;;  %3551 = vmatpush1.msra.mxu1 %v5893_v57  ;;  %v7278_v57 = vld [vmem:[#allocation50_spill] sm:$0xff] }
 0xb42   :  { %3481 = vmatprep.subr.mxu0 %v5897_v56  ;;  %3552 = vmatprep.subr.mxu1 %v5899_v60  ;;  %v2638_v56 = vadd.f32 %v7278_v57, %v7229_v18  ;;  %v6471_v57 = vld [vmem:[#allocation6 + $0x2d8] sm:$0xff] }
 0xb43   :  { %3482 = vmatpush1.msra.mxu0 %v5903_v3  ;;  %3553 = vmatpush1.msra.mxu1 %v7232_v63  ;;  %v7279_v3 = vld [vmem:[#allocation30_spill] sm:$0xff] }
 0xb44   :  { %3483 = vmatprep.subr.mxu0 %v7233_v26  ;;  %3554 = vmatprep.subr.mxu1 %v7234_v17  ;;  %v2636_v63 = vadd.f32 %v7279_v3, %v6122_v13  ;;  %v6480_v3 = vld [vmem:[#allocation6 + $0x2a8] sm:$0xff] }
 0xb45   :  { %3484 = vmatpush1.msra.mxu0 %v7235_v28  ;;  %3555 = vmatpush1.msra.mxu1 %v7236_v30 }
 0xb46   :  { %3485 = vmatprep.subr.mxu0 %v7237_v31  ;;  %3556 = vmatprep.subr.mxu1 %v7238_v32 }
 0xb47   :  { %3486 = vmatpush1.msra.mxu0 %v7239_v33  ;;  %3557 = vmatpush1.msra.mxu1 %v7240_v34 }
 0xb48   :  { %3487 = vmatprep.subr.mxu0 %v7241_v35  ;;  %3558 = vmatprep.subr.mxu1 %v7261_v36  ;;  %v6402_v36 = vld [vmem:[#allocation6 + $0x380] sm:$0xff] }
 0xb49   :  { %3488 = vmatpush1.msra.mxu0 %v7262_v37  ;;  %3559 = vmatpush1.msra.mxu1 %v7263_v39  ;;  %v6405_v37 = vld [vmem:[#allocation6 + $0x390] sm:$0xff]  ;;  %v6408_v39 = vld [vmem:[#allocation6 + $0x368] sm:$0xff] }
 0xb4a   :  { %3489 = vmatprep.subr.mxu0 %v7264_v40  ;;  %3560 = vmatprep.subr.mxu1 %v7265_v41  ;;  %v6411_v40 = vld [vmem:[#allocation6 + $0x378] sm:$0xff]  ;;  %v6414_v41 = vld [vmem:[#allocation6 + $0x360] sm:$0xff] }
 0xb4b   :  { %3490 = vmatpush1.msra.mxu0 %v7266_v42  ;;  %3561 = vmatpush1.msra.mxu1 %v7267_v43  ;;  %v6417_v42 = vld [vmem:[#allocation6 + $0x370] sm:$0xff]  ;;  %v6420_v43 = vld [vmem:[#allocation6 + $0x348] sm:$0xff] }
 0xb4c   :  { %3491 = vmatprep.subr.mxu0 %v7268_v46  ;;  %3562 = vmatprep.subr.mxu1 %v7269_v47  ;;  %v6423_v46 = vld [vmem:[#allocation6 + $0x358] sm:$0xff]  ;;  %v6426_v47 = vld [vmem:[#allocation6 + $0x340] sm:$0xff] }
 0xb4d   :  { %3492 = vmatpush1.msra.mxu0 %v7270_v27  ;;  %3525 = vmatprep.mubr.f32.mxu0 %v7271_v45  ;;  %v6429_v27 = vld [vmem:[#allocation6 + $0x350] sm:$0xff] }
 0xb4e   :  { %3563 = vmatpush1.msra.mxu1 %v7272_v53  ;;  %3596 = vmatprep.mubr.f32.mxu1 %v7271_v45  ;;  %v6432_v53 = vld [vmem:[#allocation6 + $0x328] sm:$0xff] }
 0xb4f   :  { %3635 = vmatprep.subr.mxu0 %v6368_v1  ;;  %3706 = vmatprep.subr.mxu1 %v6371_v38 }
 0xbee   :  { %v3353_v59 = vpop.f32.mrf.mxu0  ;;  %v3424_v55 = vpop.f32.mrf.mxu1 }
 0xbef   :  { %v3429_v48 = vadd.f32 %v3353_v59, %v2523_v2  ;;  %v3431_v26 = vadd.f32 %v3424_v55, %v2636_v63  ;;  %v6438_v2 = vld [vmem:[#allocation6 + $0x320] sm:$0xff]  ;;  %v6441_v59 = vld [vmem:[#allocation6 + $0x330] sm:$0xff]  ;;  %v6483_v63 = vld [vmem:[#allocation6 + $0x2b8] sm:$0xff] }
 0xbf0   :  { %v3355_v54 = vpop.f32.mrf.mxu0  ;;  %v3426_v0 = vpop.f32.mrf.mxu1  ;;  %v6462_v55 = vld [vmem:[#allocation6 + $0x2e0] sm:$0xff] }
 0xbf1   :  { %v4287_v49 = vmul.f32 -1.442695, %v3429_v48  ;;  %v3430_v51 = vadd.f32 %v3355_v54, %v2525_v61  ;;  %v3432_v60 = vadd.f32 %v3426_v0, %v2638_v56  ;;  %v6447_v61 = vld [vmem:[#allocation6 + $0x318] sm:$0xff]  ;;  %v6450_v48 = vld [vmem:[#allocation6 + $0x300] sm:$0xff]  ;;  %v6453_v54 = vld [vmem:[#allocation6 + $0x310] sm:$0xff] }
 0xbf2   :  { %v6468_v0 = vld [vmem:[#allocation6 + $0x2c8] sm:$0xff]  ;;  %v6474_v56 = vld [vmem:[#allocation6 + $0x2c0] sm:$0xff] }
 0xbf3   :  { %4540 = vpow2.f32 %v4287_v49  ;;  %v4288_v29 = vmul.f32 -1.442695, %v3430_v51  ;;  %v4289_v17 = vmul.f32 -1.442695, %v3432_v60  ;;  %v6456_v49 = vld [vmem:[#allocation6 + $0x2e8] sm:$0xff]  ;;  %v6459_v51 = vld [vmem:[#allocation6 + $0x2f8] sm:$0xff] }
 0xbf4   :  { %v6477_v60 = vld [vmem:[#allocation6 + $0x2d0] sm:$0xff] }
 0xbf5   :  { %4542 = vpow2.f32 %v4288_v29  ;;  %v6465_v29 = vld [vmem:[#allocation6 + $0x2f0] sm:$0xff] }
 0xbf6   :  { %4544 = vtanh.f32 %v3431_v26  ;;  %v6486_v26 = vld [vmem:[#allocation6 + $0x2a0] sm:$0xff] }
 0xbf7   :  { %4546 = vpow2.f32 %v4289_v17  ;;  %v6489_v17 = vld [vmem:[#allocation6 + $0x2b0] sm:$0xff] }
 0xbf8   :  { %7280 = vst [vmem:[#allocation63_spill] sm:$0xff] %v6489_v17 }
 0xc00   :  { %v4541_v28 = vpop.eup %4540 }
 0xc01   :  { %v3436_v30 = vadd.f32 1.0, %v4541_v28  ;;  %v6492_v28 = vld [vmem:[#allocation6 + $0x288] sm:$0xff] }
 0xc02   :  { %v4543_v31 = vpop.eup %4542  ;;  %7281 = vst [vmem:[#allocation24_spill] sm:$0xff] %v6492_v28 }
 0xc03   :  { %4548 = vrcp.f32 %v3436_v30  ;;  %v3442_v32 = vadd.f32 1.0, %v4543_v31  ;;  %v4545_v33 = vpop.eup %4544  ;;  %v6495_v30 = vld [vmem:[#allocation6 + $0x298] sm:$0xff]  ;;  %v6498_v31 = vld [vmem:[#allocation6 + $0x280] sm:$0xff] }
 0xc04   :  { %v4547_v34 = vpop.eup %4546  ;;  %7282 = vst [vmem:[#allocation22_spill] sm:$0xff] %v6495_v30  ;;  %7283 = vst [vmem:[#allocation36_spill] sm:$0xff] %v6498_v31 }
 0xc05   :  { %4550 = vrcp.f32 %v3442_v32  ;;  %v3449_v44 = vadd.f32 1.0, %v4547_v34  ;;  %v6501_v32 = vld [vmem:[#allocation6 + $0x290] sm:$0xff]  ;;  %v6507_v34 = vld [vmem:[#allocation6 + $0x278] sm:$0xff] }
 0xc06   :  { %7284 = vst [vmem:[#allocation38_spill] sm:$0xff] %v6501_v32  ;;  %7286 = vst [vmem:[#allocation37_spill] sm:$0xff] %v6507_v34 }
 0xc07   :  { %4552 = vrcp.f32 %v3449_v44  ;;  %v6519_v44 = vld [vmem:[#allocation6 + $0x258] sm:$0xff] }
 0xc08   :  { %7290 = vst [vmem:[#allocation41_spill] sm:$0xff] %v6519_v44 }
 0xc10   :  { %v4549_v35 = vpop.eup %4548 }
 0xc11   :  { %v3453_v19 = vmul.f32 %v4549_v35, %v4545_v33  ;;  %v6504_v33 = vld [vmem:[#allocation6 + $0x268] sm:$0xff]  ;;  %v6510_v35 = vld [vmem:[#allocation6 + $0x260] sm:$0xff] }
 0xc12   :  { %v4551_v9 = vpop.eup %4550  ;;  %7285 = vst [vmem:[#allocation39_spill] sm:$0xff] %v6504_v33  ;;  %7287 = vst [vmem:[#allocation40_spill] sm:$0xff] %v6510_v35 }
 0xc13   :  { %v3452_v58 = vmul.f32 %v4551_v9, %v6281_v14  ;;  %v6396_v14 = vld [vmem:[#allocation6 + $0x388] sm:$0xff] }
 0xc14   :  { %v4553_v7 = vpop.eup %4552  ;;  %v6516_v9 = vld [vmem:[#allocation6 + $0x248] sm:$0xff] }
 0xc15   :  { %v6383_v21 = vadd.f32 %v3453_v19, %v3452_v58  ;;  %v6513_v19 = vld [vmem:[#allocation6 + $0x270] sm:$0xff]  ;;  %7289 = vst [vmem:[#allocation43_spill] sm:$0xff] %v6516_v9  ;;  %v6522_v58 = vld [vmem:[#allocation6 + $0x240] sm:$0xff] }
 0xc16   :  { %7288 = vst [vmem:[#allocation42_spill] sm:$0xff] %v6513_v19  ;;  %7291 = vst [vmem:[#allocation12_spill] sm:$0xff] %v6522_v58 }
 0xc17   :  { %4554 = vtanh.f32 %v6383_v21 }
 0xc24   :  { %v4555_v24 = vpop.eup %4554 }
 0xc25   :  { %v3456_v25 = vmul.f32 %v4555_v24, %v4553_v7  ;;  %v6525_v7 = vld [vmem:[#allocation6 + $0x250] sm:$0xff]  ;;  %v6528_v24 = vld [vmem:[#allocation6 + $0x228] sm:$0xff] }
 0xc26   :  { %7292 = vst [vmem:[#allocation13_spill] sm:$0xff] %v6525_v7  ;;  %7293 = vst [vmem:[#allocation35_spill] sm:$0xff] %v6528_v24 }
 0xc27   :  { %3526 = vmatmul.mubr.f32.vlgmr.msra.gmra.mxu0 %v3456_v25  ;;  %3597 = vmatmul.mubr.f32.vlgmr.msra.gmra.mxu1 %v3456_v25  ;;  %v6531_v25 = vld [vmem:[#allocation6 + $0x238] sm:$0xff] }
 0xc28   :  { %3636 = vmatpush1.msra.mxu0 %v6284_v52  ;;  %3707 = vmatpush1.msra.mxu1 %v6287_v23  ;;  %7294 = vst [vmem:[#allocation33_spill] sm:$0xff] %v6531_v25 }
 0xc29   :  { %3637 = vmatprep.subr.mxu0 %v6290_v15  ;;  %3708 = vmatprep.subr.mxu1 %v6293_v22 }
 0xc2a   :  { %3638 = vmatpush1.msra.mxu0 %v6296_v12  ;;  %3709 = vmatpush1.msra.mxu1 %v6299_v6 }
 0xc2b   :  { %3639 = vmatprep.subr.mxu0 %v6302_v16  ;;  %3710 = vmatprep.subr.mxu1 %v6305_v4 }
 0xc2c   :  { %3640 = vmatpush1.msra.mxu0 %v6308_v5  ;;  %3711 = vmatpush1.msra.mxu1 %v6311_v8 }
 0xc2d   :  { %3641 = vmatprep.subr.mxu0 %v6396_v14  ;;  %3712 = vmatprep.subr.mxu1 %v6399_v10 }
 0xc2e   :  { %3642 = vmatpush1.msra.mxu0 %v6402_v36  ;;  %3713 = vmatpush1.msra.mxu1 %v6405_v37 }
 0xc2f   :  { %3643 = vmatprep.subr.mxu0 %v6408_v39  ;;  %3714 = vmatprep.subr.mxu1 %v6411_v40 }
 0xc30   :  { %3644 = vmatpush1.msra.mxu0 %v6414_v41  ;;  %3715 = vmatpush1.msra.mxu1 %v6417_v42 }
 0xc31   :  { %3645 = vmatprep.subr.mxu0 %v6420_v43  ;;  %3716 = vmatprep.subr.mxu1 %v6423_v46 }
 0xc32   :  { %3646 = vmatpush1.msra.mxu0 %v6426_v47  ;;  %3717 = vmatpush1.msra.mxu1 %v6429_v27 }
 0xc33   :  { %3647 = vmatprep.subr.mxu0 %v6432_v53  ;;  %3718 = vmatprep.subr.mxu1 %v6435_v50 }
 0xc34   :  { %3648 = vmatpush1.msra.mxu0 %v6438_v2  ;;  %3719 = vmatpush1.msra.mxu1 %v6441_v59 }
 0xc35   :  { %3649 = vmatprep.subr.mxu0 %v6444_v11  ;;  %3720 = vmatprep.subr.mxu1 %v6447_v61 }
 0xc36   :  { %3650 = vmatpush1.msra.mxu0 %v6450_v48  ;;  %3721 = vmatpush1.msra.mxu1 %v6453_v54 }
 0xc37   :  { %3651 = vmatprep.subr.mxu0 %v6456_v49  ;;  %3722 = vmatprep.subr.mxu1 %v6459_v51 }
 0xc38   :  { %3652 = vmatpush1.msra.mxu0 %v6462_v55  ;;  %3723 = vmatpush1.msra.mxu1 %v6465_v29 }
 0xc39   :  { %3653 = vmatprep.subr.mxu0 %v6468_v0  ;;  %3724 = vmatprep.subr.mxu1 %v6471_v57 }
 0xc3a   :  { %3654 = vmatpush1.msra.mxu0 %v6474_v56  ;;  %3725 = vmatpush1.msra.mxu1 %v6477_v60 }
 0xc3b   :  { %3655 = vmatprep.subr.mxu0 %v6480_v3  ;;  %3726 = vmatprep.subr.mxu1 %v6483_v63 }
 0xc3c   :  { %3656 = vmatpush1.msra.mxu0 %v6486_v26  ;;  %3727 = vmatpush1.msra.mxu1 %v6489_v17 }
 0xc3d   :  { %3657 = vmatprep.subr.mxu0 %v6492_v28  ;;  %3728 = vmatprep.subr.mxu1 %v6495_v30  ;;  %v7304_v30 = vld [vmem:[#allocation49_spill] sm:$0xff] }
 0xc3e   :  { %3658 = vmatpush1.msra.mxu0 %v6498_v31  ;;  %3729 = vmatpush1.msra.mxu1 %v6501_v32 }
 0xc3f   :  { %3659 = vmatprep.subr.mxu0 %v6504_v33  ;;  %3730 = vmatprep.subr.mxu1 %v6507_v34 }
 0xc40   :  { %3660 = vmatpush1.msra.mxu0 %v6510_v35  ;;  %3731 = vmatpush1.msra.mxu1 %v6513_v19 }
 0xc41   :  { %3661 = vmatprep.subr.mxu0 %v6516_v9  ;;  %3732 = vmatprep.subr.mxu1 %v6519_v44  ;;  %v6534_v9 = vld [vmem:[#allocation6 + $0x220] sm:$0xff]  ;;  %v6537_v44 = vld [vmem:[#allocation6 + $0x230] sm:$0xff] }
 0xc42   :  { %3662 = vmatpush1.msra.mxu0 %v6522_v58  ;;  %3733 = vmatpush1.msra.mxu1 %v6525_v7  ;;  %7295 = vst [vmem:[#allocation25_spill] sm:$0xff] %v6534_v9  ;;  %7296 = vst [vmem:[#allocation27_spill] sm:$0xff] %v6537_v44  ;;  %v6540_v58 = vld [vmem:[#allocation6 + $0x208] sm:$0xff]  ;;  %v6543_v7 = vld [vmem:[#allocation6 + $0x218] sm:$0xff] }
 0xc43   :  { %3663 = vmatprep.subr.mxu0 %v6528_v24  ;;  %3734 = vmatprep.subr.mxu1 %v6531_v25  ;;  %7297 = vst [vmem:[#allocation28_spill] sm:$0xff] %v6540_v58  ;;  %7298 = vst [vmem:[#allocation26_spill] sm:$0xff] %v6543_v7  ;;  %v6546_v24 = vld [vmem:[#allocation6 + $0x200] sm:$0xff]  ;;  %v6550_v25 = vld [vmem:[#allocation6 + $0x210] sm:$0xff] }
 0xc44   :  { %3664 = vmatpush1.msra.mxu0 %v6534_v9  ;;  %3735 = vmatpush1.msra.mxu1 %v6537_v44  ;;  %7299 = vst [vmem:[#allocation44_spill] sm:$0xff] %v6546_v24  ;;  %7300 = vst [vmem:[#allocation46_spill] sm:$0xff] %v6550_v25  ;;  %v7302_v9 = vld [vmem:[#allocation52_spill] sm:$0xff] }
 0xc45   :  { %3665 = vmatprep.subr.mxu0 %v6540_v58  ;;  %3736 = vmatprep.subr.mxu1 %v6543_v7  ;;  %v7301_v58 = vld [vmem:[#allocation51_spill] sm:$0xff]  ;;  %v2531_v19 = vadd.f32 %v7302_v9, %v6105_v62 }
 0xc46   :  { %3666 = vmatpush1.msra.mxu0 %v6546_v24  ;;  %3699 = vmatprep.mubr.f32.mxu0 %v7271_v45  ;;  %v2529_v44 = vadd.f32 %v7301_v58, %v7275_v20  ;;  %v2642_v58 = vadd.f32 %v7304_v30, %v6122_v13  ;;  %v7307_v30 = vld [vmem:[#allocation22_spill] sm:$0xff] }
 0xc47   :  { %3737 = vmatpush1.msra.mxu1 %v6550_v25  ;;  %3770 = vmatprep.mubr.f32.mxu1 %v7271_v45 }
 0xc48   :  { %3809 = vmatprep.subr.mxu0 %v6368_v1  ;;  %3880 = vmatprep.subr.mxu1 %v6371_v38  ;;  %v7303_v1 = vld [vmem:[#allocation54_spill] sm:$0xff] }
 0xc49   :  { %v2644_v31 = vadd.f32 %v7303_v1, %v7229_v18 }
 0xce7   :  { %v3527_v7 = vpop.f32.mrf.mxu0  ;;  %v3598_v32 = vpop.f32.mrf.mxu1 }
 0xce8   :  { %v3603_v24 = vadd.f32 %v3527_v7, %v2529_v44  ;;  %v3605_v20 = vadd.f32 %v3598_v32, %v2642_v58  ;;  %v7308_v32 = vld [vmem:[#allocation36_spill] sm:$0xff]  ;;  %v7310_v58 = vld [vmem:[#allocation39_spill] sm:$0xff] }
 0xce9   :  { %v3529_v35 = vpop.f32.mrf.mxu0  ;;  %v3600_v45 = vpop.f32.mrf.mxu1 }
 0xcea   :  { %v4290_v34 = vmul.f32 -1.442695, %v3603_v24  ;;  %v3604_v33 = vadd.f32 %v3529_v35, %v2531_v19  ;;  %v3606_v38 = vadd.f32 %v3600_v45, %v2644_v31 }
 0xcec   :  { %4556 = vpow2.f32 %v4290_v34  ;;  %v4291_v25 = vmul.f32 -1.442695, %v3604_v33  ;;  %v4292_v28 = vmul.f32 -1.442695, %v3606_v38 }
 0xcee   :  { %4558 = vpow2.f32 %v4291_v25  ;;  %v7309_v25 = vld [vmem:[#allocation38_spill] sm:$0xff] }
 0xcef   :  { %4560 = vtanh.f32 %v3605_v20 }
 0xcf0   :  { %4562 = vpow2.f32 %v4292_v28  ;;  %v7306_v28 = vld [vmem:[#allocation24_spill] sm:$0xff] }
 0xcf9   :  { %v4557_v17 = vpop.eup %4556 }
 0xcfa   :  { %v3610_v9 = vadd.f32 1.0, %v4557_v17 }
 0xcfb   :  { %v4559_v44 = vpop.eup %4558 }
 0xcfc   :  { %4564 = vrcp.f32 %v3610_v9  ;;  %v3616_v34 = vadd.f32 1.0, %v4559_v44  ;;  %v4561_v33 = vpop.eup %4560  ;;  %v7311_v9 = vld [vmem:[#allocation37_spill] sm:$0xff]  ;;  %v7312_v44 = vld [vmem:[#allocation40_spill] sm:$0xff] }
 0xcfd   :  { %v4563_v35 = vpop.eup %4562 }
 0xcfe   :  { %4566 = vrcp.f32 %v3616_v34  ;;  %v3623_v1 = vadd.f32 1.0, %v4563_v35  ;;  %v7313_v34 = vld [vmem:[#allocation42_spill] sm:$0xff]  ;;  %v7315_v35 = vld [vmem:[#allocation41_spill] sm:$0xff] }
 0xd00   :  { %4568 = vrcp.f32 %v3623_v1  ;;  %v7319_v1 = vld [vmem:[#allocation33_spill] sm:$0xff] }
 0xd09   :  { %v4565_v19 = vpop.eup %4564 }
 0xd0a   :  { %v3627_v7 = vmul.f32 %v4565_v19, %v4561_v33  ;;  %v7314_v33 = vld [vmem:[#allocation43_spill] sm:$0xff]  ;;  %v7316_v19 = vld [vmem:[#allocation12_spill] sm:$0xff] }
 0xd0b   :  { %v4567_v24 = vpop.eup %4566 }
 0xd0c   :  { %v3626_v45 = vmul.f32 %v4567_v24, %v6383_v21  ;;  %v7305_v21 = vld [vmem:[#allocation63_spill] sm:$0xff] }
 0xd0d   :  { %v4569_v38 = vpop.eup %4568  ;;  %v7318_v24 = vld [vmem:[#allocation35_spill] sm:$0xff] }
 0xd0e   :  { %v6565_v31 = vadd.f32 %v3627_v7, %v3626_v45  ;;  %v7317_v7 = vld [vmem:[#allocation13_spill] sm:$0xff] }
 0xd0f   :  { %v7320_v45 = vld [vmem:[#allocation25_spill] sm:$0xff] }
 0xd10   :  { %4570 = vtanh.f32 %v6565_v31 }
 0xd1d   :  { %v4571_v20 = vpop.eup %4570 }
 0xd1e   :  { %v3630_v17 = vmul.f32 %v4571_v20, %v4569_v38  ;;  %v7321_v38 = vld [vmem:[#allocation27_spill] sm:$0xff]  ;;  %v7322_v20 = vld [vmem:[#allocation28_spill] sm:$0xff] }
 0xd20   :  { %3700 = vmatmul.mubr.f32.vlgmr.msra.gmra.mxu0 %v3630_v17  ;;  %3771 = vmatmul.mubr.f32.vlgmr.msra.gmra.mxu1 %v3630_v17  ;;  %v7323_v17 = vld [vmem:[#allocation26_spill] sm:$0xff] }
 0xd21   :  { %3810 = vmatpush1.msra.mxu0 %v6284_v52  ;;  %3881 = vmatpush1.msra.mxu1 %v6287_v23 }
 0xd22   :  { %3811 = vmatprep.subr.mxu0 %v6290_v15  ;;  %3882 = vmatprep.subr.mxu1 %v6293_v22 }
 0xd23   :  { %3812 = vmatpush1.msra.mxu0 %v6296_v12  ;;  %3883 = vmatpush1.msra.mxu1 %v6299_v6 }
 0xd24   :  { %3813 = vmatprep.subr.mxu0 %v6302_v16  ;;  %3884 = vmatprep.subr.mxu1 %v6305_v4 }
 0xd25   :  { %3814 = vmatpush1.msra.mxu0 %v6308_v5  ;;  %3885 = vmatpush1.msra.mxu1 %v6311_v8 }
 0xd26   :  { %3815 = vmatprep.subr.mxu0 %v6396_v14  ;;  %3886 = vmatprep.subr.mxu1 %v6399_v10 }
 0xd27   :  { %3816 = vmatpush1.msra.mxu0 %v6402_v36  ;;  %3887 = vmatpush1.msra.mxu1 %v6405_v37 }
 0xd28   :  { %3817 = vmatprep.subr.mxu0 %v6408_v39  ;;  %3888 = vmatprep.subr.mxu1 %v6411_v40 }
 0xd29   :  { %3818 = vmatpush1.msra.mxu0 %v6414_v41  ;;  %3889 = vmatpush1.msra.mxu1 %v6417_v42 }
 0xd2a   :  { %3819 = vmatprep.subr.mxu0 %v6420_v43  ;;  %3890 = vmatprep.subr.mxu1 %v6423_v46 }
 0xd2b   :  { %3820 = vmatpush1.msra.mxu0 %v6426_v47  ;;  %3891 = vmatpush1.msra.mxu1 %v6429_v27 }
 0xd2c   :  { %3821 = vmatprep.subr.mxu0 %v6432_v53  ;;  %3892 = vmatprep.subr.mxu1 %v6435_v50 }
 0xd2d   :  { %3822 = vmatpush1.msra.mxu0 %v6438_v2  ;;  %3893 = vmatpush1.msra.mxu1 %v6441_v59 }
 0xd2e   :  { %3823 = vmatprep.subr.mxu0 %v6444_v11  ;;  %3894 = vmatprep.subr.mxu1 %v6447_v61 }
 0xd2f   :  { %3824 = vmatpush1.msra.mxu0 %v6450_v48  ;;  %3895 = vmatpush1.msra.mxu1 %v6453_v54 }
 0xd30   :  { %3825 = vmatprep.subr.mxu0 %v6456_v49  ;;  %3896 = vmatprep.subr.mxu1 %v6459_v51 }
 0xd31   :  { %3826 = vmatpush1.msra.mxu0 %v6462_v55  ;;  %3897 = vmatpush1.msra.mxu1 %v6465_v29 }
 0xd32   :  { %3827 = vmatprep.subr.mxu0 %v6468_v0  ;;  %3898 = vmatprep.subr.mxu1 %v6471_v57 }
 0xd33   :  { %3828 = vmatpush1.msra.mxu0 %v6474_v56  ;;  %3899 = vmatpush1.msra.mxu1 %v6477_v60 }
 0xd34   :  { %3829 = vmatprep.subr.mxu0 %v6480_v3  ;;  %3900 = vmatprep.subr.mxu1 %v6483_v63 }
 0xd35   :  { %3830 = vmatpush1.msra.mxu0 %v6486_v26  ;;  %3901 = vmatpush1.msra.mxu1 %v7305_v21 }
 0xd36   :  { %3831 = vmatprep.subr.mxu0 %v7306_v28  ;;  %3902 = vmatprep.subr.mxu1 %v7307_v30  ;;  %v7333_v30 = vld [vmem:[#allocation53_spill] sm:$0xff] }
 0xd37   :  { %3832 = vmatpush1.msra.mxu0 %v7308_v32  ;;  %3903 = vmatpush1.msra.mxu1 %v7309_v25 }
 0xd38   :  { %3833 = vmatprep.subr.mxu0 %v7310_v58  ;;  %3904 = vmatprep.subr.mxu1 %v7311_v9 }
 0xd39   :  { %3834 = vmatpush1.msra.mxu0 %v7312_v44  ;;  %3905 = vmatpush1.msra.mxu1 %v7313_v34  ;;  %v7324_v34 = vld [vmem:[#allocation44_spill] sm:$0xff] }
 0xd3a   :  { %3835 = vmatprep.subr.mxu0 %v7314_v33  ;;  %3906 = vmatprep.subr.mxu1 %v7315_v35  ;;  %v7325_v33 = vmov 0.0   ;;  %v7326_v35 = vld [vmem:[#allocation46_spill] sm:$0xff] }
 0xd3b   :  { %3836 = vmatpush1.msra.mxu0 %v7316_v19  ;;  %3907 = vmatpush1.msra.mxu1 %v7317_v7  ;;  %v7327_v7 = vld [vmem:[#allocation21_spill] sm:$0xff] }
 0xd3c   :  { %3837 = vmatprep.subr.mxu0 %v7318_v24  ;;  %3908 = vmatprep.subr.mxu1 %v7319_v1  ;;  %v7328_v24 = vld [vmem:[#allocation23_spill] sm:$0xff]  ;;  %v7329_v1 = vld [vmem:[#allocation58_spill] sm:$0xff] }
 0xd3d   :  { %3838 = vmatpush1.msra.mxu0 %v7320_v45  ;;  %3909 = vmatpush1.msra.mxu1 %v7321_v38  ;;  %v7330_v45 = vld [vmem:[#allocation55_spill] sm:$0xff] }
 0xd3e   :  { %3839 = vmatprep.subr.mxu0 %v7322_v20  ;;  %3910 = vmatprep.subr.mxu1 %v7323_v17  ;;  %v2535_v19 = vadd.f32 %v7330_v45, %v7329_v1  ;;  %v7331_v20 = vld [vmem:[#allocation60_spill] sm:$0xff]  ;;  %v2648_v45 = vadd.f32 %v7333_v30, %v6122_v13 }
 0xd3f   :  { %3840 = vmatpush1.msra.mxu0 %v7324_v34  ;;  %3873 = vmatprep.mubr.f32.mxu0 %v7325_v33  ;;  %v2537_v44 = vadd.f32 %v7331_v20, %v6105_v62 }
 0xd40   :  { %3911 = vmatpush1.msra.mxu1 %v7326_v35  ;;  %3944 = vmatprep.mubr.f32.mxu1 %v7325_v33 }
 0xd41   :  { %3983 = vmatprep.subr.mxu0 %v7327_v7  ;;  %4054 = vmatprep.subr.mxu1 %v7328_v24  ;;  %v7332_v7 = vld [vmem:[#allocation11_spill] sm:$0xff] }
 0xd42   :  { %v2650_v32 = vadd.f32 %v7332_v7, %v7229_v18 }
 0xde0   :  { %v3701_v38 = vpop.f32.mrf.mxu0  ;;  %v3772_v25 = vpop.f32.mrf.mxu1 }
 0xde1   :  { %v3777_v17 = vadd.f32 %v3701_v38, %v2535_v19  ;;  %v3779_v1 = vadd.f32 %v3772_v25, %v2648_v45 }
 0xde2   :  { %v3703_v9 = vpop.f32.mrf.mxu0  ;;  %v3774_v33 = vpop.f32.mrf.mxu1 }
 0xde3   :  { %v4293_v34 = vmul.f32 -1.442695, %v3777_v17  ;;  %v3778_v58 = vadd.f32 %v3703_v9, %v2537_v44  ;;  %v3780_v24 = vadd.f32 %v3774_v33, %v2650_v32 }
 0xde5   :  { %4572 = vpow2.f32 %v4293_v34  ;;  %v4294_v35 = vmul.f32 -1.442695, %v3778_v58  ;;  %v4295_v28 = vmul.f32 -1.442695, %v3780_v24 }
 0xde7   :  { %4574 = vpow2.f32 %v4294_v35 }
 0xde8   :  { %4576 = vtanh.f32 %v3779_v1 }
 0xde9   :  { %4578 = vpow2.f32 %v4295_v28 }
 0xdf2   :  { %v4573_v21 = vpop.eup %4572 }
 0xdf3   :  { %v3784_v20 = vadd.f32 1.0, %v4573_v21 }
 0xdf4   :  { %v4575_v19 = vpop.eup %4574 }
 0xdf5   :  { %4580 = vrcp.f32 %v3784_v20  ;;  %v3790_v9 = vadd.f32 1.0, %v4575_v19  ;;  %v4577_v58 = vpop.eup %4576 }
 0xdf6   :  { %v4579_v44 = vpop.eup %4578 }
 0xdf7   :  { %4582 = vrcp.f32 %v3790_v9  ;;  %v3797_v17 = vadd.f32 1.0, %v4579_v44 }
 0xdf9   :  { %4584 = vrcp.f32 %v3797_v17 }
 0xe02   :  { %v4581_v34 = vpop.eup %4580 }
 0xe03   :  { %v3801_v35 = vmul.f32 %v4581_v34, %v4577_v58 }
 0xe04   :  { %v4583_v38 = vpop.eup %4582 }
 0xe05   :  { %v3800_v32 = vmul.f32 %v4583_v38, %v6565_v31 }
 0xe06   :  { %v4585_v21 = vpop.eup %4584 }
 0xe07   :  { %v6643_v33 = vadd.f32 %v3801_v35, %v3800_v32 }
 0xe09   :  { %4586 = vtanh.f32 %v6643_v33 }
 0xe16   :  { %v4587_v30 = vpop.eup %4586 }
 0xe17   :  { %v3804_v25 = vmul.f32 %v4587_v30, %v4585_v21  ;;  %v4168_v21 = vld [vmem:[#allocation8 + $0x78] sm:$0xff]  ;;  %v4167_v30 = vld [vmem:[#allocation8 + $0x70] sm:$0xff] }
 0xe19   :  { %3874 = vmatmul.mubr.f32.vlgmr.msra.gmra.mxu0 %v3804_v25  ;;  %3945 = vmatmul.mubr.f32.vlgmr.msra.gmra.mxu1 %v3804_v25  ;;  %v4166_v25 = vld [vmem:[#allocation8 + $0x68] sm:$0xff] }
 0xe1a   :  { %3984 = vmatpush1.msra.mxu0 %v6284_v52  ;;  %4055 = vmatpush1.msra.mxu1 %v6287_v23  ;;  %v7334_v52 = vld [vmem:[#allocation63_spill] sm:$0xff]  ;;  %v7335_v23 = vld [vmem:[#allocation24_spill] sm:$0xff] }
 0xe1b   :  { %3985 = vmatprep.subr.mxu0 %v6290_v15  ;;  %4056 = vmatprep.subr.mxu1 %v6293_v22  ;;  %v7336_v15 = vld [vmem:[#allocation22_spill] sm:$0xff]  ;;  %v7337_v22 = vld [vmem:[#allocation36_spill] sm:$0xff] }
 0xe1c   :  { %3986 = vmatpush1.msra.mxu0 %v6296_v12  ;;  %4057 = vmatpush1.msra.mxu1 %v6299_v6  ;;  %v7338_v12 = vld [vmem:[#allocation38_spill] sm:$0xff]  ;;  %v7339_v6 = vld [vmem:[#allocation39_spill] sm:$0xff] }
 0xe1d   :  { %3987 = vmatprep.subr.mxu0 %v6302_v16  ;;  %4058 = vmatprep.subr.mxu1 %v6305_v4  ;;  %v7340_v16 = vld [vmem:[#allocation37_spill] sm:$0xff]  ;;  %v7341_v4 = vld [vmem:[#allocation40_spill] sm:$0xff] }
 0xe1e   :  { %3988 = vmatpush1.msra.mxu0 %v6308_v5  ;;  %4059 = vmatpush1.msra.mxu1 %v6311_v8  ;;  %v7342_v5 = vld [vmem:[#allocation42_spill] sm:$0xff]  ;;  %v7343_v8 = vld [vmem:[#allocation43_spill] sm:$0xff] }
 0xe1f   :  { %3989 = vmatprep.subr.mxu0 %v6396_v14  ;;  %4060 = vmatprep.subr.mxu1 %v6399_v10  ;;  %v7344_v14 = vld [vmem:[#allocation41_spill] sm:$0xff]  ;;  %v7345_v10 = vld [vmem:[#allocation12_spill] sm:$0xff] }
 0xe20   :  { %3990 = vmatpush1.msra.mxu0 %v6402_v36  ;;  %4061 = vmatpush1.msra.mxu1 %v6405_v37  ;;  %v7346_v36 = vld [vmem:[#allocation13_spill] sm:$0xff]  ;;  %v7347_v37 = vld [vmem:[#allocation35_spill] sm:$0xff] }
 0xe21   :  { %3991 = vmatprep.subr.mxu0 %v6408_v39  ;;  %4062 = vmatprep.subr.mxu1 %v6411_v40  ;;  %v7348_v39 = vld [vmem:[#allocation33_spill] sm:$0xff] }
 0xe22   :  { %3992 = vmatpush1.msra.mxu0 %v6414_v41  ;;  %4063 = vmatpush1.msra.mxu1 %v6417_v42  ;;  %v7349_v40 = vld [vmem:[#allocation25_spill] sm:$0xff]  ;;  %v7350_v41 = vld [vmem:[#allocation27_spill] sm:$0xff]  ;;  %v7351_v42 = vld [vmem:[#allocation28_spill] sm:$0xff] }
 0xe23   :  { %3993 = vmatprep.subr.mxu0 %v6420_v43  ;;  %4064 = vmatprep.subr.mxu1 %v6423_v46  ;;  %v7352_v43 = vld [vmem:[#allocation26_spill] sm:$0xff]  ;;  %v7353_v46 = vld [vmem:[#allocation44_spill] sm:$0xff] }
 0xe24   :  { %3994 = vmatpush1.msra.mxu0 %v6426_v47  ;;  %4065 = vmatpush1.msra.mxu1 %v6429_v27  ;;  %v7354_v47 = vmov 0.0   ;;  %v7355_v27 = vld [vmem:[#allocation46_spill] sm:$0xff] }
 0xe25   :  { %3995 = vmatprep.subr.mxu0 %v6432_v53  ;;  %4066 = vmatprep.subr.mxu1 %v6435_v50  ;;  %v7356_v53 = vld [vmem:[#allocation58_spill] sm:$0xff]  ;;  %v7357_v50 = vld [vmem:[#allocation31_spill] sm:$0xff] }
 0xe26   :  { %3996 = vmatpush1.msra.mxu0 %v6438_v2  ;;  %4067 = vmatpush1.msra.mxu1 %v6441_v59  ;;  %v2541_v2 = vadd.f32 %v7357_v50, %v7356_v53 }
 0xe27   :  { %3997 = vmatprep.subr.mxu0 %v6444_v11  ;;  %4068 = vmatprep.subr.mxu1 %v6447_v61  ;;  %v7358_v11 = vld [vmem:[#allocation56_spill] sm:$0xff] }
 0xe28   :  { %3998 = vmatpush1.msra.mxu0 %v6450_v48  ;;  %4069 = vmatpush1.msra.mxu1 %v6453_v54  ;;  %v2543_v61 = vadd.f32 %v7358_v11, %v6105_v62  ;;  %v7363_v11 = vld [vmem:[#allocation62_spill] sm:$0xff] }
 0xe29   :  { %3999 = vmatprep.subr.mxu0 %v6456_v49  ;;  %4070 = vmatprep.subr.mxu1 %v6459_v51 }
 0xe2a   :  { %4000 = vmatpush1.msra.mxu0 %v6462_v55  ;;  %4071 = vmatpush1.msra.mxu1 %v6465_v29 }
 0xe2b   :  { %4001 = vmatprep.subr.mxu0 %v6468_v0  ;;  %4072 = vmatprep.subr.mxu1 %v6471_v57  ;;  %v7359_v57 = vld [vmem:[#allocation59_spill] sm:$0xff] }
 0xe2c   :  { %4002 = vmatpush1.msra.mxu0 %v6474_v56  ;;  %4073 = vmatpush1.msra.mxu1 %v6477_v60  ;;  %v2656_v56 = vadd.f32 %v7359_v57, %v7229_v18 }
 0xe2d   :  { %4003 = vmatprep.subr.mxu0 %v6480_v3  ;;  %4074 = vmatprep.subr.mxu1 %v6483_v63  ;;  %v7360_v3 = vld [vmem:[#allocation34_spill] sm:$0xff] }
 0xe2e   :  { %4004 = vmatpush1.msra.mxu0 %v6486_v26  ;;  %4075 = vmatpush1.msra.mxu1 %v7334_v52  ;;  %v2654_v63 = vadd.f32 %v7360_v3, %v6122_v13  ;;  %v4164_v52 = vld [vmem:[#allocation8 + $0x58] sm:$0xff] }
 0xe2f   :  { %4005 = vmatprep.subr.mxu0 %v7335_v23  ;;  %4076 = vmatprep.subr.mxu1 %v7336_v15  ;;  %v4163_v23 = vld [vmem:[#allocation8 + $0x50] sm:$0xff]  ;;  %v4162_v15 = vld [vmem:[#allocation8 + $0x48] sm:$0xff] }
 0xe30   :  { %4006 = vmatpush1.msra.mxu0 %v7337_v22  ;;  %4077 = vmatpush1.msra.mxu1 %v7338_v12  ;;  %v4161_v22 = vld [vmem:[#allocation8 + $0x40] sm:$0xff]  ;;  %v4160_v12 = vld [vmem:[#allocation8 + $0x38] sm:$0xff] }
 0xe31   :  { %4007 = vmatprep.subr.mxu0 %v7339_v6  ;;  %4078 = vmatprep.subr.mxu1 %v7340_v16  ;;  %v4159_v6 = vld [vmem:[#allocation8 + $0x30] sm:$0xff]  ;;  %v4158_v16 = vld [vmem:[#allocation8 + $0x28] sm:$0xff] }
 0xe32   :  { %4008 = vmatpush1.msra.mxu0 %v7341_v4  ;;  %4079 = vmatpush1.msra.mxu1 %v7342_v5  ;;  %v4157_v4 = vld [vmem:[#allocation8 + $0x20] sm:$0xff]  ;;  %v4156_v5 = vld [vmem:[#allocation8 + $0x18] sm:$0xff] }
 0xe33   :  { %4009 = vmatprep.subr.mxu0 %v7343_v8  ;;  %4080 = vmatprep.subr.mxu1 %v7344_v14  ;;  %v4155_v8 = vld [vmem:[#allocation8 + $0x10] sm:$0xff]  ;;  %v4154_v14 = vld [vmem:[#allocation8 + $0x8] sm:$0xff] }
 0xe34   :  { %4010 = vmatpush1.msra.mxu0 %v7345_v10  ;;  %4081 = vmatpush1.msra.mxu1 %v7346_v36  ;;  %v4153_v10 = vld [vmem:[#allocation8] sm:$0xff]  ;;  %v7361_v36 = vld [vmem:[#allocation57_spill] sm:$0xff] }
 0xe35   :  { %4011 = vmatprep.subr.mxu0 %v7347_v37  ;;  %4082 = vmatprep.subr.mxu1 %v7348_v39  ;;  %v2547_v37 = vadd.f32 %v7361_v36, %v7356_v53 }
 0xe36   :  { %4012 = vmatpush1.msra.mxu0 %v7349_v40  ;;  %4083 = vmatpush1.msra.mxu1 %v7350_v41  ;;  %v7362_v40 = vld [vmem:[#allocation61_spill] sm:$0xff] }
 0xe37   :  { %4013 = vmatprep.subr.mxu0 %v7351_v42  ;;  %4084 = vmatprep.subr.mxu1 %v7352_v43  ;;  %v2549_v41 = vadd.f32 %v7362_v40, %v6105_v62 }
 0xe38   :  { %4014 = vmatpush1.msra.mxu0 %v7353_v46  ;;  %4047 = vmatprep.mubr.f32.mxu0 %v7354_v47 }
 0xe39   :  { %4085 = vmatpush1.msra.mxu1 %v7355_v27  ;;  %4118 = vmatprep.mubr.f32.mxu1 %v7354_v47 }
 0xe3a   :  { %4320 = vmatprep.subr.mxu0 %v7354_v47 }
 0xed9   :  { %v3875_v59 = vpop.f32.mrf.mxu0  ;;  %v3946_v55 = vpop.f32.mrf.mxu1 }
 0xeda   :  { %v3951_v48 = vadd.f32 %v3875_v59, %v2541_v2  ;;  %v3953_v26 = vadd.f32 %v3946_v55, %v2654_v63 }
 0xedb   :  { %v3877_v54 = vpop.f32.mrf.mxu0  ;;  %v3948_v0 = vpop.f32.mrf.mxu1 }
 0xedc   :  { %v4296_v49 = vmul.f32 -1.442695, %v3951_v48  ;;  %v3952_v51 = vadd.f32 %v3877_v54, %v2543_v61  ;;  %v3954_v60 = vadd.f32 %v3948_v0, %v2656_v56  ;;  %v7364_v48 = vld [vmem:[#allocation32_spill] sm:$0xff] }
 0xedd   :  { %v2660_v53 = vadd.f32 %v7364_v48, %v6122_v13 }
 0xede   :  { %4588 = vpow2.f32 %v4296_v49  ;;  %v4297_v29 = vmul.f32 -1.442695, %v3952_v51  ;;  %v4298_v31 = vmul.f32 -1.442695, %v3954_v60 }
 0xee0   :  { %4590 = vpow2.f32 %v4297_v29 }
 0xee1   :  { %4592 = vtanh.f32 %v3953_v26 }
 0xee2   :  { %4594 = vpow2.f32 %v4298_v31 }
 0xeeb   :  { %v4589_v28 = vpop.eup %4588 }
 0xeec   :  { %v3958_v1 = vadd.f32 1.0, %v4589_v28 }
 0xeed   :  { %v4591_v7 = vpop.eup %4590 }
 0xeee   :  { %4596 = vrcp.f32 %v3958_v1  ;;  %v3964_v24 = vadd.f32 1.0, %v4591_v7  ;;  %v4593_v45 = vpop.eup %4592  ;;  %v4302_v1 = vld [vmem:[%s6759_s5] ss:$0 sm:$0xff] }
 0xeef   :  { %v4595_v20 = vpop.eup %4594 }
 0xef0   :  { %4598 = vrcp.f32 %v3964_v24  ;;  %v3971_v44 = vadd.f32 1.0, %v4595_v20 }
 0xef2   :  { %4600 = vrcp.f32 %v3971_v44 }
 0xefb   :  { %v4597_v19 = vpop.eup %4596 }
 0xefc   :  { %v3975_v9 = vmul.f32 %v4597_v19, %v4593_v45 }
 0xefd   :  { %v4599_v58 = vpop.eup %4598 }
 0xefe   :  { %v3974_v34 = vmul.f32 %v4599_v58, %v6643_v33  ;;  %v4165_v33 = vld [vmem:[#allocation8 + $0x60] sm:$0xff] }
 0xeff   :  { %v4601_v38 = vpop.eup %4600 }
 0xf00   :  { %v6720_v35 = vadd.f32 %v3975_v9, %v3974_v34 }
 0xf02   :  { %4602 = vtanh.f32 %v6720_v35 }
 0xf0f   :  { %v4603_v17 = vpop.eup %4602 }
 0xf10   :  { %v3978_v32 = vmul.f32 %v4603_v17, %v4601_v38 }
 0xf12   :  { %4048 = vmatmul.mubr.f32.vlgmr.msra.gmra.mxu0 %v3978_v32  ;;  %4119 = vmatmul.mubr.f32.vlgmr.msra.gmra.mxu1 %v3978_v32 }
 0xf13   :  { %4321 = vmatpush3.msra.mxu0 %v4168_v21  ;;  %4352 = vmatprep.mubr.msk.f32.mxu0 %vm4756_vm0, %v7354_v47 }
 0xf14   :  { %4322 = vmatprep.subr.mxu0 %v7354_v47 }
 0xf15   :  { %4323 = vmatpush3.msra.mxu0 %v4167_v30 }
 0xf16   :  { %4324 = vmatprep.subr.mxu0 %v7354_v47 }
 0xf17   :  { %4325 = vmatpush3.msra.mxu0 %v4166_v25 }
 0xf18   :  { %4326 = vmatprep.subr.mxu0 %v7354_v47 }
 0xf19   :  { %4327 = vmatpush3.msra.mxu0 %v4165_v33 }
 0xf1a   :  { %4328 = vmatprep.subr.mxu0 %v7354_v47 }
 0xf1b   :  { %4329 = vmatpush3.msra.mxu0 %v4164_v52 }
 0xf1c   :  { %4330 = vmatprep.subr.mxu0 %v7354_v47 }
 0xf1d   :  { %4331 = vmatpush3.msra.mxu0 %v4163_v23 }
 0xf1e   :  { %4332 = vmatprep.subr.mxu0 %v7354_v47 }
 0xf1f   :  { %4333 = vmatpush3.msra.mxu0 %v4162_v15 }
 0xf20   :  { %4334 = vmatprep.subr.mxu0 %v7354_v47 }
 0xf21   :  { %4335 = vmatpush3.msra.mxu0 %v4161_v22 }
 0xf22   :  { %4336 = vmatprep.subr.mxu0 %v7354_v47 }
 0xf23   :  { %4337 = vmatpush3.msra.mxu0 %v4160_v12 }
 0xf24   :  { %4338 = vmatprep.subr.mxu0 %v7354_v47 }
 0xf25   :  { %4339 = vmatpush3.msra.mxu0 %v4159_v6 }
 0xf26   :  { %4340 = vmatprep.subr.mxu0 %v7354_v47 }
 0xf27   :  { %4341 = vmatpush3.msra.mxu0 %v4158_v16 }
 0xf28   :  { %4342 = vmatprep.subr.mxu0 %v7354_v47 }
 0xf29   :  { %4343 = vmatpush3.msra.mxu0 %v4157_v4 }
 0xf2a   :  { %4344 = vmatprep.subr.mxu0 %v7354_v47 }
 0xf2b   :  { %4345 = vmatpush3.msra.mxu0 %v4156_v5 }
 0xf2c   :  { %4346 = vmatprep.subr.mxu0 %v7354_v47 }
 0xf2d   :  { %4347 = vmatpush3.msra.mxu0 %v4155_v8 }
 0xf2e   :  { %4348 = vmatprep.subr.mxu0 %v7354_v47 }
 0xf2f   :  { %4349 = vmatpush3.msra.mxu0 %v4154_v14 }
 0xf30   :  { %4350 = vmatprep.subr.mxu0 %v7354_v47  ;;  %v2662_v47 = vadd.f32 %v7363_v11, %v7229_v18 }
 0xf31   :  { %4351 = vmatpush3.msra.mxu0 %v4153_v10 }
 0xfd2   :  { %v4049_v39 = vpop.f32.mrf.mxu0  ;;  %v4120_v50 = vpop.f32.mrf.mxu1 }
 0xfd3   :  { %v4125_v42 = vadd.f32 %v4049_v39, %v2547_v37  ;;  %v4127_v54 = vadd.f32 %v4120_v50, %v2660_v53 }
 0xfd4   :  { %v4051_v43 = vpop.f32.mrf.mxu0  ;;  %v4122_v59 = vpop.f32.mrf.mxu1 }
 0xfd5   :  { %v4299_v46 = vmul.f32 -1.442695, %v4125_v42  ;;  %v4126_v27 = vadd.f32 %v4051_v43, %v2549_v41  ;;  %v4128_v61 = vadd.f32 %v4122_v59, %v2662_v47 }
 0xfd7   :  { %4604 = vpow2.f32 %v4299_v46  ;;  %v4300_v2 = vmul.f32 -1.442695, %v4126_v27  ;;  %v4301_v49 = vmul.f32 -1.442695, %v4128_v61 }
 0xfd9   :  { %4606 = vpow2.f32 %v4300_v2 }
 0xfda   :  { %4608 = vtanh.f32 %v4127_v54 }
 0xfdb   :  { %4610 = vpow2.f32 %v4301_v49 }
 0xfe4   :  { %v4605_v51 = vpop.eup %4604 }
 0xfe5   :  { %v4132_v62 = vadd.f32 1.0, %v4605_v51 }
 0xfe6   :  { %v4607_v55 = vpop.eup %4606 }
 0xfe7   :  { %4612 = vrcp.f32 %v4132_v62  ;;  %v4138_v29 = vadd.f32 1.0, %v4607_v55  ;;  %v4609_v0 = vpop.eup %4608 }
 0xfe8   :  { %v4611_v57 = vpop.eup %4610 }
 0xfe9   :  { %4614 = vrcp.f32 %v4138_v29  ;;  %v4145_v18 = vadd.f32 1.0, %v4611_v57 }
 0xfeb   :  { %4616 = vrcp.f32 %v4145_v18 }
 0xff4   :  { %v4613_v56 = vpop.eup %4612 }
 0xff5   :  { %v4149_v60 = vmul.f32 %v4613_v56, %v4609_v0 }
 0xff6   :  { %v4615_v3 = vpop.eup %4614 }
 0xff7   :  { %v4148_v63 = vmul.f32 %v4615_v3, %v6720_v35 }
 0xff8   :  { %v4617_v13 = vpop.eup %4616 }
 0xff9   :  { %v4150_v26 = vadd.f32 %v4149_v60, %v4148_v63 }
 0xffb   :  { %4618 = vtanh.f32 %v4150_v26 }
0x1008   :  { %v4619_v31 = vpop.eup %4618 }
0x1009   :  { %v4152_v28 = vmul.f32 %v4619_v31, %v4617_v13 }
0x100b   :  { %4353 = vmatmul.mubr.f32.vlgmr.msra.gmra.mxu0 %v4152_v28 }
0x10cb   :  { %v4242_v7 = vpop.f32.mrf.mxu0 }
0x10cc   :  { %v4243_v24 = vadd.f32 %v4302_v1, %v4242_v7 }
0x10cd   :  { %v4354_v45 = vpop.f32.mrf.mxu0 }
0x10ce   :  { %4246 = vst [vmem:[%s6760_s6] sm:$0xff] %v4243_v24 }
0x10cf   :  { %4251 = vsyncpa [#allocation5], 1 }
0x10d0   :  { %4252 = vsyncpa [#allocation7], 1 }

</bundles_post_ra>
